<compile_context>
chip_gen: v5e
topology: v5e:2x2
jax: 0.10.0
libtpu: 0.0.40
codegen_flags: <defaults>
</compile_context>

<pallas_src>
import functools

import jax
import jax.numpy as jnp
from jax.experimental import pallas as pl
from jax.experimental.pallas import tpu as pltpu

LANE = 128
TILE_B = 128      # raise to 256-512 on v5e/v6e; keep n_tiles >= 2 on v7x
N_CHUNKS = 2      # in-kernel M-split so MXU and EUP overlap across chunks


def _ceil_to(x, m):
    return (x + m - 1) // m * m


def vae_kernel(x_ref, noise_ref, w_ref, b_ref, wh_ref, bh_ref,
               loss_ref, recon_ref, *, latent_dim, n_chunks):
    tile_b = x_ref.shape[0]
    d_pad = wh_ref.shape[0]
    chunk = tile_b // n_chunks

    def lin(h, w, b):
        # bf16 x bf16 on the MXU with f32 accumulation; f32 bias add on the VPU.
        return jnp.dot(h.astype(jnp.bfloat16), w,
                       preferred_element_type=jnp.float32) + b

    def silu(h):
        # h * sigmoid(h) == 0.5 * h * (tanh(h/2) + 1): one EUP transcendental.
        return 0.5 * h * (jnp.tanh(0.5 * h) + 1.0)

    def softplus(h):
        # numerically-stable single-branch softplus
        return jnp.maximum(h, 0.0) + jnp.log1p(jnp.exp(-jnp.abs(h)))

    def run_chunk(c):
        rows = pl.ds(c * chunk, chunk)
        x = x_ref[rows, :].astype(jnp.float32)                # (chunk, D_pad)

        # ---------------- encoder ----------------
        h = x
        for i in range(4):                                    # hidden layers
            h = silu(lin(h, w_ref[i], b_ref[i]))
        head = lin(h, wh_ref[...], bh_ref[...])               # (chunk, 2*D_pad)
        mu = head[:, :d_pad]                                  # lane-aligned slice
        logvar = head[:, d_pad:]
        scale = softplus(logvar) + 1e-8                       # diag of scale_tril

        # ------------- reparameterize (rsample) -------------
        # padded mu/noise lanes are exactly 0, so padded z lanes are 0 too
        z = mu + scale * noise_ref[rows, :].astype(jnp.float32)

        # ---------------- decoder ----------------
        h = z
        for i in range(4, 8):
            h = silu(lin(h, w_ref[i], b_ref[i]))
        recon = lin(h, w_ref[8], b_ref[8])                    # (chunk, D_pad)

        # ------------- losses (lane reduce first, skinny transpose after) -----
        diff = recon - x                                      # padded lanes == 0
        rec = jnp.sqrt(jnp.sum(diff * diff, axis=1, keepdims=True)).T  # (1, chunk)

        lane = jax.lax.broadcasted_iota(jnp.int32, scale.shape, 1)
        kl_terms = jnp.where(lane < latent_dim,
                             scale * scale + mu * mu - 2.0 * jnp.log(scale),
                             0.0)                             # mask padded lanes
        kl = 0.5 * (jnp.sum(kl_terms, axis=1, keepdims=True).T
                    - jnp.float32(latent_dim))                # (1, chunk)
        return rec, rec + kl

    rec_rows, loss_rows = [], []
    for c in range(n_chunks):        # unrolled at trace time; chunks interleave
        rec, loss = run_chunk(c)
        rec_rows.append(rec)
        loss_rows.append(loss)
    recon_ref[...] = jnp.concatenate(rec_rows, axis=1)        # (1, TILE_B)
    loss_ref[...] = jnp.concatenate(loss_rows, axis=1)        # lane-dense stores


def init_params(key, input_dim, hidden_dim, latent_dim):
    """PyTorch-style Linear init; weights stored as (in_features, out_features)."""
    h = hidden_dim
    enc = [input_dim, h, h // 2, h // 4, h // 8, 2 * latent_dim]
    dec = [latent_dim, h // 8, h // 4, h // 2, h, input_dim]
    weights, biases = [], []
    for dims in (enc, dec):
        for i in range(len(dims) - 1):
            fan_in, fan_out = dims[i], dims[i + 1]
            key, kw, kb = jax.random.split(key, 3)
            bound = 1.0 / (fan_in ** 0.5)
            weights.append(jax.random.uniform(kw, (fan_in, fan_out), jnp.float32, -bound, bound))
            biases.append(jax.random.uniform(kb, (fan_out,), jnp.float32, -bound, bound))
    return weights, biases


def prepare_params(weights, biases, input_dim, hidden_dim, latent_dim):
    """Zero-pad every layer to one common lane-multiple square shape
    (semantics-preserving for Linear+SiLU chains), stack the 9 square layers,
    and keep the encoder head merged as a single (D_pad, 2*D_pad) matmul."""
    d_pad = _ceil_to(max(input_dim, hidden_dim, latent_dim), LANE)

    def pad_w(w):
        return jnp.pad(w, ((0, d_pad - w.shape[0]), (0, d_pad - w.shape[1])))

    def pad_b(b):
        return jnp.pad(b, (0, d_pad - b.shape[0]))

    sq_idx = [0, 1, 2, 3, 5, 6, 7, 8, 9]          # all layers except encoder head
    w_stack = jnp.stack([pad_w(weights[i]) for i in sq_idx]).astype(jnp.bfloat16)
    b_stack = jnp.stack([pad_b(biases[i])[None, :] for i in sq_idx]).astype(jnp.float32)

    wh, bh = weights[4], biases[4]                # encoder head -> [mu | logvar]
    w_head = jnp.concatenate([pad_w(wh[:, :latent_dim]),
                              pad_w(wh[:, latent_dim:])], axis=1).astype(jnp.bfloat16)
    b_head = jnp.concatenate([pad_b(bh[:latent_dim]),
                              pad_b(bh[latent_dim:])])[None, :].astype(jnp.float32)
    return w_stack, b_stack, w_head, b_head


@functools.partial(jax.jit, static_argnames=("input_dim", "latent_dim"))
def vae_forward(x, noise, w_stack, b_stack, w_head, b_head, *, input_dim, latent_dim):
    B = x.shape[0]
    n_layers, d_pad, _ = w_stack.shape
    B_pad = _ceil_to(max(B, TILE_B), TILE_B)
    n_tiles = B_pad // TILE_B

    x_pad = jnp.pad(x.astype(jnp.float32),
                    ((0, B_pad - B), (0, d_pad - input_dim)))
    noise_pad = jnp.pad(noise.astype(jnp.float32),
                        ((0, B_pad - B), (0, d_pad - latent_dim)))

    kernel = functools.partial(vae_kernel, latent_dim=latent_dim, n_chunks=N_CHUNKS)

    data_spec = pl.BlockSpec((TILE_B, d_pad), lambda i: (i, 0))
    in_specs = [
        data_spec,                                                    # x tile
        data_spec,                                                    # noise tile
        pl.BlockSpec((n_layers, d_pad, d_pad), lambda i: (0, 0, 0)),  # stacked W
        pl.BlockSpec((n_layers, 1, d_pad), lambda i: (0, 0, 0)),      # stacked b
        pl.BlockSpec((d_pad, 2 * d_pad), lambda i: (0, 0)),           # merged head W
        pl.BlockSpec((1, 2 * d_pad), lambda i: (0, 0)),               # merged head b
    ]
    out_spec = pl.BlockSpec((1, TILE_B), lambda i: (0, i))

    loss_row, recon_row = pl.pallas_call(
        kernel,
        grid=(n_tiles,),
        in_specs=in_specs,
        out_specs=(out_spec, out_spec),
        out_shape=(jax.ShapeDtypeStruct((1, B_pad), jnp.float32),
                   jax.ShapeDtypeStruct((1, B_pad), jnp.float32)),
        compiler_params=pltpu.CompilerParams(
            dimension_semantics=("parallel",)),
    )(x_pad, noise_pad, w_stack, b_stack, w_head, b_head)

    loss = loss_row[0, :B]                 # drop padded batch columns (no-op reshape)
    loss_recon = recon_row[0, :B]
    return jnp.mean(loss), loss_recon


if __name__ == "__main__":
    B, INPUT_DIM, HIDDEN_DIM, LATENT_DIM = 256, 64, 32, 4

    key = jax.random.PRNGKey(0)
    k_x, k_noise, k_params = jax.random.split(key, 3)

    x = jax.random.normal(k_x, (B, INPUT_DIM), jnp.float32)
    # deterministic standard-normal draw used by dist.rsample()
    # TODO(synk): could be generated in-kernel via pltpu.prng_seed/prng_random_bits
    # (stateful_normal) with a per-tile seed; kept external so the
    # reparameterization noise stays reproducible for reference checks.
    noise = jax.random.normal(k_noise, (B, LATENT_DIM), jnp.float32)

    weights, biases = init_params(k_params, INPUT_DIM, HIDDEN_DIM, LATENT_DIM)
    w_stack, b_stack, w_head, b_head = prepare_params(
        weights, biases, INPUT_DIM, HIDDEN_DIM, LATENT_DIM)

    loss_mean, loss_recon = vae_forward(
        x, noise, w_stack, b_stack, w_head, b_head,
        input_dim=INPUT_DIM, latent_dim=LATENT_DIM)
    jax.block_until_ready((loss_mean, loss_recon))

    assert loss_mean.shape == ()
    assert loss_recon.shape == (B,)
    assert bool(jnp.isfinite(loss_mean)) and bool(jnp.all(jnp.isfinite(loss_recon)))
    print("KERNEL_OK")
</pallas_src>

<mosaic_0001>
module attributes {stable_mosaic.version = 11 : i64} {
  func.func @vae_kernel(%arg0: i32, %arg1: memref<128x128xf32, #tpu.memory_space<vmem>>, %arg2: memref<128x128xf32, #tpu.memory_space<vmem>>, %arg3: memref<9x128x128xbf16, #tpu.memory_space<vmem>>, %arg4: memref<9x1x128xf32, #tpu.memory_space<vmem>>, %arg5: memref<128x256xbf16, #tpu.memory_space<vmem>>, %arg6: memref<1x256xf32, #tpu.memory_space<vmem>>, %arg7: memref<1x128xf32, #tpu.memory_space<vmem>>, %arg8: memref<1x128xf32, #tpu.memory_space<vmem>>) attributes {dimension_semantics = [#tpu.dimension_semantics<parallel>], iteration_bounds = array<i64: 2>, scalar_prefetch = 0 : i64, scratch_operands = 0 : i64, tpu.core_type = #tpu.core_type<tc>, window_params = [{transform_indices = @transform_0, window_bounds = array<i64: 128, 128>}, {transform_indices = @transform_1, window_bounds = array<i64: 128, 128>}, {pipeline_mode = #tpu.pipeline_mode<synchronous>, transform_indices = @transform_2, window_bounds = array<i64: 9, 128, 128>}, {pipeline_mode = #tpu.pipeline_mode<synchronous>, transform_indices = @transform_3, window_bounds = array<i64: 9, 1, 128>}, {pipeline_mode = #tpu.pipeline_mode<synchronous>, transform_indices = @transform_4, window_bounds = array<i64: 128, 256>}, {pipeline_mode = #tpu.pipeline_mode<synchronous>, transform_indices = @transform_5, window_bounds = array<i64: 1, 256>}, {transform_indices = @transform_6, window_bounds = array<i64: 1, 128>}, {transform_indices = @transform_7, window_bounds = array<i64: 1, 128>}]} {
    %c0 = arith.constant 0 : index
    %c0_0 = arith.constant 0 : index
    %0 = vector.load %arg1[%c0, %c0_0] : memref<128x128xf32, #tpu.memory_space<vmem>>, vector<64x128xf32>
    %c0_1 = arith.constant 0 : index
    %c0_2 = arith.constant 0 : index
    %c0_3 = arith.constant 0 : index
    %1 = vector.load %arg3[%c0_1, %c0_2, %c0_3] : memref<9x128x128xbf16, #tpu.memory_space<vmem>>, vector<1x128x128xbf16>
    %2 = vector.shape_cast %1 : vector<1x128x128xbf16> to vector<128x128xbf16>
    %c0_4 = arith.constant 0 : index
    %c0_5 = arith.constant 0 : index
    %c0_6 = arith.constant 0 : index
    %3 = vector.load %arg4[%c0_4, %c0_5, %c0_6] : memref<9x1x128xf32, #tpu.memory_space<vmem>>, vector<1x1x128xf32>
    %4 = vector.shape_cast %3 : vector<1x1x128xf32> to vector<1x128xf32>
    %5 = arith.truncf %0 : vector<64x128xf32> to vector<64x128xbf16>
    %cst = arith.constant dense<0.000000e+00> : vector<64x128xf32>
    %6 = tpu.matmul %5, %2, %cst {dimension_numbers = #tpu.dot_dimension_numbers<[1], [0], [0], [1], [0, 0, 1, 1], [], []>} : vector<64x128xbf16>, vector<128x128xbf16>, vector<64x128xf32> -> vector<64x128xf32>
    %7 = vector.broadcast %4 : vector<1x128xf32> to vector<64x128xf32>
    %8 = arith.addf %6, %7 : vector<64x128xf32>
    %cst_7 = arith.constant 5.000000e-01 : f32
    %9 = vector.broadcast %cst_7 : f32 to vector<64x128xf32>
    %10 = arith.mulf %9, %8 : vector<64x128xf32>
    %cst_8 = arith.constant 5.000000e-01 : f32
    %11 = vector.broadcast %cst_8 : f32 to vector<64x128xf32>
    %12 = arith.mulf %11, %8 : vector<64x128xf32>
    %13 = math.tanh %12 : vector<64x128xf32>
    %cst_9 = arith.constant 1.000000e+00 : f32
    %14 = vector.broadcast %cst_9 : f32 to vector<64x128xf32>
    %15 = arith.addf %13, %14 : vector<64x128xf32>
    %16 = arith.mulf %10, %15 : vector<64x128xf32>
    %c1 = arith.constant 1 : index
    %c0_10 = arith.constant 0 : index
    %c0_11 = arith.constant 0 : index
    %17 = vector.load %arg3[%c1, %c0_10, %c0_11] : memref<9x128x128xbf16, #tpu.memory_space<vmem>>, vector<1x128x128xbf16>
    %18 = vector.shape_cast %17 : vector<1x128x128xbf16> to vector<128x128xbf16>
    %c1_12 = arith.constant 1 : index
    %c0_13 = arith.constant 0 : index
    %c0_14 = arith.constant 0 : index
    %19 = vector.load %arg4[%c1_12, %c0_13, %c0_14] : memref<9x1x128xf32, #tpu.memory_space<vmem>>, vector<1x1x128xf32>
    %20 = vector.shape_cast %19 : vector<1x1x128xf32> to vector<1x128xf32>
    %21 = arith.truncf %16 : vector<64x128xf32> to vector<64x128xbf16>
    %cst_15 = arith.constant dense<0.000000e+00> : vector<64x128xf32>
    %22 = tpu.matmul %21, %18, %cst_15 {dimension_numbers = #tpu.dot_dimension_numbers<[1], [0], [0], [1], [0, 0, 1, 1], [], []>} : vector<64x128xbf16>, vector<128x128xbf16>, vector<64x128xf32> -> vector<64x128xf32>
    %23 = vector.broadcast %20 : vector<1x128xf32> to vector<64x128xf32>
    %24 = arith.addf %22, %23 : vector<64x128xf32>
    %cst_16 = arith.constant 5.000000e-01 : f32
    %25 = vector.broadcast %cst_16 : f32 to vector<64x128xf32>
    %26 = arith.mulf %25, %24 : vector<64x128xf32>
    %cst_17 = arith.constant 5.000000e-01 : f32
    %27 = vector.broadcast %cst_17 : f32 to vector<64x128xf32>
    %28 = arith.mulf %27, %24 : vector<64x128xf32>
    %29 = math.tanh %28 : vector<64x128xf32>
    %cst_18 = arith.constant 1.000000e+00 : f32
    %30 = vector.broadcast %cst_18 : f32 to vector<64x128xf32>
    %31 = arith.addf %29, %30 : vector<64x128xf32>
    %32 = arith.mulf %26, %31 : vector<64x128xf32>
    %c2 = arith.constant 2 : index
    %c0_19 = arith.constant 0 : index
    %c0_20 = arith.constant 0 : index
    %33 = vector.load %arg3[%c2, %c0_19, %c0_20] : memref<9x128x128xbf16, #tpu.memory_space<vmem>>, vector<1x128x128xbf16>
    %34 = vector.shape_cast %33 : vector<1x128x128xbf16> to vector<128x128xbf16>
    %c2_21 = arith.constant 2 : index
    %c0_22 = arith.constant 0 : index
    %c0_23 = arith.constant 0 : index
    %35 = vector.load %arg4[%c2_21, %c0_22, %c0_23] : memref<9x1x128xf32, #tpu.memory_space<vmem>>, vector<1x1x128xf32>
    %36 = vector.shape_cast %35 : vector<1x1x128xf32> to vector<1x128xf32>
    %37 = arith.truncf %32 : vector<64x128xf32> to vector<64x128xbf16>
    %cst_24 = arith.constant dense<0.000000e+00> : vector<64x128xf32>
    %38 = tpu.matmul %37, %34, %cst_24 {dimension_numbers = #tpu.dot_dimension_numbers<[1], [0], [0], [1], [0, 0, 1, 1], [], []>} : vector<64x128xbf16>, vector<128x128xbf16>, vector<64x128xf32> -> vector<64x128xf32>
    %39 = vector.broadcast %36 : vector<1x128xf32> to vector<64x128xf32>
    %40 = arith.addf %38, %39 : vector<64x128xf32>
    %cst_25 = arith.constant 5.000000e-01 : f32
    %41 = vector.broadcast %cst_25 : f32 to vector<64x128xf32>
    %42 = arith.mulf %41, %40 : vector<64x128xf32>
    %cst_26 = arith.constant 5.000000e-01 : f32
    %43 = vector.broadcast %cst_26 : f32 to vector<64x128xf32>
    %44 = arith.mulf %43, %40 : vector<64x128xf32>
    %45 = math.tanh %44 : vector<64x128xf32>
    %cst_27 = arith.constant 1.000000e+00 : f32
    %46 = vector.broadcast %cst_27 : f32 to vector<64x128xf32>
    %47 = arith.addf %45, %46 : vector<64x128xf32>
    %48 = arith.mulf %42, %47 : vector<64x128xf32>
    %c3 = arith.constant 3 : index
    %c0_28 = arith.constant 0 : index
    %c0_29 = arith.constant 0 : index
    %49 = vector.load %arg3[%c3, %c0_28, %c0_29] : memref<9x128x128xbf16, #tpu.memory_space<vmem>>, vector<1x128x128xbf16>
    %50 = vector.shape_cast %49 : vector<1x128x128xbf16> to vector<128x128xbf16>
    %c3_30 = arith.constant 3 : index
    %c0_31 = arith.constant 0 : index
    %c0_32 = arith.constant 0 : index
    %51 = vector.load %arg4[%c3_30, %c0_31, %c0_32] : memref<9x1x128xf32, #tpu.memory_space<vmem>>, vector<1x1x128xf32>
    %52 = vector.shape_cast %51 : vector<1x1x128xf32> to vector<1x128xf32>
    %53 = arith.truncf %48 : vector<64x128xf32> to vector<64x128xbf16>
    %cst_33 = arith.constant dense<0.000000e+00> : vector<64x128xf32>
    %54 = tpu.matmul %53, %50, %cst_33 {dimension_numbers = #tpu.dot_dimension_numbers<[1], [0], [0], [1], [0, 0, 1, 1], [], []>} : vector<64x128xbf16>, vector<128x128xbf16>, vector<64x128xf32> -> vector<64x128xf32>
    %55 = vector.broadcast %52 : vector<1x128xf32> to vector<64x128xf32>
    %56 = arith.addf %54, %55 : vector<64x128xf32>
    %cst_34 = arith.constant 5.000000e-01 : f32
    %57 = vector.broadcast %cst_34 : f32 to vector<64x128xf32>
    %58 = arith.mulf %57, %56 : vector<64x128xf32>
    %cst_35 = arith.constant 5.000000e-01 : f32
    %59 = vector.broadcast %cst_35 : f32 to vector<64x128xf32>
    %60 = arith.mulf %59, %56 : vector<64x128xf32>
    %61 = math.tanh %60 : vector<64x128xf32>
    %cst_36 = arith.constant 1.000000e+00 : f32
    %62 = vector.broadcast %cst_36 : f32 to vector<64x128xf32>
    %63 = arith.addf %61, %62 : vector<64x128xf32>
    %64 = arith.mulf %58, %63 : vector<64x128xf32>
    %c0_37 = arith.constant 0 : index
    %c0_38 = arith.constant 0 : index
    %65 = vector.load %arg5[%c0_37, %c0_38] : memref<128x256xbf16, #tpu.memory_space<vmem>>, vector<128x256xbf16>
    %c0_39 = arith.constant 0 : index
    %c0_40 = arith.constant 0 : index
    %66 = vector.load %arg6[%c0_39, %c0_40] : memref<1x256xf32, #tpu.memory_space<vmem>>, vector<1x256xf32>
    %67 = arith.truncf %64 : vector<64x128xf32> to vector<64x128xbf16>
    %cst_41 = arith.constant dense<0.000000e+00> : vector<64x256xf32>
    %68 = tpu.matmul %67, %65, %cst_41 {dimension_numbers = #tpu.dot_dimension_numbers<[1], [0], [0], [1], [0, 0, 1, 1], [], []>} : vector<64x128xbf16>, vector<128x256xbf16>, vector<64x256xf32> -> vector<64x256xf32>
    %69 = vector.broadcast %66 : vector<1x256xf32> to vector<64x256xf32>
    %70 = arith.addf %68, %69 : vector<64x256xf32>
    %71 = vector.extract_strided_slice %70 {offsets = [0, 0], sizes = [64, 128], strides = [1, 1]} : vector<64x256xf32> to vector<64x128xf32>
    %72 = vector.extract_strided_slice %70 {offsets = [0, 128], sizes = [64, 128], strides = [1, 1]} : vector<64x256xf32> to vector<64x128xf32>
    %cst_42 = arith.constant 0.000000e+00 : f32
    %73 = vector.broadcast %cst_42 : f32 to vector<64x128xf32>
    %74 = arith.maximumf %72, %73 : vector<64x128xf32>
    %75 = math.absf %72 : vector<64x128xf32>
    %cst_43 = arith.constant 0.000000e+00 : f32
    %76 = vector.broadcast %cst_43 : f32 to vector<64x128xf32>
    %77 = arith.subf %76, %75 : vector<64x128xf32>
    %78 = math.exp %77 : vector<64x128xf32>
    %79 = math.log1p %78 : vector<64x128xf32>
    %80 = arith.addf %74, %79 : vector<64x128xf32>
    %cst_44 = arith.constant 9.99999993E-9 : f32
    %81 = vector.broadcast %cst_44 : f32 to vector<64x128xf32>
    %82 = arith.addf %80, %81 : vector<64x128xf32>
    %c0_45 = arith.constant 0 : index
    %c0_46 = arith.constant 0 : index
    %83 = vector.load %arg2[%c0_45, %c0_46] : memref<128x128xf32, #tpu.memory_space<vmem>>, vector<64x128xf32>
    %84 = arith.mulf %82, %83 : vector<64x128xf32>
    %85 = arith.addf %71, %84 : vector<64x128xf32>
    %c4 = arith.constant 4 : index
    %c0_47 = arith.constant 0 : index
    %c0_48 = arith.constant 0 : index
    %86 = vector.load %arg3[%c4, %c0_47, %c0_48] : memref<9x128x128xbf16, #tpu.memory_space<vmem>>, vector<1x128x128xbf16>
    %87 = vector.shape_cast %86 : vector<1x128x128xbf16> to vector<128x128xbf16>
    %c4_49 = arith.constant 4 : index
    %c0_50 = arith.constant 0 : index
    %c0_51 = arith.constant 0 : index
    %88 = vector.load %arg4[%c4_49, %c0_50, %c0_51] : memref<9x1x128xf32, #tpu.memory_space<vmem>>, vector<1x1x128xf32>
    %89 = vector.shape_cast %88 : vector<1x1x128xf32> to vector<1x128xf32>
    %90 = arith.truncf %85 : vector<64x128xf32> to vector<64x128xbf16>
    %cst_52 = arith.constant dense<0.000000e+00> : vector<64x128xf32>
    %91 = tpu.matmul %90, %87, %cst_52 {dimension_numbers = #tpu.dot_dimension_numbers<[1], [0], [0], [1], [0, 0, 1, 1], [], []>} : vector<64x128xbf16>, vector<128x128xbf16>, vector<64x128xf32> -> vector<64x128xf32>
    %92 = vector.broadcast %89 : vector<1x128xf32> to vector<64x128xf32>
    %93 = arith.addf %91, %92 : vector<64x128xf32>
    %cst_53 = arith.constant 5.000000e-01 : f32
    %94 = vector.broadcast %cst_53 : f32 to vector<64x128xf32>
    %95 = arith.mulf %94, %93 : vector<64x128xf32>
    %cst_54 = arith.constant 5.000000e-01 : f32
    %96 = vector.broadcast %cst_54 : f32 to vector<64x128xf32>
    %97 = arith.mulf %96, %93 : vector<64x128xf32>
    %98 = math.tanh %97 : vector<64x128xf32>
    %cst_55 = arith.constant 1.000000e+00 : f32
    %99 = vector.broadcast %cst_55 : f32 to vector<64x128xf32>
    %100 = arith.addf %98, %99 : vector<64x128xf32>
    %101 = arith.mulf %95, %100 : vector<64x128xf32>
    %c5 = arith.constant 5 : index
    %c0_56 = arith.constant 0 : index
    %c0_57 = arith.constant 0 : index
    %102 = vector.load %arg3[%c5, %c0_56, %c0_57] : memref<9x128x128xbf16, #tpu.memory_space<vmem>>, vector<1x128x128xbf16>
    %103 = vector.shape_cast %102 : vector<1x128x128xbf16> to vector<128x128xbf16>
    %c5_58 = arith.constant 5 : index
    %c0_59 = arith.constant 0 : index
    %c0_60 = arith.constant 0 : index
    %104 = vector.load %arg4[%c5_58, %c0_59, %c0_60] : memref<9x1x128xf32, #tpu.memory_space<vmem>>, vector<1x1x128xf32>
    %105 = vector.shape_cast %104 : vector<1x1x128xf32> to vector<1x128xf32>
    %106 = arith.truncf %101 : vector<64x128xf32> to vector<64x128xbf16>
    %cst_61 = arith.constant dense<0.000000e+00> : vector<64x128xf32>
    %107 = tpu.matmul %106, %103, %cst_61 {dimension_numbers = #tpu.dot_dimension_numbers<[1], [0], [0], [1], [0, 0, 1, 1], [], []>} : vector<64x128xbf16>, vector<128x128xbf16>, vector<64x128xf32> -> vector<64x128xf32>
    %108 = vector.broadcast %105 : vector<1x128xf32> to vector<64x128xf32>
    %109 = arith.addf %107, %108 : vector<64x128xf32>
    %cst_62 = arith.constant 5.000000e-01 : f32
    %110 = vector.broadcast %cst_62 : f32 to vector<64x128xf32>
    %111 = arith.mulf %110, %109 : vector<64x128xf32>
    %cst_63 = arith.constant 5.000000e-01 : f32
    %112 = vector.broadcast %cst_63 : f32 to vector<64x128xf32>
    %113 = arith.mulf %112, %109 : vector<64x128xf32>
    %114 = math.tanh %113 : vector<64x128xf32>
    %cst_64 = arith.constant 1.000000e+00 : f32
    %115 = vector.broadcast %cst_64 : f32 to vector<64x128xf32>
    %116 = arith.addf %114, %115 : vector<64x128xf32>
    %117 = arith.mulf %111, %116 : vector<64x128xf32>
    %c6 = arith.constant 6 : index
    %c0_65 = arith.constant 0 : index
    %c0_66 = arith.constant 0 : index
    %118 = vector.load %arg3[%c6, %c0_65, %c0_66] : memref<9x128x128xbf16, #tpu.memory_space<vmem>>, vector<1x128x128xbf16>
    %119 = vector.shape_cast %118 : vector<1x128x128xbf16> to vector<128x128xbf16>
    %c6_67 = arith.constant 6 : index
    %c0_68 = arith.constant 0 : index
    %c0_69 = arith.constant 0 : index
    %120 = vector.load %arg4[%c6_67, %c0_68, %c0_69] : memref<9x1x128xf32, #tpu.memory_space<vmem>>, vector<1x1x128xf32>
    %121 = vector.shape_cast %120 : vector<1x1x128xf32> to vector<1x128xf32>
    %122 = arith.truncf %117 : vector<64x128xf32> to vector<64x128xbf16>
    %cst_70 = arith.constant dense<0.000000e+00> : vector<64x128xf32>
    %123 = tpu.matmul %122, %119, %cst_70 {dimension_numbers = #tpu.dot_dimension_numbers<[1], [0], [0], [1], [0, 0, 1, 1], [], []>} : vector<64x128xbf16>, vector<128x128xbf16>, vector<64x128xf32> -> vector<64x128xf32>
    %124 = vector.broadcast %121 : vector<1x128xf32> to vector<64x128xf32>
    %125 = arith.addf %123, %124 : vector<64x128xf32>
    %cst_71 = arith.constant 5.000000e-01 : f32
    %126 = vector.broadcast %cst_71 : f32 to vector<64x128xf32>
    %127 = arith.mulf %126, %125 : vector<64x128xf32>
    %cst_72 = arith.constant 5.000000e-01 : f32
    %128 = vector.broadcast %cst_72 : f32 to vector<64x128xf32>
    %129 = arith.mulf %128, %125 : vector<64x128xf32>
    %130 = math.tanh %129 : vector<64x128xf32>
    %cst_73 = arith.constant 1.000000e+00 : f32
    %131 = vector.broadcast %cst_73 : f32 to vector<64x128xf32>
    %132 = arith.addf %130, %131 : vector<64x128xf32>
    %133 = arith.mulf %127, %132 : vector<64x128xf32>
    %c7 = arith.constant 7 : index
    %c0_74 = arith.constant 0 : index
    %c0_75 = arith.constant 0 : index
    %134 = vector.load %arg3[%c7, %c0_74, %c0_75] : memref<9x128x128xbf16, #tpu.memory_space<vmem>>, vector<1x128x128xbf16>
    %135 = vector.shape_cast %134 : vector<1x128x128xbf16> to vector<128x128xbf16>
    %c7_76 = arith.constant 7 : index
    %c0_77 = arith.constant 0 : index
    %c0_78 = arith.constant 0 : index
    %136 = vector.load %arg4[%c7_76, %c0_77, %c0_78] : memref<9x1x128xf32, #tpu.memory_space<vmem>>, vector<1x1x128xf32>
    %137 = vector.shape_cast %136 : vector<1x1x128xf32> to vector<1x128xf32>
    %138 = arith.truncf %133 : vector<64x128xf32> to vector<64x128xbf16>
    %cst_79 = arith.constant dense<0.000000e+00> : vector<64x128xf32>
    %139 = tpu.matmul %138, %135, %cst_79 {dimension_numbers = #tpu.dot_dimension_numbers<[1], [0], [0], [1], [0, 0, 1, 1], [], []>} : vector<64x128xbf16>, vector<128x128xbf16>, vector<64x128xf32> -> vector<64x128xf32>
    %140 = vector.broadcast %137 : vector<1x128xf32> to vector<64x128xf32>
    %141 = arith.addf %139, %140 : vector<64x128xf32>
    %cst_80 = arith.constant 5.000000e-01 : f32
    %142 = vector.broadcast %cst_80 : f32 to vector<64x128xf32>
    %143 = arith.mulf %142, %141 : vector<64x128xf32>
    %cst_81 = arith.constant 5.000000e-01 : f32
    %144 = vector.broadcast %cst_81 : f32 to vector<64x128xf32>
    %145 = arith.mulf %144, %141 : vector<64x128xf32>
    %146 = math.tanh %145 : vector<64x128xf32>
    %cst_82 = arith.constant 1.000000e+00 : f32
    %147 = vector.broadcast %cst_82 : f32 to vector<64x128xf32>
    %148 = arith.addf %146, %147 : vector<64x128xf32>
    %149 = arith.mulf %143, %148 : vector<64x128xf32>
    %c8 = arith.constant 8 : index
    %c0_83 = arith.constant 0 : index
    %c0_84 = arith.constant 0 : index
    %150 = vector.load %arg3[%c8, %c0_83, %c0_84] : memref<9x128x128xbf16, #tpu.memory_space<vmem>>, vector<1x128x128xbf16>
    %151 = vector.shape_cast %150 : vector<1x128x128xbf16> to vector<128x128xbf16>
    %c8_85 = arith.constant 8 : index
    %c0_86 = arith.constant 0 : index
    %c0_87 = arith.constant 0 : index
    %152 = vector.load %arg4[%c8_85, %c0_86, %c0_87] : memref<9x1x128xf32, #tpu.memory_space<vmem>>, vector<1x1x128xf32>
    %153 = vector.shape_cast %152 : vector<1x1x128xf32> to vector<1x128xf32>
    %154 = arith.truncf %149 : vector<64x128xf32> to vector<64x128xbf16>
    %cst_88 = arith.constant dense<0.000000e+00> : vector<64x128xf32>
    %155 = tpu.matmul %154, %151, %cst_88 {dimension_numbers = #tpu.dot_dimension_numbers<[1], [0], [0], [1], [0, 0, 1, 1], [], []>} : vector<64x128xbf16>, vector<128x128xbf16>, vector<64x128xf32> -> vector<64x128xf32>
    %156 = vector.broadcast %153 : vector<1x128xf32> to vector<64x128xf32>
    %157 = arith.addf %155, %156 : vector<64x128xf32>
    %158 = arith.subf %157, %0 : vector<64x128xf32>
    %159 = arith.mulf %158, %158 : vector<64x128xf32>
    %cst_89 = arith.constant dense<0.000000e+00> : vector<64xf32>
    %160 = vector.multi_reduction <add>, %159, %cst_89 [1] : vector<64x128xf32> to vector<64xf32>
    %161 = vector.shape_cast %160 : vector<64xf32> to vector<64x1xf32>
    %162 = math.sqrt %161 : vector<64x1xf32>
    %163 = tpu.transpose %162, [1, 0] : vector<64x1xf32> -> vector<1x64xf32>
    %164 = tpu.iota {dimensions = array<i32: 1>} : vector<64x128xi32>
    %c4_i32 = arith.constant 4 : i32
    %165 = vector.broadcast %c4_i32 : i32 to vector<64x128xi32>
    %166 = arith.cmpi slt, %164, %165 : vector<64x128xi32>
    %167 = arith.mulf %82, %82 : vector<64x128xf32>
    %168 = arith.mulf %71, %71 : vector<64x128xf32>
    %169 = arith.addf %167, %168 : vector<64x128xf32>
    %170 = math.log %82 : vector<64x128xf32>
    %cst_90 = arith.constant 2.000000e+00 : f32
    %171 = vector.broadcast %cst_90 : f32 to vector<64x128xf32>
    %172 = arith.mulf %171, %170 : vector<64x128xf32>
    %173 = arith.subf %169, %172 : vector<64x128xf32>
    %cst_91 = arith.constant 0.000000e+00 : f32
    %174 = vector.broadcast %cst_91 : f32 to vector<64x128xf32>
    %175 = arith.select %166, %173, %174 : vector<64x128xi1>, vector<64x128xf32>
    %cst_92 = arith.constant dense<0.000000e+00> : vector<64xf32>
    %176 = vector.multi_reduction <add>, %175, %cst_92 [1] : vector<64x128xf32> to vector<64xf32>
    %177 = vector.shape_cast %176 : vector<64xf32> to vector<64x1xf32>
    %178 = tpu.transpose %177, [1, 0] : vector<64x1xf32> -> vector<1x64xf32>
    %cst_93 = arith.constant 4.000000e+00 : f32
    %179 = vector.broadcast %cst_93 : f32 to vector<1x64xf32>
    %180 = arith.subf %178, %179 : vector<1x64xf32>
    %cst_94 = arith.constant 5.000000e-01 : f32
    %181 = vector.broadcast %cst_94 : f32 to vector<1x64xf32>
    %182 = arith.mulf %181, %180 : vector<1x64xf32>
    %183 = arith.addf %163, %182 : vector<1x64xf32>
    %c64 = arith.constant 64 : index
    %c0_95 = arith.constant 0 : index
    %184 = vector.load %arg1[%c64, %c0_95] : memref<128x128xf32, #tpu.memory_space<vmem>>, vector<64x128xf32>
    %c0_96 = arith.constant 0 : index
    %c0_97 = arith.constant 0 : index
    %c0_98 = arith.constant 0 : index
    %185 = vector.load %arg3[%c0_96, %c0_97, %c0_98] : memref<9x128x128xbf16, #tpu.memory_space<vmem>>, vector<1x128x128xbf16>
    %186 = vector.shape_cast %185 : vector<1x128x128xbf16> to vector<128x128xbf16>
    %c0_99 = arith.constant 0 : index
    %c0_100 = arith.constant 0 : index
    %c0_101 = arith.constant 0 : index
    %187 = vector.load %arg4[%c0_99, %c0_100, %c0_101] : memref<9x1x128xf32, #tpu.memory_space<vmem>>, vector<1x1x128xf32>
    %188 = vector.shape_cast %187 : vector<1x1x128xf32> to vector<1x128xf32>
    %189 = arith.truncf %184 : vector<64x128xf32> to vector<64x128xbf16>
    %cst_102 = arith.constant dense<0.000000e+00> : vector<64x128xf32>
    %190 = tpu.matmul %189, %186, %cst_102 {dimension_numbers = #tpu.dot_dimension_numbers<[1], [0], [0], [1], [0, 0, 1, 1], [], []>} : vector<64x128xbf16>, vector<128x128xbf16>, vector<64x128xf32> -> vector<64x128xf32>
    %191 = vector.broadcast %188 : vector<1x128xf32> to vector<64x128xf32>
    %192 = arith.addf %190, %191 : vector<64x128xf32>
    %cst_103 = arith.constant 5.000000e-01 : f32
    %193 = vector.broadcast %cst_103 : f32 to vector<64x128xf32>
    %194 = arith.mulf %193, %192 : vector<64x128xf32>
    %cst_104 = arith.constant 5.000000e-01 : f32
    %195 = vector.broadcast %cst_104 : f32 to vector<64x128xf32>
    %196 = arith.mulf %195, %192 : vector<64x128xf32>
    %197 = math.tanh %196 : vector<64x128xf32>
    %cst_105 = arith.constant 1.000000e+00 : f32
    %198 = vector.broadcast %cst_105 : f32 to vector<64x128xf32>
    %199 = arith.addf %197, %198 : vector<64x128xf32>
    %200 = arith.mulf %194, %199 : vector<64x128xf32>
    %c1_106 = arith.constant 1 : index
    %c0_107 = arith.constant 0 : index
    %c0_108 = arith.constant 0 : index
    %201 = vector.load %arg3[%c1_106, %c0_107, %c0_108] : memref<9x128x128xbf16, #tpu.memory_space<vmem>>, vector<1x128x128xbf16>
    %202 = vector.shape_cast %201 : vector<1x128x128xbf16> to vector<128x128xbf16>
    %c1_109 = arith.constant 1 : index
    %c0_110 = arith.constant 0 : index
    %c0_111 = arith.constant 0 : index
    %203 = vector.load %arg4[%c1_109, %c0_110, %c0_111] : memref<9x1x128xf32, #tpu.memory_space<vmem>>, vector<1x1x128xf32>
    %204 = vector.shape_cast %203 : vector<1x1x128xf32> to vector<1x128xf32>
    %205 = arith.truncf %200 : vector<64x128xf32> to vector<64x128xbf16>
    %cst_112 = arith.constant dense<0.000000e+00> : vector<64x128xf32>
    %206 = tpu.matmul %205, %202, %cst_112 {dimension_numbers = #tpu.dot_dimension_numbers<[1], [0], [0], [1], [0, 0, 1, 1], [], []>} : vector<64x128xbf16>, vector<128x128xbf16>, vector<64x128xf32> -> vector<64x128xf32>
    %207 = vector.broadcast %204 : vector<1x128xf32> to vector<64x128xf32>
    %208 = arith.addf %206, %207 : vector<64x128xf32>
    %cst_113 = arith.constant 5.000000e-01 : f32
    %209 = vector.broadcast %cst_113 : f32 to vector<64x128xf32>
    %210 = arith.mulf %209, %208 : vector<64x128xf32>
    %cst_114 = arith.constant 5.000000e-01 : f32
    %211 = vector.broadcast %cst_114 : f32 to vector<64x128xf32>
    %212 = arith.mulf %211, %208 : vector<64x128xf32>
    %213 = math.tanh %212 : vector<64x128xf32>
    %cst_115 = arith.constant 1.000000e+00 : f32
    %214 = vector.broadcast %cst_115 : f32 to vector<64x128xf32>
    %215 = arith.addf %213, %214 : vector<64x128xf32>
    %216 = arith.mulf %210, %215 : vector<64x128xf32>
    %c2_116 = arith.constant 2 : index
    %c0_117 = arith.constant 0 : index
    %c0_118 = arith.constant 0 : index
    %217 = vector.load %arg3[%c2_116, %c0_117, %c0_118] : memref<9x128x128xbf16, #tpu.memory_space<vmem>>, vector<1x128x128xbf16>
    %218 = vector.shape_cast %217 : vector<1x128x128xbf16> to vector<128x128xbf16>
    %c2_119 = arith.constant 2 : index
    %c0_120 = arith.constant 0 : index
    %c0_121 = arith.constant 0 : index
    %219 = vector.load %arg4[%c2_119, %c0_120, %c0_121] : memref<9x1x128xf32, #tpu.memory_space<vmem>>, vector<1x1x128xf32>
    %220 = vector.shape_cast %219 : vector<1x1x128xf32> to vector<1x128xf32>
    %221 = arith.truncf %216 : vector<64x128xf32> to vector<64x128xbf16>
    %cst_122 = arith.constant dense<0.000000e+00> : vector<64x128xf32>
    %222 = tpu.matmul %221, %218, %cst_122 {dimension_numbers = #tpu.dot_dimension_numbers<[1], [0], [0], [1], [0, 0, 1, 1], [], []>} : vector<64x128xbf16>, vector<128x128xbf16>, vector<64x128xf32> -> vector<64x128xf32>
    %223 = vector.broadcast %220 : vector<1x128xf32> to vector<64x128xf32>
    %224 = arith.addf %222, %223 : vector<64x128xf32>
    %cst_123 = arith.constant 5.000000e-01 : f32
    %225 = vector.broadcast %cst_123 : f32 to vector<64x128xf32>
    %226 = arith.mulf %225, %224 : vector<64x128xf32>
    %cst_124 = arith.constant 5.000000e-01 : f32
    %227 = vector.broadcast %cst_124 : f32 to vector<64x128xf32>
    %228 = arith.mulf %227, %224 : vector<64x128xf32>
    %229 = math.tanh %228 : vector<64x128xf32>
    %cst_125 = arith.constant 1.000000e+00 : f32
    %230 = vector.broadcast %cst_125 : f32 to vector<64x128xf32>
    %231 = arith.addf %229, %230 : vector<64x128xf32>
    %232 = arith.mulf %226, %231 : vector<64x128xf32>
    %c3_126 = arith.constant 3 : index
    %c0_127 = arith.constant 0 : index
    %c0_128 = arith.constant 0 : index
    %233 = vector.load %arg3[%c3_126, %c0_127, %c0_128] : memref<9x128x128xbf16, #tpu.memory_space<vmem>>, vector<1x128x128xbf16>
    %234 = vector.shape_cast %233 : vector<1x128x128xbf16> to vector<128x128xbf16>
    %c3_129 = arith.constant 3 : index
    %c0_130 = arith.constant 0 : index
    %c0_131 = arith.constant 0 : index
    %235 = vector.load %arg4[%c3_129, %c0_130, %c0_131] : memref<9x1x128xf32, #tpu.memory_space<vmem>>, vector<1x1x128xf32>
    %236 = vector.shape_cast %235 : vector<1x1x128xf32> to vector<1x128xf32>
    %237 = arith.truncf %232 : vector<64x128xf32> to vector<64x128xbf16>
    %cst_132 = arith.constant dense<0.000000e+00> : vector<64x128xf32>
    %238 = tpu.matmul %237, %234, %cst_132 {dimension_numbers = #tpu.dot_dimension_numbers<[1], [0], [0], [1], [0, 0, 1, 1], [], []>} : vector<64x128xbf16>, vector<128x128xbf16>, vector<64x128xf32> -> vector<64x128xf32>
    %239 = vector.broadcast %236 : vector<1x128xf32> to vector<64x128xf32>
    %240 = arith.addf %238, %239 : vector<64x128xf32>
    %cst_133 = arith.constant 5.000000e-01 : f32
    %241 = vector.broadcast %cst_133 : f32 to vector<64x128xf32>
    %242 = arith.mulf %241, %240 : vector<64x128xf32>
    %cst_134 = arith.constant 5.000000e-01 : f32
    %243 = vector.broadcast %cst_134 : f32 to vector<64x128xf32>
    %244 = arith.mulf %243, %240 : vector<64x128xf32>
    %245 = math.tanh %244 : vector<64x128xf32>
    %cst_135 = arith.constant 1.000000e+00 : f32
    %246 = vector.broadcast %cst_135 : f32 to vector<64x128xf32>
    %247 = arith.addf %245, %246 : vector<64x128xf32>
    %248 = arith.mulf %242, %247 : vector<64x128xf32>
    %c0_136 = arith.constant 0 : index
    %c0_137 = arith.constant 0 : index
    %249 = vector.load %arg5[%c0_136, %c0_137] : memref<128x256xbf16, #tpu.memory_space<vmem>>, vector<128x256xbf16>
    %c0_138 = arith.constant 0 : index
    %c0_139 = arith.constant 0 : index
    %250 = vector.load %arg6[%c0_138, %c0_139] : memref<1x256xf32, #tpu.memory_space<vmem>>, vector<1x256xf32>
    %251 = arith.truncf %248 : vector<64x128xf32> to vector<64x128xbf16>
    %cst_140 = arith.constant dense<0.000000e+00> : vector<64x256xf32>
    %252 = tpu.matmul %251, %249, %cst_140 {dimension_numbers = #tpu.dot_dimension_numbers<[1], [0], [0], [1], [0, 0, 1, 1], [], []>} : vector<64x128xbf16>, vector<128x256xbf16>, vector<64x256xf32> -> vector<64x256xf32>
    %253 = vector.broadcast %250 : vector<1x256xf32> to vector<64x256xf32>
    %254 = arith.addf %252, %253 : vector<64x256xf32>
    %255 = vector.extract_strided_slice %254 {offsets = [0, 0], sizes = [64, 128], strides = [1, 1]} : vector<64x256xf32> to vector<64x128xf32>
    %256 = vector.extract_strided_slice %254 {offsets = [0, 128], sizes = [64, 128], strides = [1, 1]} : vector<64x256xf32> to vector<64x128xf32>
    %cst_141 = arith.constant 0.000000e+00 : f32
    %257 = vector.broadcast %cst_141 : f32 to vector<64x128xf32>
    %258 = arith.maximumf %256, %257 : vector<64x128xf32>
    %259 = math.absf %256 : vector<64x128xf32>
    %cst_142 = arith.constant 0.000000e+00 : f32
    %260 = vector.broadcast %cst_142 : f32 to vector<64x128xf32>
    %261 = arith.subf %260, %259 : vector<64x128xf32>
    %262 = math.exp %261 : vector<64x128xf32>
    %263 = math.log1p %262 : vector<64x128xf32>
    %264 = arith.addf %258, %263 : vector<64x128xf32>
    %cst_143 = arith.constant 9.99999993E-9 : f32
    %265 = vector.broadcast %cst_143 : f32 to vector<64x128xf32>
    %266 = arith.addf %264, %265 : vector<64x128xf32>
    %c64_144 = arith.constant 64 : index
    %c0_145 = arith.constant 0 : index
    %267 = vector.load %arg2[%c64_144, %c0_145] : memref<128x128xf32, #tpu.memory_space<vmem>>, vector<64x128xf32>
    %268 = arith.mulf %266, %267 : vector<64x128xf32>
    %269 = arith.addf %255, %268 : vector<64x128xf32>
    %c4_146 = arith.constant 4 : index
    %c0_147 = arith.constant 0 : index
    %c0_148 = arith.constant 0 : index
    %270 = vector.load %arg3[%c4_146, %c0_147, %c0_148] : memref<9x128x128xbf16, #tpu.memory_space<vmem>>, vector<1x128x128xbf16>
    %271 = vector.shape_cast %270 : vector<1x128x128xbf16> to vector<128x128xbf16>
    %c4_149 = arith.constant 4 : index
    %c0_150 = arith.constant 0 : index
    %c0_151 = arith.constant 0 : index
    %272 = vector.load %arg4[%c4_149, %c0_150, %c0_151] : memref<9x1x128xf32, #tpu.memory_space<vmem>>, vector<1x1x128xf32>
    %273 = vector.shape_cast %272 : vector<1x1x128xf32> to vector<1x128xf32>
    %274 = arith.truncf %269 : vector<64x128xf32> to vector<64x128xbf16>
    %cst_152 = arith.constant dense<0.000000e+00> : vector<64x128xf32>
    %275 = tpu.matmul %274, %271, %cst_152 {dimension_numbers = #tpu.dot_dimension_numbers<[1], [0], [0], [1], [0, 0, 1, 1], [], []>} : vector<64x128xbf16>, vector<128x128xbf16>, vector<64x128xf32> -> vector<64x128xf32>
    %276 = vector.broadcast %273 : vector<1x128xf32> to vector<64x128xf32>
    %277 = arith.addf %275, %276 : vector<64x128xf32>
    %cst_153 = arith.constant 5.000000e-01 : f32
    %278 = vector.broadcast %cst_153 : f32 to vector<64x128xf32>
    %279 = arith.mulf %278, %277 : vector<64x128xf32>
    %cst_154 = arith.constant 5.000000e-01 : f32
    %280 = vector.broadcast %cst_154 : f32 to vector<64x128xf32>
    %281 = arith.mulf %280, %277 : vector<64x128xf32>
    %282 = math.tanh %281 : vector<64x128xf32>
    %cst_155 = arith.constant 1.000000e+00 : f32
    %283 = vector.broadcast %cst_155 : f32 to vector<64x128xf32>
    %284 = arith.addf %282, %283 : vector<64x128xf32>
    %285 = arith.mulf %279, %284 : vector<64x128xf32>
    %c5_156 = arith.constant 5 : index
    %c0_157 = arith.constant 0 : index
    %c0_158 = arith.constant 0 : index
    %286 = vector.load %arg3[%c5_156, %c0_157, %c0_158] : memref<9x128x128xbf16, #tpu.memory_space<vmem>>, vector<1x128x128xbf16>
    %287 = vector.shape_cast %286 : vector<1x128x128xbf16> to vector<128x128xbf16>
    %c5_159 = arith.constant 5 : index
    %c0_160 = arith.constant 0 : index
    %c0_161 = arith.constant 0 : index
    %288 = vector.load %arg4[%c5_159, %c0_160, %c0_161] : memref<9x1x128xf32, #tpu.memory_space<vmem>>, vector<1x1x128xf32>
    %289 = vector.shape_cast %288 : vector<1x1x128xf32> to vector<1x128xf32>
    %290 = arith.truncf %285 : vector<64x128xf32> to vector<64x128xbf16>
    %cst_162 = arith.constant dense<0.000000e+00> : vector<64x128xf32>
    %291 = tpu.matmul %290, %287, %cst_162 {dimension_numbers = #tpu.dot_dimension_numbers<[1], [0], [0], [1], [0, 0, 1, 1], [], []>} : vector<64x128xbf16>, vector<128x128xbf16>, vector<64x128xf32> -> vector<64x128xf32>
    %292 = vector.broadcast %289 : vector<1x128xf32> to vector<64x128xf32>
    %293 = arith.addf %291, %292 : vector<64x128xf32>
    %cst_163 = arith.constant 5.000000e-01 : f32
    %294 = vector.broadcast %cst_163 : f32 to vector<64x128xf32>
    %295 = arith.mulf %294, %293 : vector<64x128xf32>
    %cst_164 = arith.constant 5.000000e-01 : f32
    %296 = vector.broadcast %cst_164 : f32 to vector<64x128xf32>
    %297 = arith.mulf %296, %293 : vector<64x128xf32>
    %298 = math.tanh %297 : vector<64x128xf32>
    %cst_165 = arith.constant 1.000000e+00 : f32
    %299 = vector.broadcast %cst_165 : f32 to vector<64x128xf32>
    %300 = arith.addf %298, %299 : vector<64x128xf32>
    %301 = arith.mulf %295, %300 : vector<64x128xf32>
    %c6_166 = arith.constant 6 : index
    %c0_167 = arith.constant 0 : index
    %c0_168 = arith.constant 0 : index
    %302 = vector.load %arg3[%c6_166, %c0_167, %c0_168] : memref<9x128x128xbf16, #tpu.memory_space<vmem>>, vector<1x128x128xbf16>
    %303 = vector.shape_cast %302 : vector<1x128x128xbf16> to vector<128x128xbf16>
    %c6_169 = arith.constant 6 : index
    %c0_170 = arith.constant 0 : index
    %c0_171 = arith.constant 0 : index
    %304 = vector.load %arg4[%c6_169, %c0_170, %c0_171] : memref<9x1x128xf32, #tpu.memory_space<vmem>>, vector<1x1x128xf32>
    %305 = vector.shape_cast %304 : vector<1x1x128xf32> to vector<1x128xf32>
    %306 = arith.truncf %301 : vector<64x128xf32> to vector<64x128xbf16>
    %cst_172 = arith.constant dense<0.000000e+00> : vector<64x128xf32>
    %307 = tpu.matmul %306, %303, %cst_172 {dimension_numbers = #tpu.dot_dimension_numbers<[1], [0], [0], [1], [0, 0, 1, 1], [], []>} : vector<64x128xbf16>, vector<128x128xbf16>, vector<64x128xf32> -> vector<64x128xf32>
    %308 = vector.broadcast %305 : vector<1x128xf32> to vector<64x128xf32>
    %309 = arith.addf %307, %308 : vector<64x128xf32>
    %cst_173 = arith.constant 5.000000e-01 : f32
    %310 = vector.broadcast %cst_173 : f32 to vector<64x128xf32>
    %311 = arith.mulf %310, %309 : vector<64x128xf32>
    %cst_174 = arith.constant 5.000000e-01 : f32
    %312 = vector.broadcast %cst_174 : f32 to vector<64x128xf32>
    %313 = arith.mulf %312, %309 : vector<64x128xf32>
    %314 = math.tanh %313 : vector<64x128xf32>
    %cst_175 = arith.constant 1.000000e+00 : f32
    %315 = vector.broadcast %cst_175 : f32 to vector<64x128xf32>
    %316 = arith.addf %314, %315 : vector<64x128xf32>
    %317 = arith.mulf %311, %316 : vector<64x128xf32>
    %c7_176 = arith.constant 7 : index
    %c0_177 = arith.constant 0 : index
    %c0_178 = arith.constant 0 : index
    %318 = vector.load %arg3[%c7_176, %c0_177, %c0_178] : memref<9x128x128xbf16, #tpu.memory_space<vmem>>, vector<1x128x128xbf16>
    %319 = vector.shape_cast %318 : vector<1x128x128xbf16> to vector<128x128xbf16>
    %c7_179 = arith.constant 7 : index
    %c0_180 = arith.constant 0 : index
    %c0_181 = arith.constant 0 : index
    %320 = vector.load %arg4[%c7_179, %c0_180, %c0_181] : memref<9x1x128xf32, #tpu.memory_space<vmem>>, vector<1x1x128xf32>
    %321 = vector.shape_cast %320 : vector<1x1x128xf32> to vector<1x128xf32>
    %322 = arith.truncf %317 : vector<64x128xf32> to vector<64x128xbf16>
    %cst_182 = arith.constant dense<0.000000e+00> : vector<64x128xf32>
    %323 = tpu.matmul %322, %319, %cst_182 {dimension_numbers = #tpu.dot_dimension_numbers<[1], [0], [0], [1], [0, 0, 1, 1], [], []>} : vector<64x128xbf16>, vector<128x128xbf16>, vector<64x128xf32> -> vector<64x128xf32>
    %324 = vector.broadcast %321 : vector<1x128xf32> to vector<64x128xf32>
    %325 = arith.addf %323, %324 : vector<64x128xf32>
    %cst_183 = arith.constant 5.000000e-01 : f32
    %326 = vector.broadcast %cst_183 : f32 to vector<64x128xf32>
    %327 = arith.mulf %326, %325 : vector<64x128xf32>
    %cst_184 = arith.constant 5.000000e-01 : f32
    %328 = vector.broadcast %cst_184 : f32 to vector<64x128xf32>
    %329 = arith.mulf %328, %325 : vector<64x128xf32>
    %330 = math.tanh %329 : vector<64x128xf32>
    %cst_185 = arith.constant 1.000000e+00 : f32
    %331 = vector.broadcast %cst_185 : f32 to vector<64x128xf32>
    %332 = arith.addf %330, %331 : vector<64x128xf32>
    %333 = arith.mulf %327, %332 : vector<64x128xf32>
    %c8_186 = arith.constant 8 : index
    %c0_187 = arith.constant 0 : index
    %c0_188 = arith.constant 0 : index
    %334 = vector.load %arg3[%c8_186, %c0_187, %c0_188] : memref<9x128x128xbf16, #tpu.memory_space<vmem>>, vector<1x128x128xbf16>
    %335 = vector.shape_cast %334 : vector<1x128x128xbf16> to vector<128x128xbf16>
    %c8_189 = arith.constant 8 : index
    %c0_190 = arith.constant 0 : index
    %c0_191 = arith.constant 0 : index
    %336 = vector.load %arg4[%c8_189, %c0_190, %c0_191] : memref<9x1x128xf32, #tpu.memory_space<vmem>>, vector<1x1x128xf32>
    %337 = vector.shape_cast %336 : vector<1x1x128xf32> to vector<1x128xf32>
    %338 = arith.truncf %333 : vector<64x128xf32> to vector<64x128xbf16>
    %cst_192 = arith.constant dense<0.000000e+00> : vector<64x128xf32>
    %339 = tpu.matmul %338, %335, %cst_192 {dimension_numbers = #tpu.dot_dimension_numbers<[1], [0], [0], [1], [0, 0, 1, 1], [], []>} : vector<64x128xbf16>, vector<128x128xbf16>, vector<64x128xf32> -> vector<64x128xf32>
    %340 = vector.broadcast %337 : vector<1x128xf32> to vector<64x128xf32>
    %341 = arith.addf %339, %340 : vector<64x128xf32>
    %342 = arith.subf %341, %184 : vector<64x128xf32>
    %343 = arith.mulf %342, %342 : vector<64x128xf32>
    %cst_193 = arith.constant dense<0.000000e+00> : vector<64xf32>
    %344 = vector.multi_reduction <add>, %343, %cst_193 [1] : vector<64x128xf32> to vector<64xf32>
    %345 = vector.shape_cast %344 : vector<64xf32> to vector<64x1xf32>
    %346 = math.sqrt %345 : vector<64x1xf32>
    %347 = tpu.transpose %346, [1, 0] : vector<64x1xf32> -> vector<1x64xf32>
    %348 = tpu.iota {dimensions = array<i32: 1>} : vector<64x128xi32>
    %c4_i32_194 = arith.constant 4 : i32
    %349 = vector.broadcast %c4_i32_194 : i32 to vector<64x128xi32>
    %350 = arith.cmpi slt, %348, %349 : vector<64x128xi32>
    %351 = arith.mulf %266, %266 : vector<64x128xf32>
    %352 = arith.mulf %255, %255 : vector<64x128xf32>
    %353 = arith.addf %351, %352 : vector<64x128xf32>
    %354 = math.log %266 : vector<64x128xf32>
    %cst_195 = arith.constant 2.000000e+00 : f32
    %355 = vector.broadcast %cst_195 : f32 to vector<64x128xf32>
    %356 = arith.mulf %355, %354 : vector<64x128xf32>
    %357 = arith.subf %353, %356 : vector<64x128xf32>
    %cst_196 = arith.constant 0.000000e+00 : f32
    %358 = vector.broadcast %cst_196 : f32 to vector<64x128xf32>
    %359 = arith.select %350, %357, %358 : vector<64x128xi1>, vector<64x128xf32>
    %cst_197 = arith.constant dense<0.000000e+00> : vector<64xf32>
    %360 = vector.multi_reduction <add>, %359, %cst_197 [1] : vector<64x128xf32> to vector<64xf32>
    %361 = vector.shape_cast %360 : vector<64xf32> to vector<64x1xf32>
    %362 = tpu.transpose %361, [1, 0] : vector<64x1xf32> -> vector<1x64xf32>
    %cst_198 = arith.constant 4.000000e+00 : f32
    %363 = vector.broadcast %cst_198 : f32 to vector<1x64xf32>
    %364 = arith.subf %362, %363 : vector<1x64xf32>
    %cst_199 = arith.constant 5.000000e-01 : f32
    %365 = vector.broadcast %cst_199 : f32 to vector<1x64xf32>
    %366 = arith.mulf %365, %364 : vector<1x64xf32>
    %367 = arith.addf %347, %366 : vector<1x64xf32>
    %368 = tpu.concatenate %163, %347 in 1 : vector<1x64xf32>, vector<1x64xf32> -> vector<1x128xf32>
    %c0_200 = arith.constant 0 : index
    %c0_201 = arith.constant 0 : index
    %369 = vector.load %arg8[%c0_200, %c0_201] : memref<1x128xf32, #tpu.memory_space<vmem>>, vector<1x128xf32>
    tpu.vector_store %arg8[%c0_200, %c0_201], %368 {strides = array<i32>} : memref<1x128xf32, #tpu.memory_space<vmem>>, vector<1x128xf32>,
    %370 = tpu.concatenate %183, %367 in 1 : vector<1x64xf32>, vector<1x64xf32> -> vector<1x128xf32>
    %c0_202 = arith.constant 0 : index
    %c0_203 = arith.constant 0 : index
    %371 = vector.load %arg7[%c0_202, %c0_203] : memref<1x128xf32, #tpu.memory_space<vmem>>, vector<1x128xf32>
    tpu.vector_store %arg7[%c0_202, %c0_203], %370 {strides = array<i32>} : memref<1x128xf32, #tpu.memory_space<vmem>>, vector<1x128xf32>,
    return
  }
  func.func @transform_0(%arg0: i32) -> (i32, i32) {
    %c0_i32 = arith.constant 0 : i32
    %c0_i32_0 = arith.constant 0 : i32
    return %arg0, %c0_i32 : i32, i32
  }
  func.func @transform_1(%arg0: i32) -> (i32, i32) {
    %c0_i32 = arith.constant 0 : i32
    %c0_i32_0 = arith.constant 0 : i32
    return %arg0, %c0_i32 : i32, i32
  }
  func.func @transform_2(%arg0: i32) -> (i32, i32, i32) {
    %c0_i32 = arith.constant 0 : i32
    %c0_i32_0 = arith.constant 0 : i32
    %c0_i32_1 = arith.constant 0 : i32
    %c0_i32_2 = arith.constant 0 : i32
    return %c0_i32, %c0_i32_0, %c0_i32_1 : i32, i32, i32
  }
  func.func @transform_3(%arg0: i32) -> (i32, i32, i32) {
    %c0_i32 = arith.constant 0 : i32
    %c0_i32_0 = arith.constant 0 : i32
    %c0_i32_1 = arith.constant 0 : i32
    %c0_i32_2 = arith.constant 0 : i32
    return %c0_i32, %c0_i32_0, %c0_i32_1 : i32, i32, i32
  }
  func.func @transform_4(%arg0: i32) -> (i32, i32) {
    %c0_i32 = arith.constant 0 : i32
    %c0_i32_0 = arith.constant 0 : i32
    %c0_i32_1 = arith.constant 0 : i32
    return %c0_i32, %c0_i32_0 : i32, i32
  }
  func.func @transform_5(%arg0: i32) -> (i32, i32) {
    %c0_i32 = arith.constant 0 : i32
    %c0_i32_0 = arith.constant 0 : i32
    %c0_i32_1 = arith.constant 0 : i32
    return %c0_i32, %c0_i32_0 : i32, i32
  }
  func.func @transform_6(%arg0: i32) -> (i32, i32) {
    %c0_i32 = arith.constant 0 : i32
    %c0_i32_0 = arith.constant 0 : i32
    return %c0_i32, %arg0 : i32, i32
  }
  func.func @transform_7(%arg0: i32) -> (i32, i32) {
    %c0_i32 = arith.constant 0 : i32
    %c0_i32_0 = arith.constant 0 : i32
    return %c0_i32, %arg0 : i32, i32
  }
}

</mosaic_0001>

<bundles_post_ra>
// kernel: vae_forward.1
= control target key start
LH: loop header
LB: loop body
LE: loop exit
PB: predicated region body
PF: predicated region fallthrough
CT: control target
= control target key end

     0   :  { %13 = vsyncpa [#allocation3], 0  ;;  %s5426_s0 = inlined_call_operand.vmem [shape: f32[256,128], index: 0, kind: input, shape index: {}]   ;;  %s5427_s1 = inlined_call_operand.vmem [shape: f32[256,128], index: 1, kind: input, shape index: {}]   ;;  %s5428_s2 = inlined_call_operand.vmem [shape: bf16[9,128,128], index: 2, kind: input, shape index: {}]   ;;  %s5429_s3 = inlined_call_operand.vmem [shape: f32[9,1,128], index: 3, kind: input, shape index: {}]   ;;  %s5430_s4 = inlined_call_operand.vmem [shape: bf16[128,256], index: 4, kind: input, shape index: {}]   ;;  %s5431_s5 = inlined_call_operand.vmem [shape: f32[1,256], index: 5, kind: input, shape index: {}]   ;;  %s5432_s6 = inlined_call_operand.vmem [shape: f32[1,256], index: 6, kind: output, shape index: {0}]   ;;  %s5433_s7 = inlined_call_operand.hbm [shape: f32[1,256], index: 7, kind: output, shape index: {1}]  }
   0x1   :  { %15 = vsyncpa [#allocation3 + $0x1], 0  ;;  %s4476_s24 = smov 0   ;;  %s4478_s25 = smov 0  }
   0x2   :  { %s4480_s26 = smov 0   ;;  %s4482_s27 = smov 0  }
   0x3 LB: > { %s4497_s28 = sadd.s32 4294967295, %s4433_s27   ;;  %s3260_s29 = sadd.s32 4294967294, %s4433_s27   ;;  %s4433_s27 = sphi %s4482_s27, %s5441_s27   ;;  %s4429_s26 = sphi %s4480_s26, %s5440_s26   ;;  %s4425_s25 = sphi %s4478_s25, %s5439_s25   ;;  %s4421_s24 = sphi %s4476_s24, %s5438_s24  }
   0x4   : > { %s4501_s30 = sadd.s32 1, %s4433_s27   ;;  %s190_s8 = sadd.s32 1, %s4429_s26 }
   0x5   : > { %s187_s9 = ssub.s32 %s4433_s27, %s4501_s30  ;;  %p200_p0 = scmp.ne.s32.totalorder %s4429_s26, %s4425_s25 }
   0x6   : > { %p188_p1 = scmp.eq.s32.totalorder %s187_s9, 0  ;;  %p201_p2 = scmp.eq.s32.totalorder %s4497_s28, 1 }
   0x7   : > { %p206_p3 = scmp.ne.s32.totalorder %s4425_s25, %s4421_s24  ;;  %p207_p4 = scmp.eq.s32.totalorder %s3260_s29, 1 }
   0x8   : > { %s4512_s10 = scalar_select %p188_p1, %s4429_s26, %s190_s8  }
   0x9   : > { %p4514_p5 = por %p201_p2, %p200_p0  ;;  %p4518_p6 = por %p207_p4, %p206_p3 }
   0xa   : > { %p3263_p7 = scmp.ge.s32.totalorder %s4433_s27, 1  ;;  %p255_p8 = scmp.lt.s32.totalorder %s4433_s27, 3 }
   0xc   : > { %p256_p9 = pnand %p3263_p7, %p255_p8 }
   0xd   : > { %s3264_s19 = sshll.u32 (!%p256_p9), %s4497_s28, 4  ;;  %s292_s29 = sand.u32 (!%p256_p9), 1, %s4425_s25  }
   0xe   : > { %259 = sbr.rel (%p256_p9) target bundleno = 3004 (0xbbc), region = 44  ;;  %p295_p10 = scmp.lt.s32.totalorder (!%p256_p9), %s3264_s19, 31 }
   0xf   : > { %s293_s13 = scalar_lea.vmem (!%p256_p9), [#allocation2], %s292_s29  ;;  %s4391_s23 = scalar_lea.hbm (!%p256_p9), %s5433_s7, 2 }
  0x10   : > { %s3172_s15 = sshll.u32 (!%p256_p9), %s293_s13, 4  ;;  %s3173_s15 = int_to_ptr.vmem [resolvable:$true] %s3172_s15 }
  0x13   : > { %v3767_v0 = vld [vmem:[%s5428_s2 + $0x38] sm:$0xff]  ;;  %v3766_v1 = vld [vmem:[%s5428_s2 + $0x30] sm:$0xff]  ;;  %v3765_v2 = vld [vmem:[%s5428_s2 + $0x28] sm:$0xff]  ;;  %s5443_s19 = smov (!%p295_p10, %s3264_s19), 31 }
  0x14   : > { %389 = vmatpush.bf16.msra.mxu0 %v3767_v0  ;;  %3848 = vmatpush.bf16.msra.mxu2 %v3767_v0  ;;  %v3764_v3 = vld [vmem:[%s5428_s2 + $0x20] sm:$0xff]  ;;  %v3763_v4 = vld [vmem:[%s5428_s2 + $0x18] sm:$0xff]  ;;  %v3762_v6 = vld [vmem:[%s5428_s2 + $0x10] sm:$0xff]  ;;  %s3265_s14 = sshll.u32 %s5443_s19, 3 }
  0x15   : > { %v3775_v5 = vld [vmem:[%s5428_s2 + $0x78] sm:$0xff]  ;;  %v3774_v7 = vld [vmem:[%s5428_s2 + $0x70] sm:$0xff]  ;;  %v3761_v8 = vld [vmem:[%s5428_s2 + $0x8] sm:$0xff]  ;;  %s4560_s22 = scalar_lea.vmem %s5426_s0, %s3265_s14  ;;  %s4852_s16 = scalar_lea.vmem %s5427_s1, %s3265_s14 }
  0x16   : > { %524 = vmatpush.bf16.msra.mxu1 %v3775_v5  ;;  %3856 = vmatpush.bf16.msra.mxu3 %v3775_v5  ;;  %v3760_v9 = vld [vmem:[%s5428_s2] sm:$0xff]  ;;  %v310_v11 = vld [vmem:[%s4560_s22 + $0x8] sm:$0xff]  ;;  %v311_v16 = vld [vmem:[%s4560_s22 + $0x10] sm:$0xff]  ;;  %s3159_s14 = scalar_lea.sflag [#allocation3], %s292_s29 }
  0x17   : > { %v309_v10 = vld [vmem:[%s4560_s22] sm:$0xff]  ;;  %v314_v13 = vld [vmem:[%s4560_s22 + $0x28] sm:$0xff]  ;;  %v312_v17 = vld [vmem:[%s4560_s22 + $0x18] sm:$0xff] }
  0x18   : > { %390 = vmatpush.bf16.msra.mxu0 %v3766_v1  ;;  %3849 = vmatpush.bf16.msra.mxu2 %v3766_v1  ;;  %v313_v12 = vld [vmem:[%s4560_s22 + $0x20] sm:$0xff]  ;;  %v334_v14 = vpack.c.bf16 %v310_v11, %v309_v10  ;;  %v315_v18 = vld [vmem:[%s4560_s22 + $0x30] sm:$0xff]  ;;  %v316_v19 = vld [vmem:[%s4560_s22 + $0x38] sm:$0xff]  ;;  %v335_v20 = vpack.c.bf16 %v312_v17, %v311_v16 }
  0x19   : > { %v336_v15 = vpack.c.bf16 %v314_v13, %v313_v12  ;;  %v337_v21 = vpack.c.bf16 %v316_v19, %v315_v18  ;;  %v3773_v22 = vld [vmem:[%s5428_s2 + $0x68] sm:$0xff]  ;;  %v3772_v23 = vld [vmem:[%s5428_s2 + $0x60] sm:$0xff]  ;;  %v3771_v24 = vld [vmem:[%s5428_s2 + $0x58] sm:$0xff] }
  0x1a   : > { %525 = vmatpush.bf16.msra.mxu1 %v3774_v7  ;;  %3857 = vmatpush.bf16.msra.mxu3 %v3774_v7  ;;  %v3770_v25 = vld [vmem:[%s5428_s2 + $0x50] sm:$0xff]  ;;  %v3769_v26 = vld [vmem:[%s5428_s2 + $0x48] sm:$0xff]  ;;  %v3768_v27 = vld [vmem:[%s5428_s2 + $0x40] sm:$0xff] }
  0x1b   : > { %v3905_v28 = vld [vmem:[%s5429_s3] ss:$0 sm:$0xff]  ;;  %v3783_v42 = vld [vmem:[%s5428_s2 + $0xb8] sm:$0xff]  ;;  %v3782_v47 = vld [vmem:[%s5428_s2 + $0xb0] sm:$0xff] }
  0x1c   : > { %391 = vmatpush.bf16.msra.mxu0 %v3765_v2  ;;  %3850 = vmatpush.bf16.msra.mxu2 %v3765_v2  ;;  %v3781_v19 = vld [vmem:[%s5428_s2 + $0xa8] sm:$0xff] }
  0x1e   : > { %526 = vmatpush.bf16.msra.mxu1 %v3773_v22  ;;  %3858 = vmatpush.bf16.msra.mxu3 %v3773_v22  ;;  %v3778_v22 = vld [vmem:[%s5428_s2 + $0x90] sm:$0xff] }
  0x20   : > { %392 = vmatpush.bf16.msra.mxu0 %v3764_v3  ;;  %3851 = vmatpush.bf16.msra.mxu2 %v3764_v3 }
  0x22   : > { %527 = vmatpush.bf16.msra.mxu1 %v3772_v23  ;;  %3859 = vmatpush.bf16.msra.mxu3 %v3772_v23  ;;  %v3777_v23 = vld [vmem:[%s5428_s2 + $0x88] sm:$0xff] }
  0x24   : > { %393 = vmatpush.bf16.msra.mxu0 %v3763_v4  ;;  %3852 = vmatpush.bf16.msra.mxu2 %v3763_v4 }
  0x26   : > { %528 = vmatpush.bf16.msra.mxu1 %v3771_v24  ;;  %3860 = vmatpush.bf16.msra.mxu3 %v3771_v24  ;;  %v3776_v24 = vld [vmem:[%s5428_s2 + $0x80] sm:$0xff] }
  0x28   : > { %394 = vmatpush.bf16.msra.mxu0 %v3762_v6  ;;  %3853 = vmatpush.bf16.msra.mxu2 %v3762_v6 }
  0x2a   : > { %529 = vmatpush.bf16.msra.mxu1 %v3770_v25  ;;  %3861 = vmatpush.bf16.msra.mxu3 %v3770_v25  ;;  %v3906_v25 = vld [vmem:[%s5429_s3 + $0x1] ss:$0 sm:$0xff] }
  0x2c   : > { %395 = vmatpush.bf16.msra.mxu0 %v3761_v8  ;;  %3854 = vmatpush.bf16.msra.mxu2 %v3761_v8 }
  0x2e   : > { %530 = vmatpush.bf16.msra.mxu1 %v3769_v26  ;;  %3862 = vmatpush.bf16.msra.mxu3 %v3769_v26 }
  0x30   : > { %396 = vmatpush.bf16.msra.mxu0 %v3760_v9  ;;  %3855 = vmatpush.bf16.msra.mxu2 %v3760_v9 }
  0x32   : > { %531 = vmatpush.bf16.msra.mxu1 %v3768_v27  ;;  %3863 = vmatpush.bf16.msra.mxu3 %v3768_v27 }
  0x33   : > { %397 = vmatmul.bf16.vlgmr.msra.gmra.mxu0 %v334_v14  ;;  %407 = vmatmul.bf16.vlgmr.msra.gmra.mxu2 %v336_v15 }
  0x34   : > { %659 = vmatpush.bf16.msrb.mxu2 %v3783_v42 }
  0x38   : > { %660 = vmatpush.bf16.msrb.mxu2 %v3782_v47 }
  0x3c   : > { %661 = vmatpush.bf16.msrb.mxu2 %v3781_v19  ;;  %v3786_v19 = vld [vmem:[%s5428_s2 + $0xd0] sm:$0xff] }
  0x43   : > { %402 = vmatmul.bf16.gmra.mxu0 %v335_v20  ;;  %412 = vmatmul.bf16.gmra.mxu2 %v337_v21  ;;  %v3780_v20 = vld [vmem:[%s5428_s2 + $0xa0] sm:$0xff]  ;;  %v3779_v21 = vld [vmem:[%s5428_s2 + $0x98] sm:$0xff] }
  0x44   : > { %662 = vmatpush.bf16.msrb.mxu2 %v3780_v20  ;;  %v3785_v20 = vld [vmem:[%s5428_s2 + $0xc8] sm:$0xff] }
  0x48   : > { %663 = vmatpush.bf16.msrb.mxu2 %v3779_v21  ;;  %v3784_v21 = vld [vmem:[%s5428_s2 + $0xc0] sm:$0xff] }
  0x4c   : > { %664 = vmatpush.bf16.msrb.mxu2 %v3778_v22  ;;  %v4648_v22 = vld [vmem:[%s5429_s3 + $0x2] ss:$0 sm:$0xff] }
  0x50   : > { %665 = vmatpush.bf16.msrb.mxu2 %v3777_v23 }
  0x54   : > { %666 = vmatpush.bf16.msrb.mxu2 %v3776_v24 }
  0xb0   : > { %v398_v29 = vpop.f32.mrf.mxu0 }
  0xb1   : > { %v399_v30 = vadd.f32 %v3905_v28, %v398_v29 }
  0xb3   : > { %v418_v31 = vmul.f32 0.5, %v399_v30 }
  0xb5   : > { %3914 = vtanh.f32 %v418_v31 }
  0xb6   : > { %v408_v32 = vpop.f32.mrf.mxu2 }
  0xb7   : > { %v409_v33 = vadd.f32 %v3905_v28, %v408_v32 }
  0xb8   : > { %v400_v34 = vpop.f32.mrf.mxu0 }
  0xb9   : > { %v422_v35 = vmul.f32 0.5, %v409_v33  ;;  %v401_v36 = vadd.f32 %v3905_v28, %v400_v34 }
  0xbb   : > { %v419_v37 = vmul.f32 0.5, %v401_v36  ;;  %3916 = vtanh.f32 %v422_v35  ;;  %v3915_v39 = vpop.eup %3914 }
  0xbc   : > { %v434_v46 = vadd.f32 1.0, %v3915_v39 }
  0xbd   : > { %3918 = vtanh.f32 %v419_v37 }
  0xbe   : > { %v410_v38 = vpop.f32.mrf.mxu2  ;;  %v442_v51 = vmul.f32 %v434_v46, %v418_v31 }
  0xbf   : > { %v411_v40 = vadd.f32 %v3905_v28, %v410_v38 }
  0xc0   : > { %v403_v41 = vpop.f32.mrf.mxu0 }
  0xc1   : > { %v423_v43 = vmul.f32 0.5, %v411_v40  ;;  %v404_v44 = vadd.f32 %v3905_v28, %v403_v41  ;;  %v3917_v45 = vpop.eup %3916 }
  0xc2   : > { %v438_v52 = vadd.f32 1.0, %v3917_v45 }
  0xc3   : > { %v3919_v48 = vpop.eup %3918  ;;  %3920 = vtanh.f32 %v423_v43  ;;  %v420_v50 = vmul.f32 0.5, %v404_v44 }
  0xc4   : > { %v435_v49 = vadd.f32 1.0, %v3919_v48  ;;  %v446_v61 = vmul.f32 %v438_v52, %v422_v35 }
  0xc5   : > { %3922 = vtanh.f32 %v420_v50 }
  0xc6   : > { %v413_v53 = vpop.f32.mrf.mxu2  ;;  %v443_v54 = vmul.f32 %v435_v49, %v419_v37 }
  0xc7   : > { %v414_v55 = vadd.f32 %v3905_v28, %v413_v53 }
  0xc8   : > { %v405_v56 = vpop.f32.mrf.mxu0  ;;  %v469_v57 = vpack.c.bf16 %v443_v54, %v442_v51 }
  0xc9   : > { %v3921_v58 = vpop.eup %3920  ;;  %v424_v59 = vmul.f32 0.5, %v414_v55  ;;  %v406_v60 = vadd.f32 %v3905_v28, %v405_v56 }
  0xca   : > { %532 = vmatmul.bf16.vlgmr.msra.gmra.mxu1 %v469_v57  ;;  %v439_v62 = vadd.f32 1.0, %v3921_v58 }
  0xcb   : > { %v421_v63 = vmul.f32 0.5, %v406_v60  ;;  %3924 = vtanh.f32 %v424_v59  ;;  %v3923_v3 = vpop.eup %3922 }
  0xcc   : > { %v447_v0 = vmul.f32 %v439_v62, %v423_v43  ;;  %v436_v7 = vadd.f32 1.0, %v3923_v3 }
  0xcd   : > { %3926 = vtanh.f32 %v421_v63 }
  0xce   : > { %v415_v1 = vpop.f32.mrf.mxu2  ;;  %v471_v2 = vpack.c.bf16 %v447_v0, %v446_v61  ;;  %v444_v10 = vmul.f32 %v436_v7, %v420_v50  ;;  %v3790_v61 = vld [vmem:[%s5428_s2 + $0xf0] sm:$0xff] }
  0xcf   : > { %v416_v4 = vadd.f32 %v3905_v28, %v415_v1 }
  0xd0   : > { %542 = vmatmul.bf16.vlgmr.msra.gmra.mxu3 %v471_v2 }
  0xd1   : > { %v425_v5 = vmul.f32 0.5, %v416_v4  ;;  %v3925_v6 = vpop.eup %3924 }
  0xd2   : > { %v440_v11 = vadd.f32 1.0, %v3925_v6 }
  0xd3   : > { %v3927_v8 = vpop.eup %3926  ;;  %3928 = vtanh.f32 %v425_v5 }
  0xd4   : > { %v437_v9 = vadd.f32 1.0, %v3927_v8  ;;  %v448_v15 = vmul.f32 %v440_v11, %v424_v59  ;;  %v3791_v59 = vld [vmem:[%s5428_s2 + $0xf8] sm:$0xff] }
  0xd5   : > { %794 = vmatpush.bf16.msrb.mxu3 %v3791_v59  ;;  %v3807_v59 = vld [vmem:[%s5430_s4 + $0x74] sm:$0xf0] }
  0xd6   : > { %v445_v12 = vmul.f32 %v437_v9, %v421_v63 }
  0xd8   : > { %v470_v13 = vpack.c.bf16 %v445_v12, %v444_v10 }
  0xd9   : > { %v3929_v14 = vpop.eup %3928  ;;  %795 = vmatpush.bf16.msrb.mxu3 %v3790_v61 }
  0xda   : > { %537 = vmatmul.bf16.gmra.mxu1 %v470_v13  ;;  %v441_v16 = vadd.f32 1.0, %v3929_v14 }
  0xdc   : > { %v449_v17 = vmul.f32 %v441_v16, %v425_v5  ;;  %v3789_v16 = vld [vmem:[%s5428_s2 + $0xe8] sm:$0xff] }
  0xdd   : > { %796 = vmatpush.bf16.msrb.mxu3 %v3789_v16 }
  0xde   : > { %v472_v18 = vpack.c.bf16 %v449_v17, %v448_v15  ;;  %v3788_v17 = vld [vmem:[%s5428_s2 + $0xe0] sm:$0xff] }
  0xe0   : > { %547 = vmatmul.bf16.gmra.mxu3 %v472_v18  ;;  %v3787_v18 = vld [vmem:[%s5428_s2 + $0xd8] sm:$0xff] }
  0xe1   : > { %797 = vmatpush.bf16.msrb.mxu3 %v3788_v17 }
  0xe5   : > { %798 = vmatpush.bf16.msrb.mxu3 %v3787_v18 }
  0xe9   : > { %799 = vmatpush.bf16.msrb.mxu3 %v3786_v19 }
  0xed   : > { %800 = vmatpush.bf16.msrb.mxu3 %v3785_v20 }
  0xf1   : > { %801 = vmatpush.bf16.msrb.mxu3 %v3784_v21 }
 0x147   : > { %v533_v26 = vpop.f32.mrf.mxu1 }
 0x148   : > { %v534_v27 = vadd.f32 %v3906_v25, %v533_v26 }
 0x14a   : > { %v553_v28 = vmul.f32 0.5, %v534_v27 }
 0x14c   : > { %3930 = vtanh.f32 %v553_v28 }
 0x14f   : > { %v535_v29 = vpop.f32.mrf.mxu1 }
 0x150   : > { %v536_v30 = vadd.f32 %v3906_v25, %v535_v29 }
 0x152   : > { %v554_v31 = vmul.f32 0.5, %v536_v30  ;;  %v3931_v33 = vpop.eup %3930 }
 0x153   : > { %v543_v32 = vpop.f32.mrf.mxu3  ;;  %v569_v36 = vadd.f32 1.0, %v3931_v33 }
 0x154   : > { %3932 = vtanh.f32 %v554_v31  ;;  %v544_v49 = vadd.f32 %v3906_v25, %v543_v32 }
 0x155   : > { %v577_v40 = vmul.f32 %v569_v36, %v553_v28 }
 0x156   : > { %v557_v55 = vmul.f32 0.5, %v544_v49 }
 0x157   : > { %v538_v34 = vpop.f32.mrf.mxu1 }
 0x158   : > { %v539_v35 = vadd.f32 %v3906_v25, %v538_v34 }
 0x15a   : > { %v3933_v37 = vpop.eup %3932  ;;  %v555_v39 = vmul.f32 0.5, %v539_v35 }
 0x15b   : > { %v570_v38 = vadd.f32 1.0, %v3933_v37  ;;  %v545_v42 = vpop.f32.mrf.mxu3 }
 0x15c   : > { %3934 = vtanh.f32 %v555_v39  ;;  %v546_v48 = vadd.f32 %v3906_v25, %v545_v42 }
 0x15d   : > { %v578_v41 = vmul.f32 %v570_v38, %v554_v31 }
 0x15e   : > { %v558_v53 = vmul.f32 0.5, %v546_v48 }
 0x15f   : > { %v540_v43 = vpop.f32.mrf.mxu1  ;;  %v604_v44 = vpack.c.bf16 %v578_v41, %v577_v40 }
 0x160   : > { %v541_v45 = vadd.f32 %v3906_v25, %v540_v43 }
 0x161   : > { %667 = vmatmul.bf16.vlgmr.msrb.gmra.mxu2 %v604_v44 }
 0x162   : > { %v556_v46 = vmul.f32 0.5, %v541_v45  ;;  %v3935_v47 = vpop.eup %3934 }
 0x163   : > { %v571_v50 = vadd.f32 1.0, %v3935_v47  ;;  %v548_v51 = vpop.f32.mrf.mxu3 }
 0x164   : > { %3936 = vtanh.f32 %v556_v46  ;;  %v549_v2 = vadd.f32 %v3906_v25, %v548_v51 }
 0x165   : > { %v579_v56 = vmul.f32 %v571_v50, %v555_v39  ;;  %3938 = vtanh.f32 %v558_v53 }
 0x166   : > { %3940 = vtanh.f32 %v557_v55  ;;  %v559_v6 = vmul.f32 0.5, %v549_v2 }
 0x16a   : > { %v3937_v52 = vpop.eup %3936 }
 0x16b   : > { %v572_v54 = vadd.f32 1.0, %v3937_v52  ;;  %v550_v60 = vpop.f32.mrf.mxu3  ;;  %v3939_v62 = vpop.eup %3938 }
 0x16c   : > { %v3941_v63 = vpop.eup %3940  ;;  %v551_v0 = vadd.f32 %v3906_v25, %v550_v60  ;;  %v574_v1 = vadd.f32 1.0, %v3939_v62  ;;  %v3804_v60 = vld [vmem:[%s5430_s4 + $0x64] sm:$0xf]  ;;  %v3499_v62 = vld [vmem:[%s5430_s4 + $0x68] sm:$0xf0] }
 0x16d   : > { %v580_v57 = vmul.f32 %v572_v54, %v556_v46  ;;  %v573_v3 = vadd.f32 1.0, %v3941_v63  ;;  %v3806_v54 = vld [vmem:[%s5430_s4 + $0x74] sm:$0xf]  ;;  %v3497_v63 = vld [vmem:[%s5430_s4 + $0x60] sm:$0xf] }
 0x16e   : > { %v560_v4 = vmul.f32 0.5, %v551_v0  ;;  %v582_v5 = vmul.f32 %v574_v1, %v558_v53  ;;  %v4682_v0 = vor.u32 %v3804_v60, %v3499_v62  ;;  %v3805_v1 = vld [vmem:[%s5430_s4 + $0x64] sm:$0xf0]  ;;  %v3908_v60 = vld [vmem:[%s5429_s3 + $0x3] ss:$0 sm:$0xff] }
 0x16f   : > { %v605_v58 = vpack.c.bf16 %v580_v57, %v579_v56  ;;  %v581_v7 = vmul.f32 %v573_v3, %v557_v55  ;;  %v3507_v55 = vld [vmem:[%s5430_s4 + $0x78] sm:$0xf0]  ;;  %v3505_v56 = vld [vmem:[%s5430_s4 + $0x70] sm:$0xf]  ;;  %v4688_v2 = vor.u32 %v3805_v1, %v3497_v63 }
 0x170   : > { %3942 = vtanh.f32 %v560_v4  ;;  %v4673_v61 = vor.u32 %v3807_v59, %v3505_v56 }
 0x171   : > { %672 = vmatmul.bf16.gmra.mxu2 %v605_v58  ;;  %v606_v8 = vpack.c.bf16 %v582_v5, %v581_v7  ;;  %3944 = vtanh.f32 %v559_v6  ;;  %v4665_v58 = vor.u32 %v3806_v54, %v3507_v55  ;;  %v3451_v54 = vld [vmem:[%s5430_s4 + $0x8] sm:$0xf0]  ;;  %v3449_v55 = vld [vmem:[%s5430_s4] sm:$0xf] }
 0x172   : > { %961 = vmatpush.bf16.msrb.mxu0 %v4673_v61 }
 0x173   : > { %990 = vmatpush.bf16.msrb.mxu1 %v4665_v58 }
 0x176   : > { %v3943_v9 = vpop.eup %3942  ;;  %962 = vmatpush.bf16.msrb.mxu0 %v4688_v2 }
 0x177   : > { %v3945_v10 = vpop.eup %3944  ;;  %v576_v11 = vadd.f32 1.0, %v3943_v9  ;;  %991 = vmatpush.bf16.msrb.mxu1 %v4682_v0 }
 0x178   : > { %v575_v12 = vadd.f32 1.0, %v3945_v10 }
 0x179   : > { %v584_v13 = vmul.f32 %v576_v11, %v560_v4 }
 0x17a   : > { %v583_v14 = vmul.f32 %v575_v12, %v559_v6 }
 0x17c   : > { %v607_v15 = vpack.c.bf16 %v584_v13, %v583_v14 }
 0x181   : > { %677 = vmatmul.bf16.gmra.mxu2 %v606_v8 }
 0x191   : > { %682 = vmatmul.bf16.gmra.mxu2 %v607_v15 }
 0x1e4   : > { %v668_v23 = vpop.f32.mrf.mxu2 }
 0x1e5   : > { %v669_v24 = vadd.f32 %v4648_v22, %v668_v23 }
 0x1e7   : > { %v688_v25 = vmul.f32 0.5, %v669_v24  ;;  %v3802_v24 = vld [vmem:[%s5430_s4 + $0x54] sm:$0xf] }
 0x1e9   : > { %3946 = vtanh.f32 %v688_v25 }
 0x1ec   : > { %v670_v26 = vpop.f32.mrf.mxu2 }
 0x1ed   : > { %v671_v27 = vadd.f32 %v4648_v22, %v670_v26 }
 0x1ef   : > { %v689_v28 = vmul.f32 0.5, %v671_v27  ;;  %v3947_v29 = vpop.eup %3946  ;;  %v3803_v27 = vld [vmem:[%s5430_s4 + $0x54] sm:$0xf0] }
 0x1f0   : > { %v704_v32 = vadd.f32 1.0, %v3947_v29  ;;  %v3800_v29 = vld [vmem:[%s5430_s4 + $0x44] sm:$0xf] }
 0x1f1   : > { %3948 = vtanh.f32 %v689_v28 }
 0x1f2   : > { %v712_v36 = vmul.f32 %v704_v32, %v688_v25  ;;  %v3491_v25 = vld [vmem:[%s5430_s4 + $0x58] sm:$0xf0] }
 0x1f3   : > { %v4703_v26 = vor.u32 %v3802_v24, %v3491_v25 }
 0x1f4   : > { %v673_v30 = vpop.f32.mrf.mxu2 }
 0x1f5   : > { %v674_v31 = vadd.f32 %v4648_v22, %v673_v30  ;;  %992 = vmatpush.bf16.msrb.mxu1 %v4703_v26  ;;  %v3483_v30 = vld [vmem:[%s5430_s4 + $0x48] sm:$0xf0] }
 0x1f6   : > { %v4721_v32 = vor.u32 %v3800_v29, %v3483_v30 }
 0x1f7   : > { %v3949_v33 = vpop.eup %3948  ;;  %v690_v35 = vmul.f32 0.5, %v674_v31  ;;  %v3481_v31 = vld [vmem:[%s5430_s4 + $0x40] sm:$0xf] }
 0x1f8   : > { %v705_v34 = vadd.f32 1.0, %v3949_v33  ;;  %v3801_v33 = vld [vmem:[%s5430_s4 + $0x44] sm:$0xf0] }
 0x1f9   : > { %3950 = vtanh.f32 %v690_v35  ;;  %993 = vmatpush.bf16.msrb.mxu1 %v4721_v32 }
 0x1fa   : > { %v713_v37 = vmul.f32 %v705_v34, %v689_v28  ;;  %v4726_v34 = vor.u32 %v3801_v33, %v3481_v31 }
 0x1fc   : > { %v675_v38 = vpop.f32.mrf.mxu2  ;;  %v739_v39 = vpack.c.bf16 %v713_v37, %v712_v36  ;;  %v3475_v36 = vld [vmem:[%s5430_s4 + $0x38] sm:$0xf0]  ;;  %v3473_v37 = vld [vmem:[%s5430_s4 + $0x30] sm:$0xf] }
 0x1fd   : > { %v676_v40 = vadd.f32 %v4648_v22, %v675_v38 }
 0x1fe   : > { %802 = vmatmul.bf16.vlgmr.msrb.gmra.mxu3 %v739_v39  ;;  %v3799_v39 = vld [vmem:[%s5430_s4 + $0x34] sm:$0xf0] }
 0x1ff   : > { %v691_v41 = vmul.f32 0.5, %v676_v40  ;;  %v3951_v42 = vpop.eup %3950  ;;  %v4744_v40 = vor.u32 %v3799_v39, %v3473_v37  ;;  %v3814_v37 = vld [vmem:[%s5428_s2 + $0x130] sm:$0xff] }
 0x200   : > { %v706_v45 = vadd.f32 1.0, %v3951_v42  ;;  %v3467_v42 = vld [vmem:[%s5430_s4 + $0x28] sm:$0xf0] }
 0x201   : > { %3952 = vtanh.f32 %v691_v41 }
 0x202   : > { %v714_v49 = vmul.f32 %v706_v45, %v690_v35  ;;  %v3798_v35 = vld [vmem:[%s5430_s4 + $0x34] sm:$0xf]  ;;  %v3797_v45 = vld [vmem:[%s5430_s4 + $0x24] sm:$0xf0] }
 0x203   : > { %v4739_v38 = vor.u32 %v3798_v35, %v3475_v36  ;;  %v3815_v35 = vld [vmem:[%s5428_s2 + $0x138] sm:$0xff] }
 0x204   : > { %v678_v43 = vpop.f32.mrf.mxu2  ;;  %1245 = vmatpush.bf16.msra.mxu2 %v3815_v35 }
 0x205   : > { %v679_v44 = vadd.f32 %v4648_v22, %v678_v43  ;;  %994 = vmatpush.bf16.msrb.mxu1 %v4739_v38  ;;  %v3465_v43 = vld [vmem:[%s5430_s4 + $0x20] sm:$0xf] }
 0x207   : > { %v3953_v46 = vpop.eup %3952  ;;  %v692_v48 = vmul.f32 0.5, %v679_v44 }
 0x208   : > { %v707_v47 = vadd.f32 1.0, %v3953_v46  ;;  %v4762_v46 = vor.u32 %v3797_v45, %v3465_v43  ;;  %1246 = vmatpush.bf16.msra.mxu2 %v3814_v37 }
 0x209   : > { %3954 = vtanh.f32 %v692_v48 }
 0x20a   : > { %v715_v50 = vmul.f32 %v707_v47, %v691_v41  ;;  %v3796_v41 = vld [vmem:[%s5430_s4 + $0x24] sm:$0xf]  ;;  %v3794_v47 = vld [vmem:[%s5430_s4 + $0x14] sm:$0xf] }
 0x20b   : > { %v4757_v44 = vor.u32 %v3796_v41, %v3467_v42  ;;  %v3813_v42 = vld [vmem:[%s5428_s2 + $0x128] sm:$0xff] }
 0x20c   : > { %v680_v51 = vpop.f32.mrf.mxu2  ;;  %v740_v52 = vpack.c.bf16 %v715_v50, %v714_v49  ;;  %v3457_v49 = vld [vmem:[%s5430_s4 + $0x10] sm:$0xf]  ;;  %1247 = vmatpush.bf16.msra.mxu2 %v3813_v42 }
 0x20d   : > { %v681_v53 = vadd.f32 %v4648_v22, %v680_v51  ;;  %995 = vmatpush.bf16.msrb.mxu1 %v4757_v44  ;;  %v3795_v51 = vld [vmem:[%s5430_s4 + $0x14] sm:$0xf0] }
 0x20e   : > { %807 = vmatmul.bf16.gmra.mxu3 %v740_v52  ;;  %v4780_v52 = vor.u32 %v3795_v51, %v3457_v49 }
 0x20f   : > { %v693_v57 = vmul.f32 0.5, %v681_v53  ;;  %v3955_v3 = vpop.eup %3954  ;;  %v3792_v53 = vld [vmem:[%s5430_s4 + $0x4] sm:$0xf] }
 0x210   : > { %v708_v6 = vadd.f32 1.0, %v3955_v3  ;;  %v4793_v56 = vor.u32 %v3792_v53, %v3451_v54 }
 0x211   : > { %3956 = vtanh.f32 %v693_v57 }
 0x212   : > { %v716_v10 = vmul.f32 %v708_v6, %v692_v48  ;;  %v3459_v48 = vld [vmem:[%s5430_s4 + $0x18] sm:$0xf0] }
 0x213   : > { %v4775_v50 = vor.u32 %v3794_v47, %v3459_v48 }
 0x214   : > { %v683_v4 = vpop.f32.mrf.mxu2 }
 0x215   : > { %v684_v5 = vadd.f32 %v4648_v22, %v683_v4  ;;  %996 = vmatpush.bf16.msrb.mxu1 %v4775_v50 }
 0x217   : > { %v3957_v7 = vpop.eup %3956  ;;  %v694_v9 = vmul.f32 0.5, %v684_v5 }
 0x218   : > { %v709_v8 = vadd.f32 1.0, %v3957_v7 }
 0x219   : > { %3958 = vtanh.f32 %v694_v9  ;;  %997 = vmatpush.bf16.msrb.mxu1 %v4793_v56 }
 0x21a   : > { %v717_v11 = vmul.f32 %v709_v8, %v693_v57  ;;  %v3793_v57 = vld [vmem:[%s5430_s4 + $0x4] sm:$0xf0] }
 0x21b   : > { %v4798_v59 = vor.u32 %v3793_v57, %v3449_v55 }
 0x21c   : > { %v685_v12 = vpop.f32.mrf.mxu2  ;;  %v741_v13 = vpack.c.bf16 %v717_v11, %v716_v10 }
 0x21d   : > { %v686_v14 = vadd.f32 %v4648_v22, %v685_v12  ;;  %v3489_v22 = vld [vmem:[%s5430_s4 + $0x50] sm:$0xf] }
 0x21e   : > { %812 = vmatmul.bf16.gmra.mxu3 %v741_v13  ;;  %v4708_v28 = vor.u32 %v3803_v27, %v3489_v22 }
 0x21f   : > { %v695_v15 = vmul.f32 0.5, %v686_v14  ;;  %v3959_v16 = vpop.eup %3958 }
 0x220   : > { %v710_v17 = vadd.f32 1.0, %v3959_v16  ;;  %963 = vmatpush.bf16.msrb.mxu0 %v4708_v28 }
 0x221   : > { %3960 = vtanh.f32 %v695_v15 }
 0x222   : > { %v718_v20 = vmul.f32 %v710_v17, %v694_v9 }
 0x224   : > { %964 = vmatpush.bf16.msrb.mxu0 %v4726_v34 }
 0x227   : > { %v3961_v18 = vpop.eup %3960 }
 0x228   : > { %v711_v19 = vadd.f32 1.0, %v3961_v18  ;;  %965 = vmatpush.bf16.msrb.mxu0 %v4744_v40 }
 0x22a   : > { %v719_v21 = vmul.f32 %v711_v19, %v695_v15 }
 0x22c   : > { %v742_v23 = vpack.c.bf16 %v719_v21, %v718_v20  ;;  %966 = vmatpush.bf16.msrb.mxu0 %v4762_v46 }
 0x22e   : > { %817 = vmatmul.bf16.gmra.mxu3 %v742_v23 }
 0x230   : > { %967 = vmatpush.bf16.msrb.mxu0 %v4780_v52 }
 0x234   : > { %968 = vmatpush.bf16.msrb.mxu0 %v4798_v59 }
 0x281   : > { %v803_v62 = vpop.f32.mrf.mxu3 }
 0x282   : > { %v804_v63 = vadd.f32 %v3908_v60, %v803_v62 }
 0x284   : > { %v823_v1 = vmul.f32 0.5, %v804_v63 }
 0x286   : > { %3962 = vtanh.f32 %v823_v1 }
 0x289   : > { %v805_v3 = vpop.f32.mrf.mxu3 }
 0x28a   : > { %v806_v4 = vadd.f32 %v3908_v60, %v805_v3 }
 0x28c   : > { %v824_v5 = vmul.f32 0.5, %v806_v4  ;;  %v3963_v6 = vpop.eup %3962 }
 0x28d   : > { %v839_v9 = vadd.f32 1.0, %v3963_v6 }
 0x28e   : > { %3964 = vtanh.f32 %v824_v5 }
 0x28f   : > { %v847_v13 = vmul.f32 %v839_v9, %v823_v1 }
 0x291   : > { %v808_v7 = vpop.f32.mrf.mxu3 }
 0x292   : > { %v809_v8 = vadd.f32 %v3908_v60, %v808_v7 }
 0x294   : > { %v3965_v10 = vpop.eup %3964  ;;  %v825_v12 = vmul.f32 0.5, %v809_v8  ;;  %v3812_v8 = vld [vmem:[%s5428_s2 + $0x120] sm:$0xff] }
 0x295   : > { %v840_v11 = vadd.f32 1.0, %v3965_v10  ;;  %1248 = vmatpush.bf16.msra.mxu2 %v3812_v8  ;;  %v3811_v10 = vld [vmem:[%s5428_s2 + $0x118] sm:$0xff] }
 0x296   : > { %3966 = vtanh.f32 %v825_v12 }
 0x297   : > { %v848_v14 = vmul.f32 %v840_v11, %v824_v5 }
 0x299   : > { %v810_v15 = vpop.f32.mrf.mxu3  ;;  %v872_v16 = vpack.c.bf16 %v848_v14, %v847_v13  ;;  %1249 = vmatpush.bf16.msra.mxu2 %v3811_v10  ;;  %v3810_v13 = vld [vmem:[%s5428_s2 + $0x110] sm:$0xff] }
 0x29a   : > { %v811_v17 = vadd.f32 %v3908_v60, %v810_v15 }
 0x29b   : > { %969 = vmatmul.bf16.vlgmr.msrb.gmra.mxu0 %v872_v16  ;;  %998 = vmatmul.bf16.vlgmr.msrb.gmra.mxu1 %v872_v16  ;;  %v3809_v16 = vld [vmem:[%s5428_s2 + $0x108] sm:$0xff] }
 0x29c   : > { %v826_v18 = vmul.f32 0.5, %v811_v17  ;;  %v3967_v19 = vpop.eup %3966 }
 0x29d   : > { %v841_v23 = vadd.f32 1.0, %v3967_v19  ;;  %1250 = vmatpush.bf16.msra.mxu2 %v3810_v13 }
 0x29e   : > { %3968 = vtanh.f32 %v826_v18 }
 0x29f   : > { %v849_v27 = vmul.f32 %v841_v23, %v825_v12 }
 0x2a1   : > { %v813_v20 = vpop.f32.mrf.mxu3  ;;  %1251 = vmatpush.bf16.msra.mxu2 %v3809_v16 }
 0x2a2   : > { %v814_v21 = vadd.f32 %v3908_v60, %v813_v20  ;;  %v3808_v20 = vld [vmem:[%s5428_s2 + $0x100] sm:$0xff] }
 0x2a4   : > { %v3969_v24 = vpop.eup %3968  ;;  %v827_v22 = vmul.f32 0.5, %v814_v21 }
 0x2a5   : > { %v842_v25 = vadd.f32 1.0, %v3969_v24  ;;  %1252 = vmatpush.bf16.msra.mxu2 %v3808_v20 }
 0x2a6   : > { %3970 = vtanh.f32 %v827_v22 }
 0x2a7   : > { %v850_v29 = vmul.f32 %v842_v25, %v826_v18 }
 0x2a9   : > { %v815_v30 = vpop.f32.mrf.mxu3  ;;  %v873_v31 = vpack.c.bf16 %v850_v29, %v849_v27 }
 0x2aa   : > { %v816_v33 = vadd.f32 %v3908_v60, %v815_v30 }
 0x2ab   : > { %974 = vmatmul.bf16.gmra.mxu0 %v873_v31  ;;  %1003 = vmatmul.bf16.gmra.mxu1 %v873_v31 }
 0x2ac   : > { %v828_v36 = vmul.f32 0.5, %v816_v33  ;;  %v3971_v39 = vpop.eup %3970 }
 0x2ad   : > { %v843_v45 = vadd.f32 1.0, %v3971_v39 }
 0x2ae   : > { %3972 = vtanh.f32 %v828_v36 }
 0x2af   : > { %v851_v51 = vmul.f32 %v843_v45, %v827_v22 }
 0x2b1   : > { %v818_v41 = vpop.f32.mrf.mxu3 }
 0x2b2   : > { %v819_v43 = vadd.f32 %v3908_v60, %v818_v41 }
 0x2b4   : > { %v3973_v47 = vpop.eup %3972  ;;  %v829_v49 = vmul.f32 0.5, %v819_v43 }
 0x2b5   : > { %v844_v48 = vadd.f32 1.0, %v3973_v47 }
 0x2b6   : > { %3974 = vtanh.f32 %v829_v49 }
 0x2b7   : > { %v852_v53 = vmul.f32 %v844_v48, %v828_v36 }
 0x2b9   : > { %v820_v54 = vpop.f32.mrf.mxu3  ;;  %v874_v55 = vpack.c.bf16 %v852_v53, %v851_v51 }
 0x2ba   : > { %v821_v57 = vadd.f32 %v3908_v60, %v820_v54  ;;  %v4820_v60 = vld [vmem:[%s5431_s5] sm:$0x3] }
 0x2bb   : > { %979 = vmatmul.bf16.gmra.mxu0 %v874_v55  ;;  %1008 = vmatmul.bf16.gmra.mxu1 %v874_v55  ;;  %v4823_v9 = vperm.slane %v4820_v60, 1  ;;  %v4858_v16 = vperm.slane %v4820_v60, 0 }
 0x2bc   : > { %v830_v62 = vmul.f32 0.5, %v821_v57  ;;  %v3975_v63 = vpop.eup %3974 }
 0x2bd   : > { %v845_v1 = vadd.f32 1.0, %v3975_v63 }
 0x2be   : > { %3976 = vtanh.f32 %v830_v62 }
 0x2bf   : > { %v853_v5 = vmul.f32 %v845_v1, %v829_v49 }
 0x2c4   : > { %v3977_v3 = vpop.eup %3976 }
 0x2c5   : > { %v846_v4 = vadd.f32 1.0, %v3977_v3 }
 0x2c7   : > { %v854_v6 = vmul.f32 %v846_v4, %v830_v62 }
 0x2c9   : > { %v875_v7 = vpack.c.bf16 %v854_v6, %v853_v5 }
 0x2cb   : > { %984 = vmatmul.bf16.gmra.mxu0 %v875_v7  ;;  %1013 = vmatmul.bf16.gmra.mxu1 %v875_v7 }
 0x318   : > { %v999_v11 = vpop.f32.mrf.mxu1  ;;  %v970_v22 = vpop.f32.mrf.mxu0 }
 0x319   : > { %v1000_v12 = vadd.f32 %v999_v11, %v4823_v9 }
 0x31b   : > { %v1027_v14 = vand.u32 2147483647, %v1000_v12  ;;  %v1019_v53 = vmax.f32 %v1000_v12, 0.0 }
 0x31d   : > { %v1035_v15 = vsub.f32 0.0, %v1027_v14 }
 0x31f   : > { %v1043_v17 = vmul.f32 1.442695, %v1035_v15 }
 0x320   : > { %v1001_v18 = vpop.f32.mrf.mxu1  ;;  %v972_v54 = vpop.f32.mrf.mxu0 }
 0x321   : > { %3978 = vpow2.f32 %v1043_v17  ;;  %v1002_v19 = vadd.f32 %v1001_v18, %v4823_v9  ;;  %v1147_v17 = vld [vmem:[%s4852_s16] sm:$0xff]  ;;  %v973_v60 = vadd.f32 %v972_v54, %v4858_v16 }
 0x323   : > { %v1028_v21 = vand.u32 2147483647, %v1002_v19  ;;  %v1020_v15 = vmax.f32 %v1002_v19, 0.0 }
 0x325   : > { %v1036_v23 = vsub.f32 0.0, %v1028_v21 }
 0x327   : > { %v3979_v24 = vpop.eup %3978  ;;  %v1045_v25 = vmul.f32 1.442695, %v1036_v23 }
 0x328   : > { %v1059_v27 = vadd.f32 1.0, %v3979_v24  ;;  %v1004_v29 = vpop.f32.mrf.mxu1  ;;  %v1062_v30 = vmul.f32 -0.5, %v3979_v24  ;;  %v1065_v37 = vand.u32 2147483647, %v3979_v24  ;;  %v4862_v23 = vpop.f32.mrf.mxu0 }
 0x329   : > { %3980 = vpow2.f32 %v1045_v25  ;;  %v4840_v31 = vadd.f32 %v1004_v29, %v4823_v9  ;;  %v1148_v25 = vld [vmem:[%s4852_s16 + $0x8] sm:$0xff] }
 0x32a   : > { %3982 = vlog2.f32 %v1059_v27  ;;  %v1063_v35 = vadd.f32 1.0, %v1062_v30  ;;  %vm1066_vm0 = vcmp.lt.f32.partialorder %v1065_v37, 0.0004427343  ;;  %v1974_v37 = vlaneseq }
 0x32b   : > { %v1029_v33 = vand.u32 2147483647, %v4840_v31 }
 0x32c   : > { %v1064_v49 = vmul.f32 %v3979_v24, %v1063_v35  ;;  %v971_v35 = vadd.f32 %v970_v22, %v4858_v16 }
 0x32d   : > { %v1037_v36 = vsub.f32 0.0, %v1029_v33 }
 0x32f   : > { %v3981_v39 = vpop.eup %3980  ;;  %v1047_v41 = vmul.f32 1.442695, %v1037_v36 }
 0x330   : > { %v3983_v42 = vpop.eup %3982  ;;  %v1068_v43 = vadd.f32 1.0, %v3981_v39  ;;  %v1071_v45 = vmul.f32 -0.5, %v3981_v39  ;;  %v1006_v47 = vpop.f32.mrf.mxu1  ;;  %v1074_v3 = vand.u32 2147483647, %v3981_v39 }
 0x331   : > { %v1061_v48 = vmul.f32 0.6931472, %v3983_v42  ;;  %3984 = vpow2.f32 %v1047_v41  ;;  %v4844_v51 = vadd.f32 %v1006_v47, %v4823_v9  ;;  %v1986_v42 = vmul.f32 %v973_v60, %v973_v60 }
 0x332   : > { %3986 = vlog2.f32 %v1068_v43  ;;  %v1072_v63 = vadd.f32 1.0, %v1071_v45  ;;  %vm1075_vm1 = vcmp.lt.f32.partialorder %v1074_v3, 0.0004427343  ;;  %v4878_v3 = vand.u32 127, %v1974_v37 }
 0x333   : > { %v1067_v55 = vsel %vm1066_vm0, %v1064_v49, %v1061_v48  ;;  %v1030_v57 = vand.u32 2147483647, %v4844_v51 }
 0x334   : > { %v1131_v62 = vadd.f32 %v1067_v55, %v1019_v53  ;;  %v1073_v8 = vmul.f32 %v3981_v39, %v1072_v63  ;;  %vm1976_vm3 = vcmp.lt.s32.totalorder %v4878_v3, 4 }
 0x335   : > { %v1038_v1 = vsub.f32 0.0, %v1030_v57 }
 0x336   : > { %v1139_v7 = vadd.f32 1e-08, %v1131_v62  ;;  %v1021_v62 = vmax.f32 %v4840_v31, 0.0 }
 0x337   : > { %v3985_v4 = vpop.eup %3984  ;;  %v1049_v5 = vmul.f32 1.442695, %v1038_v1 }
 0x338   : > { %v3987_v6 = vpop.eup %3986  ;;  %v1077_v10 = vadd.f32 1.0, %v3985_v4  ;;  %v1009_v11 = vpop.f32.mrf.mxu1  ;;  %v1080_v13 = vmul.f32 -0.5, %v3985_v4  ;;  %v1083_v24 = vand.u32 2147483647, %v3985_v4  ;;  %v1155_v30 = vmul.f32 %v1147_v17, %v1139_v7 }
 0x339   : > { %v1070_v12 = vmul.f32 0.6931472, %v3987_v6  ;;  %3988 = vpow2.f32 %v1049_v5  ;;  %v4855_v14 = vadd.f32 %v1009_v11, %v4823_v9  ;;  %v1977_v54 = vmul.f32 %v1139_v7, %v1139_v7 }
 0x33a   : > { %3990 = vlog2.f32 %v1077_v10  ;;  %v1081_v27 = vadd.f32 1.0, %v1080_v13  ;;  %vm4867_vm2 = vcmp.lt.f32.partialorder %v1083_v24, 0.0004427343  ;;  %v1163_v55 = vadd.f32 %v1155_v30, %v971_v35 }
 0x33b   : > { %v1076_v18 = vsel %vm1075_vm1, %v1073_v8, %v1070_v12  ;;  %v1031_v20 = vand.u32 2147483647, %v4855_v14  ;;  %3992 = vlog2.f32 %v1139_v7  ;;  %v1985_v5 = vmul.f32 %v971_v35, %v971_v35  ;;  %v4880_v12 = vpop.f32.mrf.mxu0 }
 0x33c   : > { %v1132_v21 = vadd.f32 %v1076_v18, %v1020_v15  ;;  %v1082_v49 = vmul.f32 %v3985_v4, %v1081_v27  ;;  %v1022_v17 = vmax.f32 %v4844_v51, 0.0 }
 0x33d   : > { %v1039_v29 = vsub.f32 0.0, %v1031_v20  ;;  %v1993_v13 = vadd.f32 %v1985_v5, %v1977_v54 }
 0x33e   : > { %v1140_v33 = vadd.f32 1e-08, %v1132_v21 }
 0x33f   : > { %v3989_v19 = vpop.eup %3988  ;;  %v1051_v36 = vmul.f32 1.442695, %v1039_v29 }
 0x340   : > { %v3991_v39 = vpop.eup %3990  ;;  %v1156_v41 = vmul.f32 %v1148_v25, %v1140_v33  ;;  %v1086_v43 = vadd.f32 1.0, %v3989_v19  ;;  %v1089_v45 = vmul.f32 -0.5, %v3989_v19  ;;  %v1011_v47 = vpop.f32.mrf.mxu1  ;;  %v1092_v7 = vand.u32 2147483647, %v3989_v19 }
 0x341   : > { %v1079_v48 = vmul.f32 0.6931472, %v3991_v39  ;;  %3994 = vpow2.f32 %v1051_v36  ;;  %v4872_v53 = vadd.f32 %v1011_v47, %v4823_v9  ;;  %v3993_v22 = vpop.eup %3992  ;;  %v1978_v37 = vmul.f32 %v1140_v33, %v1140_v33 }
 0x342   : > { %3996 = vlog2.f32 %v1086_v43  ;;  %v1164_v57 = vadd.f32 %v1156_v41, %v973_v60  ;;  %v1090_v4 = vadd.f32 1.0, %v1089_v45  ;;  %v2002_v6 = vmul.f32 0.6931472, %v3993_v22 }
 0x343   : > { %v1085_v63 = vsel %vm4867_vm2, %v1082_v49, %v1079_v48  ;;  %v1032_v1 = vand.u32 2147483647, %v4872_v53  ;;  %3998 = vlog2.f32 %v1140_v33  ;;  %vm1093_vm4 = vcmp.lt.f32.partialorder %v1092_v7, 0.0004427343  ;;  %v4893_v60 = vpop.f32.mrf.mxu0 }
 0x344   : > { %v1190_v8 = vpack.c.bf16 %v1164_v57, %v1163_v55  ;;  %v1133_v10 = vadd.f32 %v1085_v63, %v1021_v62  ;;  %v2017_v15 = vmul.f32 2.0, %v2002_v6  ;;  %v1091_v21 = vmul.f32 %v3989_v19, %v1090_v4 }
 0x345   : > { %v1040_v11 = vsub.f32 0.0, %v1032_v1  ;;  %v1994_v22 = vadd.f32 %v1986_v42, %v1978_v37  ;;  %v976_v33 = vadd.f32 %v4862_v23, %v4858_v16  ;;  %v1023_v57 = vmax.f32 %v4855_v14, 0.0 }
 0x346   : > { %1253 = vmatmul.bf16.vlgmr.msra.gmra.mxu2 %v1190_v8  ;;  %v2025_v27 = vsub.f32 %v1993_v13, %v2017_v15  ;;  %v1141_v30 = vadd.f32 1e-08, %v1133_v10  ;;  %v1149_v10 = vld [vmem:[%s4852_s16 + $0x10] sm:$0xff]  ;;  %v1150_v15 = vld [vmem:[%s4852_s16 + $0x18] sm:$0xff] }
 0x347   : > { %v3995_v31 = vpop.eup %3994  ;;  %v1053_v18 = vmul.f32 1.442695, %v1040_v11 }
 0x348   : > { %v3997_v20 = vpop.eup %3996  ;;  %v1095_v24 = vadd.f32 1.0, %v3995_v31  ;;  %v1098_v25 = vmul.f32 -0.5, %v3995_v31  ;;  %v1014_v29 = vpop.f32.mrf.mxu1  ;;  %v2033_v51 = vsel %vm1976_vm3, %v2025_v27, 0.0  ;;  %v1101_v49 = vand.u32 2147483647, %v3995_v31 }
 0x349   : > { %v1088_v35 = vmul.f32 0.6931472, %v3997_v20  ;;  %4000 = vpow2.f32 %v1053_v18  ;;  %v4885_v36 = vadd.f32 %v1014_v29, %v4823_v9  ;;  %v3999_v39 = vpop.eup %3998  ;;  %2041 = vadd.xlane.f32.xlu0 %v2033_v51  ;;  %v1979_v23 = vmul.f32 %v1141_v30, %v1141_v30 }
 0x34a   : > { %4002 = vlog2.f32 %v1095_v24  ;;  %v1099_v45 = vadd.f32 1.0, %v1098_v25  ;;  %v2004_v47 = vmul.f32 0.6931472, %v3999_v39  ;;  %vm1102_vm5 = vcmp.lt.f32.partialorder %v1101_v49, 0.0004427343 }
 0x34b   : > { %v1094_v41 = vsel %vm1093_vm4, %v1091_v21, %v1088_v35  ;;  %v1033_v19 = vand.u32 2147483647, %v4885_v36  ;;  %4004 = vlog2.f32 %v1141_v30  ;;  %v1987_v18 = vmul.f32 %v976_v33, %v976_v33 }
 0x34c   : > { %v1134_v43 = vadd.f32 %v1094_v41, %v1022_v17  ;;  %v2018_v54 = vmul.f32 2.0, %v2004_v47  ;;  %v1100_v5 = vmul.f32 %v3995_v31, %v1099_v45  ;;  %v1157_v21 = vmul.f32 %v1149_v10, %v1141_v30 }
 0x34d   : > { %v1041_v48 = vsub.f32 0.0, %v1033_v19  ;;  %v978_v24 = vadd.f32 %v4880_v12, %v4858_v16  ;;  %v1995_v39 = vadd.f32 %v1987_v18, %v1979_v23  ;;  %v1024_v30 = vmax.f32 %v4872_v53, 0.0  ;;  %v3823_v18 = vld [vmem:[%s5428_s2 + $0x178] sm:$0xff] }
 0x34e   : > { %v1142_v1 = vadd.f32 1e-08, %v1134_v43  ;;  %v2026_v6 = vsub.f32 %v1994_v22, %v2018_v54  ;;  %v1165_v47 = vadd.f32 %v1157_v21, %v976_v33  ;;  %1380 = vmatpush.bf16.msra.mxu3 %v3823_v18 }
 0x34f   : > { %v4001_v55 = vpop.eup %4000  ;;  %v1055_v62 = vmul.f32 1.442695, %v1041_v48  ;;  %v1988_v53 = vmul.f32 %v978_v24, %v978_v24 }
 0x350   : > { %v4003_v63 = vpop.eup %4002  ;;  %v1104_v4 = vadd.f32 1.0, %v4001_v55  ;;  %v1016_v8 = vpop.f32.mrf.mxu1  ;;  %v1107_v7 = vmul.f32 -0.5, %v4001_v55  ;;  %v2034_v14 = vsel %vm1976_vm3, %v2026_v6, 0.0  ;;  %v1158_v29 = vmul.f32 %v1150_v15, %v1142_v1 }
 0x351   : > { %v1097_v11 = vmul.f32 0.6931472, %v4003_v63  ;;  %4006 = vpow2.f32 %v1055_v62  ;;  %v4897_v13 = vadd.f32 %v1016_v8, %v4823_v9  ;;  %v4005_v17 = vpop.eup %4004  ;;  %2043 = vadd.xlane.f32.xlu1 %v2034_v14  ;;  %v1110_v37 = vand.u32 2147483647, %v4001_v55  ;;  %v982_v63 = vpop.f32.mrf.mxu0 }
 0x352   : > { %4008 = vlog2.f32 %v1104_v4  ;;  %v2006_v27 = vmul.f32 0.6931472, %v4005_v17  ;;  %v1108_v35 = vadd.f32 1.0, %v1107_v7  ;;  %v1166_v19 = vadd.f32 %v1158_v29, %v978_v24  ;;  %v1152_v7 = vld [vmem:[%s4852_s16 + $0x28] sm:$0xff] }
 0x353   : > { %v1103_v31 = vsel %vm1102_vm5, %v1100_v5, %v1097_v11  ;;  %v1034_v20 = vand.u32 2147483647, %v4897_v13  ;;  %4010 = vlog2.f32 %v1142_v1  ;;  %vm1111_vm6 = vcmp.lt.f32.partialorder %v1110_v37, 0.0004427343  ;;  %v1151_v11 = vld [vmem:[%s4852_s16 + $0x20] sm:$0xff] }
 0x354   : > { %v1135_v25 = vadd.f32 %v1103_v31, %v1023_v57  ;;  %v2019_v41 = vmul.f32 2.0, %v2006_v27  ;;  %v1109_v57 = vmul.f32 %v4001_v55, %v1108_v35  ;;  %v1191_v62 = vpack.c.bf16 %v1166_v19, %v1165_v47 }
 0x355   : > { %v1042_v51 = vsub.f32 0.0, %v1034_v20  ;;  %v1980_v4 = vmul.f32 %v1142_v1, %v1142_v1  ;;  %v981_v31 = vadd.f32 %v4893_v60, %v4858_v16  ;;  %v983_v20 = vadd.f32 %v982_v63, %v4858_v16 }
 0x356   : > { %v1143_v43 = vadd.f32 1e-08, %v1135_v25  ;;  %v2027_v12 = vsub.f32 %v1995_v39, %v2019_v41  ;;  %1258 = vmatmul.bf16.gmra.mxu2 %v1191_v62  ;;  %v1025_v60 = vmax.f32 %v4885_v36, 0.0 }
 0x357   : > { %v4007_v42 = vpop.eup %4006  ;;  %v1057_v45 = vmul.f32 1.442695, %v1042_v51  ;;  %v1996_v23 = vadd.f32 %v1988_v53, %v1980_v4  ;;  %v3822_v51 = vld [vmem:[%s5428_s2 + $0x170] sm:$0xff] }
 0x358   : > { %v4009_v48 = vpop.eup %4008  ;;  %v1113_v49 = vadd.f32 1.0, %v4007_v42  ;;  %v1116_v22 = vmul.f32 -0.5, %v4007_v42  ;;  %v2035_v5 = vsel %vm1976_vm3, %v2027_v12, 0.0  ;;  %v1119_v14 = vand.u32 2147483647, %v4007_v42  ;;  %1381 = vmatpush.bf16.msra.mxu3 %v3822_v51 }
 0x359   : > { %v1106_v54 = vmul.f32 0.6931472, %v4009_v48  ;;  %4012 = vpow2.f32 %v1057_v45  ;;  %v4011_v33 = vpop.eup %4010  ;;  %2045 = vadd.xlane.f32.xlu0 %v2035_v5  ;;  %v1981_v21 = vmul.f32 %v1143_v43, %v1143_v43  ;;  %v1159_v35 = vmul.f32 %v1151_v11, %v1143_v43 }
 0x35a   : > { %4014 = vlog2.f32 %v1113_v49  ;;  %v1117_v10 = vadd.f32 1.0, %v1116_v22  ;;  %v2008_v55 = vmul.f32 0.6931472, %v4011_v33  ;;  %vm1120_vm7 = vcmp.lt.f32.partialorder %v1119_v14, 0.0004427343  ;;  %v3821_v22 = vld [vmem:[%s5428_s2 + $0x168] sm:$0xff] }
 0x35b   : > { %v1112_v6 = vsel %vm1111_vm6, %v1109_v57, %v1106_v54  ;;  %4016 = vlog2.f32 %v1143_v43  ;;  %v1989_v45 = vmul.f32 %v981_v31, %v981_v31  ;;  %v1167_v57 = vadd.f32 %v1159_v35, %v981_v31 }
 0x35c   : > { %v1136_v8 = vadd.f32 %v1112_v6, %v1024_v30  ;;  %v2020_v17 = vmul.f32 2.0, %v2008_v55  ;;  %v1118_v25 = vmul.f32 %v4007_v42, %v1117_v10  ;;  %v985_v30 = vpop.f32.mrf.mxu0  ;;  %1382 = vmatpush.bf16.msra.mxu3 %v3821_v22  ;;  %v1026_v14 = vmax.f32 %v4897_v13, 0.0  ;;  %v1153_v13 = vld [vmem:[%s4852_s16 + $0x30] sm:$0xff] }
 0x35d   : > { %v1997_v54 = vadd.f32 %v1989_v45, %v1981_v21 }
 0x35e   : > { %v1144_v15 = vadd.f32 1e-08, %v1136_v8  ;;  %v2028_v29 = vsub.f32 %v1996_v23, %v2020_v17  ;;  %v1990_v8 = vmul.f32 %v983_v20, %v983_v20  ;;  %v986_v17 = vadd.f32 %v985_v30, %v4858_v16 }
 0x35f   : > { %v4013_v1 = vpop.eup %4012 }
 0x360   : > { %v4015_v24 = vpop.eup %4014  ;;  %v1122_v27 = vadd.f32 1.0, %v4013_v1  ;;  %v1125_v41 = vmul.f32 -0.5, %v4013_v1  ;;  %v1160_v19 = vmul.f32 %v1152_v7, %v1144_v15  ;;  %4018 = vlog2.f32 %v1144_v15 }
 0x361   : > { %v4017_v37 = vpop.eup %4016  ;;  %v1115_v39 = vmul.f32 0.6931472, %v4015_v24  ;;  %v2036_v42 = vsel %vm1976_vm3, %v2028_v29, 0.0  ;;  %v1128_v63 = vand.u32 2147483647, %v4013_v1  ;;  %v1982_v5 = vmul.f32 %v1144_v15, %v1144_v15  ;;  %v1154_v24 = vld [vmem:[%s4852_s16 + $0x38] sm:$0xff] }
 0x362   : > { %4020 = vlog2.f32 %v1122_v27  ;;  %2047 = vadd.xlane.f32.xlu1 %v2036_v42  ;;  %v2010_v43 = vmul.f32 0.6931472, %v4017_v37  ;;  %v1168_v48 = vadd.f32 %v1160_v19, %v983_v20  ;;  %v1126_v12 = vadd.f32 1.0, %v1125_v41 }
 0x363   : > { %v1121_v47 = vsel %vm1120_vm7, %v1118_v25, %v1115_v39  ;;  %vm1129_vm8 = vcmp.lt.f32.partialorder %v1128_v63, 0.0004427343  ;;  %v1998_v15 = vadd.f32 %v1990_v8, %v1982_v5  ;;  %v1991_v35 = vmul.f32 %v986_v17, %v986_v17  ;;  %v3819_v5 = vld [vmem:[%s5428_s2 + $0x158] sm:$0xff] }
 0x364   : > { %v1137_v49 = vadd.f32 %v1121_v47, %v1025_v60  ;;  %v2021_v36 = vmul.f32 2.0, %v2010_v43  ;;  %v1192_v6 = vpack.c.bf16 %v1168_v48, %v1167_v57  ;;  %v1127_v11 = vmul.f32 %v4013_v1, %v1126_v12  ;;  %v987_v1 = vpop.f32.mrf.mxu0 }
 0x365   : > { %v988_v39 = vadd.f32 %v987_v1, %v4858_v16 }
 0x366   : > { %v1145_v62 = vadd.f32 1e-08, %v1137_v49  ;;  %v4019_v4 = vpop.eup %4018  ;;  %v2029_v33 = vsub.f32 %v1997_v54, %v2021_v36  ;;  %1263 = vmatmul.bf16.gmra.mxu2 %v1192_v6  ;;  %v3817_v6 = vld [vmem:[%s5428_s2 + $0x148] sm:$0xff] }
 0x367   : > { %v2012_v10 = vmul.f32 0.6931472, %v4019_v4  ;;  %v1992_v49 = vmul.f32 %v988_v39, %v988_v39  ;;  %v3818_v4 = vld [vmem:[%s5428_s2 + $0x150] sm:$0xff] }
 0x368   : > { %v4021_v53 = vpop.eup %4020  ;;  %4022 = vlog2.f32 %v1145_v62  ;;  %v2037_v7 = vsel %vm1976_vm3, %v2029_v33, 0.0  ;;  %v1983_v21 = vmul.f32 %v1145_v62, %v1145_v62  ;;  %v1161_v60 = vmul.f32 %v1153_v13, %v1145_v62  ;;  %v3820_v62 = vld [vmem:[%s5428_s2 + $0x160] sm:$0xff] }
 0x369   : > { %v1124_v55 = vmul.f32 0.6931472, %v4021_v53  ;;  %2049 = vadd.xlane.f32.xlu0 %v2037_v7  ;;  %v2022_v23 = vmul.f32 2.0, %v2012_v10  ;;  %1383 = vmatpush.bf16.msra.mxu3 %v3820_v62  ;;  %v3816_v53 = vld [vmem:[%s5428_s2 + $0x140] sm:$0xff] }
 0x36a   : > { %v1999_v41 = vadd.f32 %v1991_v35, %v1983_v21  ;;  %v1169_v43 = vadd.f32 %v1161_v60, %v986_v17  ;;  %v4956_v10 = vld [vmem:[%s5429_s3 + $0x4] ss:$0 sm:$0xff]  ;;  %v4300_v17 = vld [vmem:[%s5428_s2 + $0x28] sm:$0xff] }
 0x36b   : > { %v1130_v18 = vsel %vm1129_vm8, %v1127_v11, %v1124_v55  ;;  %v2030_v20 = vsub.f32 %v1998_v15, %v2022_v23  ;;  %v4298_v55 = vld [vmem:[%s5428_s2 + $0x38] sm:$0xff] }
 0x36c   : > { %v1138_v31 = vadd.f32 %v1130_v18, %v1026_v14  ;;  %v4299_v14 = vld [vmem:[%s5428_s2 + $0x30] sm:$0xff] }
 0x36d   : > { %v2038_v29 = vsel %vm1976_vm3, %v2030_v20, 0.0  ;;  %1384 = vmatpush.bf16.msra.mxu3 %v3819_v5  ;;  %v4301_v20 = vld [vmem:[%s5428_s2 + $0x20] sm:$0xff] }
 0x36e   : > { %v4023_v25 = vpop.eup %4022  ;;  %v1146_v27 = vadd.f32 1e-08, %v1138_v31  ;;  %2051 = vadd.xlane.f32.xlu1 %v2038_v29 }
 0x36f   : > { %v2014_v51 = vmul.f32 0.6931472, %v4023_v25  ;;  %v4302_v25 = vld [vmem:[%s5428_s2 + $0x18] sm:$0xff] }
 0x370   : > { %v1162_v37 = vmul.f32 %v1154_v24, %v1146_v27  ;;  %4024 = vlog2.f32 %v1146_v27  ;;  %v1984_v48 = vmul.f32 %v1146_v27, %v1146_v27  ;;  %v4303_v27 = vld [vmem:[%s5428_s2 + $0x10] sm:$0xff] }
 0x371   : > { %v2023_v19 = vmul.f32 2.0, %v2014_v51  ;;  %1385 = vmatpush.bf16.msra.mxu3 %v3818_v4 }
 0x372   : > { %v1170_v45 = vadd.f32 %v1162_v37, %v988_v39  ;;  %v2000_v54 = vadd.f32 %v1992_v49, %v1984_v48  ;;  %v4304_v39 = vld [vmem:[%s5428_s2 + $0x8] sm:$0xff] }
 0x373   : > { %v2031_v42 = vsub.f32 %v1999_v41, %v2023_v19 }
 0x374   : > { %v1193_v22 = vpack.c.bf16 %v1170_v45, %v1169_v43  ;;  %v4305_v45 = vld [vmem:[%s5428_s2] sm:$0xff] }
 0x375   : > { %v2039_v47 = vsel %vm1976_vm3, %v2031_v42, 0.0  ;;  %1386 = vmatpush.bf16.msra.mxu3 %v3817_v6 }
 0x376   : > { %v4025_v30 = vpop.eup %4024  ;;  %2053 = vadd.xlane.f32.xlu0 %v2039_v47  ;;  %1268 = vmatmul.bf16.gmra.mxu2 %v1193_v22 }
 0x377   : > { %v2016_v12 = vmul.f32 0.6931472, %v4025_v30 }
 0x379   : > { %v2024_v36 = vmul.f32 2.0, %v2016_v12  ;;  %1387 = vmatpush.bf16.msra.mxu3 %v3816_v53 }
 0x37b   : > { %v2032_v57 = vsub.f32 %v2000_v54, %v2024_v36 }
 0x37d   : > { %v2040_v63 = vsel %vm1976_vm3, %v2032_v57, 0.0  ;;  %2104 = vmatpush.bf16.msrb.mxu3 %v4298_v55 }
 0x37e   : > { %2055 = vadd.xlane.f32.xlu1 %v2040_v63 }
 0x381   : > { %2105 = vmatpush.bf16.msrb.mxu3 %v4299_v14 }
 0x385   : > { %2106 = vmatpush.bf16.msrb.mxu3 %v4300_v17 }
 0x389   : > { %2107 = vmatpush.bf16.msrb.mxu3 %v4301_v20 }
 0x38d   : > { %2108 = vmatpush.bf16.msrb.mxu3 %v4302_v25 }
 0x391   : > { %2109 = vmatpush.bf16.msrb.mxu3 %v4303_v27  ;;  %v3831_v27 = vld [vmem:[%s5428_s2 + $0x1b8] sm:$0xff] }
 0x392   : > { %1515 = vmatpush.bf16.msra.mxu0 %v3831_v27 }
 0x395   : > { %2110 = vmatpush.bf16.msrb.mxu3 %v4304_v39  ;;  %v2095_v39 = vld [vmem:[%s4560_s22 + $0x58] sm:$0xff] }
 0x399   : > { %2111 = vmatpush.bf16.msrb.mxu3 %v4305_v45  ;;  %v2097_v45 = vld [vmem:[%s4560_s22 + $0x68] sm:$0xff] }
 0x3bc   : > { %v2042_v33 = vpop.xlane.xlu0 %2041 }
 0x3bd   : > { %2057 = vxpose.xlu0.b32.start [1/8] (short) (narrow) %v2042_v33, 8 }
 0x3c4   : > { %v2044_v8 = vpop.xlane.xlu1 %2043 }
 0x3c5   : > { %2058 = vxpose.xlu0.b32.cont [2/8] (short) (narrow) %v2044_v8, 8 }
 0x3c9   : > { %v1254_v11 = vpop.f32.mrf.mxu2 }
 0x3ca   : > { %v1255_v7 = vadd.f32 %v4956_v10, %v1254_v11 }
 0x3cc   : > { %v2046_v15 = vpop.xlane.xlu0 %2045  ;;  %v1274_v23 = vmul.f32 0.5, %v1255_v7 }
 0x3cd   : > { %2059 = vxpose.xlu0.b32.cont [3/8] (short) (narrow) %v2046_v15, 8 }
 0x3ce   : > { %4026 = vtanh.f32 %v1274_v23 }
 0x3d1   : > { %v1256_v18 = vpop.f32.mrf.mxu2 }
 0x3d2   : > { %v1257_v31 = vadd.f32 %v4956_v10, %v1256_v18 }
 0x3d4   : > { %v1275_v21 = vmul.f32 0.5, %v1257_v31  ;;  %v4027_v1 = vpop.eup %4026 }
 0x3d5   : > { %v2048_v24 = vpop.xlane.xlu1 %2047  ;;  %v1290_v29 = vadd.f32 1.0, %v4027_v1 }
 0x3d6   : > { %4028 = vtanh.f32 %v1275_v21  ;;  %2060 = vxpose.xlu0.b32.cont [4/8] (short) (narrow) %v2048_v24, 8 }
 0x3d7   : > { %v1298_v41 = vmul.f32 %v1290_v29, %v1274_v23  ;;  %v2092_v29 = vld [vmem:[%s4560_s22 + $0x40] sm:$0xff] }
 0x3d9   : > { %v1259_v37 = vpop.f32.mrf.mxu2 }
 0x3da   : > { %v1260_v60 = vadd.f32 %v4956_v10, %v1259_v37  ;;  %v2094_v37 = vld [vmem:[%s4560_s22 + $0x50] sm:$0xff] }
 0x3dc   : > { %v4029_v13 = vpop.eup %4028  ;;  %v2050_v51 = vpop.xlane.xlu0 %2049  ;;  %v1276_v47 = vmul.f32 0.5, %v1260_v60  ;;  %v3827_v60 = vld [vmem:[%s5428_s2 + $0x198] sm:$0xff] }
 0x3dd   : > { %v1291_v35 = vadd.f32 1.0, %v4029_v13 }
 0x3de   : > { %2061 = vxpose.xlu0.b32.cont [5/8] (short) (narrow) %v2050_v51, 8  ;;  %4030 = vtanh.f32 %v1276_v47  ;;  %v3829_v51 = vld [vmem:[%s5428_s2 + $0x1a8] sm:$0xff] }
 0x3df   : > { %v1299_v19 = vmul.f32 %v1291_v35, %v1275_v21  ;;  %v3830_v35 = vld [vmem:[%s5428_s2 + $0x1b0] sm:$0xff] }
 0x3e0   : > { %1516 = vmatpush.bf16.msra.mxu0 %v3830_v35 }
 0x3e1   : > { %v1325_v42 = vpack.c.bf16 %v1299_v19, %v1298_v41  ;;  %v2052_v43 = vpop.xlane.xlu1 %2051  ;;  %v1261_v48 = vpop.f32.mrf.mxu2  ;;  %v2101_v41 = vpack.c.bf16 %v2095_v39, %v2094_v37  ;;  %v3828_v19 = vld [vmem:[%s5428_s2 + $0x1a0] sm:$0xff] }
 0x3e2   : > { %v1262_v30 = vadd.f32 %v4956_v10, %v1261_v48  ;;  %v2099_v48 = vld [vmem:[%s4560_s22 + $0x78] sm:$0xff] }
 0x3e3   : > { %1388 = vmatmul.bf16.vlgmr.msra.gmra.mxu3 %v1325_v42  ;;  %v2096_v42 = vld [vmem:[%s4560_s22 + $0x60] sm:$0xff] }
 0x3e4   : > { %2364 = vmatpush.bf16.msra.mxu3 %v4673_v61  ;;  %v1277_v49 = vmul.f32 0.5, %v1262_v30  ;;  %v4031_v12 = vpop.eup %4030  ;;  %1517 = vmatpush.bf16.msra.mxu0 %v3829_v51 }
 0x3e5   : > { %v1292_v57 = vadd.f32 1.0, %v4031_v12  ;;  %v3824_v12 = vld [vmem:[%s5428_s2 + $0x180] sm:$0xff] }
 0x3e6   : > { %2062 = vxpose.xlu0.b32.cont [6/8] (short) (narrow) %v2052_v43, 8  ;;  %4032 = vtanh.f32 %v1277_v49  ;;  %v2098_v43 = vld [vmem:[%s4560_s22 + $0x70] sm:$0xff] }
 0x3e7   : > { %v1300_v5 = vmul.f32 %v1292_v57, %v1276_v47  ;;  %v2102_v47 = vpack.c.bf16 %v2097_v45, %v2096_v42  ;;  %v2103_v30 = vpack.c.bf16 %v2099_v48, %v2098_v43 }
 0x3e8   : > { %2365 = vmatpush.bf16.msra.mxu3 %v4688_v2  ;;  %1518 = vmatpush.bf16.msra.mxu0 %v3828_v19 }
 0x3e9   : > { %v2054_v22 = vpop.xlane.xlu0 %2053  ;;  %v1264_v54 = vpop.f32.mrf.mxu2 }
 0x3ea   : > { %v1265_v36 = vadd.f32 %v4956_v10, %v1264_v54  ;;  %v5033_v54 = vld [vmem:[%s5429_s3 + $0x5] ss:$0 sm:$0xff] }
 0x3ec   : > { %2366 = vmatpush.bf16.msra.mxu3 %v4708_v28  ;;  %v4033_v61 = vpop.eup %4032  ;;  %v1278_v62 = vmul.f32 0.5, %v1265_v36  ;;  %1519 = vmatpush.bf16.msra.mxu0 %v3827_v60  ;;  %v4306_v36 = vld [vmem:[%s5428_s2 + $0x78] sm:$0xff] }
 0x3ed   : > { %v1293_v63 = vadd.f32 1.0, %v4033_v61 }
 0x3ee   : > { %2063 = vxpose.xlu0.b32.cont [7/8] (short) (narrow) %v2054_v22, 8  ;;  %4034 = vtanh.f32 %v1278_v62  ;;  %v3825_v22 = vld [vmem:[%s5428_s2 + $0x188] sm:$0xff] }
 0x3ef   : > { %v1301_v33 = vmul.f32 %v1293_v63, %v1277_v49  ;;  %v3826_v49 = vld [vmem:[%s5428_s2 + $0x190] sm:$0xff] }
 0x3f0   : > { %2367 = vmatpush.bf16.msra.mxu3 %v4726_v34  ;;  %1520 = vmatpush.bf16.msra.mxu0 %v3826_v49  ;;  %v4307_v63 = vld [vmem:[%s5428_s2 + $0x70] sm:$0xff] }
 0x3f1   : > { %v2056_v4 = vpop.xlane.xlu1 %2055  ;;  %v1266_v2 = vpop.f32.mrf.mxu2  ;;  %v1326_v6 = vpack.c.bf16 %v1301_v33, %v1300_v5  ;;  %v4308_v5 = vld [vmem:[%s5428_s2 + $0x68] sm:$0xff] }
 0x3f2   : > { %v1267_v28 = vadd.f32 %v4956_v10, %v1266_v2  ;;  %v4309_v2 = vld [vmem:[%s5428_s2 + $0x60] sm:$0xff] }
 0x3f3   : > { %1393 = vmatmul.bf16.gmra.mxu3 %v1326_v6 }
 0x3f4   : > { %2368 = vmatpush.bf16.msra.mxu3 %v4744_v40  ;;  %v1279_v53 = vmul.f32 0.5, %v1267_v28  ;;  %v4035_v34 = vpop.eup %4034  ;;  %1521 = vmatpush.bf16.msra.mxu0 %v3825_v22  ;;  %v4310_v28 = vld [vmem:[%s5428_s2 + $0x58] sm:$0xff] }
 0x3f5   : > { %v1294_v11 = vadd.f32 1.0, %v4035_v34  ;;  %v4311_v34 = vld [vmem:[%s5428_s2 + $0x50] sm:$0xff] }
 0x3f6   : > { %2064 = vxpose.xlu0.b32.end [8/8] (short) (narrow) %v2056_v4, 8  ;;  %4036 = vtanh.f32 %v1279_v53 }
 0x3f7   : > { %v1302_v15 = vmul.f32 %v1294_v11, %v1278_v62 }
 0x3f8   : > { %2369 = vmatpush.bf16.msra.mxu3 %v4762_v46  ;;  %1522 = vmatpush.bf16.msra.mxu0 %v3824_v12 }
 0x3f9   : > { %v1269_v8 = vpop.f32.mrf.mxu2 }
 0x3fa   : > { %v1270_v55 = vadd.f32 %v4956_v10, %v1269_v8 }
 0x3fc   : > { %2370 = vmatpush.bf16.msra.mxu3 %v4780_v52  ;;  %v4037_v7 = vpop.eup %4036  ;;  %v1280_v14 = vmul.f32 0.5, %v1270_v55  ;;  %2169 = vmatpush.bf16.msrb.mxu0 %v4306_v36 }
 0x3fd   : > { %v1295_v40 = vadd.f32 1.0, %v4037_v7 }
 0x3fe   : > { %4038 = vtanh.f32 %v1280_v14 }
 0x3ff   : > { %v1303_v23 = vmul.f32 %v1295_v40, %v1279_v53  ;;  %v4312_v40 = vld [vmem:[%s5428_s2 + $0x48] sm:$0xff] }
 0x400   : > { %2371 = vmatpush.bf16.msra.mxu3 %v4798_v59  ;;  %2170 = vmatpush.bf16.msrb.mxu0 %v4307_v63 }
 0x401   : > { %v1271_v17 = vpop.f32.mrf.mxu2  ;;  %v1327_v18 = vpack.c.bf16 %v1303_v23, %v1302_v15 }
 0x402   : > { %v1272_v46 = vadd.f32 %v4956_v10, %v1271_v17  ;;  %v2093_v10 = vld [vmem:[%s4560_s22 + $0x48] sm:$0xff] }
 0x403   : > { %1398 = vmatmul.bf16.gmra.mxu3 %v1327_v18  ;;  %v2100_v13 = vpack.c.bf16 %v2093_v10, %v2092_v29  ;;  %v4313_v18 = vld [vmem:[%s5428_s2 + $0x40] sm:$0xff] }
 0x404   : > { %v1281_v52 = vmul.f32 0.5, %v1272_v46  ;;  %v4039_v31 = vpop.eup %4038  ;;  %2171 = vmatpush.bf16.msrb.mxu0 %v4308_v5 }
 0x405   : > { %v1296_v20 = vadd.f32 1.0, %v4039_v31 }
 0x406   : > { %4040 = vtanh.f32 %v1281_v52 }
 0x407   : > { %v1304_v25 = vmul.f32 %v1296_v20, %v1280_v14 }
 0x408   : > { %2172 = vmatpush.bf16.msrb.mxu0 %v4309_v2 }
 0x40c   : > { %v4041_v21 = vpop.eup %4040  ;;  %2173 = vmatpush.bf16.msrb.mxu0 %v4310_v28 }
 0x40d   : > { %v1297_v24 = vadd.f32 1.0, %v4041_v21 }
 0x40f   : > { %v1305_v59 = vmul.f32 %v1297_v24, %v1281_v52 }
 0x410   : > { %2174 = vmatpush.bf16.msrb.mxu0 %v4311_v34 }
 0x411   : > { %v1328_v1 = vpack.c.bf16 %v1305_v59, %v1304_v25 }
 0x413   : > { %1403 = vmatmul.bf16.gmra.mxu3 %v1328_v1 }
 0x414   : > { %2175 = vmatpush.bf16.msrb.mxu0 %v4312_v40 }
 0x418   : > { %2176 = vmatpush.bf16.msrb.mxu0 %v4313_v18 }
 0x423   : > { %2112 = vmatmul.bf16.vlgmr.msrb.gmra.mxu3 %v2100_v13 }
 0x424   : > { %2708 = vmatpush.bf16.msrb.mxu3 %v3831_v27 }
 0x428   : > { %2709 = vmatpush.bf16.msrb.mxu3 %v3830_v35 }
 0x42c   : > { %2710 = vmatpush.bf16.msrb.mxu3 %v3829_v51 }
 0x430   : > { %2711 = vmatpush.bf16.msrb.mxu3 %v3828_v19 }
 0x433   : > { %2117 = vmatmul.bf16.gmra.mxu3 %v2101_v41 }
 0x434   : > { %2712 = vmatpush.bf16.msrb.mxu3 %v3827_v60 }
 0x438   : > { %2713 = vmatpush.bf16.msrb.mxu3 %v3826_v49 }
 0x43c   : > { %2714 = vmatpush.bf16.msrb.mxu3 %v3825_v22 }
 0x440   : > { %2715 = vmatpush.bf16.msrb.mxu3 %v3824_v12 }
 0x443   : > { %2122 = vmatmul.bf16.gmra.mxu3 %v2102_v47 }
 0x453   : > { %2127 = vmatmul.bf16.gmra.mxu3 %v2103_v30  ;;  %v5078_v30 = vld [vmem:[%s5429_s3] ss:$0 sm:$0xff] }
 0x466   : > { %v1389_v57 = vpop.f32.mrf.mxu3 }
 0x467   : > { %v1390_v61 = vadd.f32 %v5033_v54, %v1389_v57 }
 0x469   : > { %v1409_v62 = vmul.f32 0.5, %v1390_v61 }
 0x46b   : > { %4042 = vtanh.f32 %v1409_v62 }
 0x46e   : > { %v1391_v4 = vpop.f32.mrf.mxu3 }
 0x46f   : > { %v1392_v33 = vadd.f32 %v5033_v54, %v1391_v4 }
 0x471   : > { %v1410_v6 = vmul.f32 0.5, %v1392_v33  ;;  %v4043_v53 = vpop.eup %4042 }
 0x472   : > { %v1425_v8 = vadd.f32 1.0, %v4043_v53 }
 0x473   : > { %4044 = vtanh.f32 %v1410_v6 }
 0x474   : > { %v1433_v14 = vmul.f32 %v1425_v8, %v1409_v62 }
 0x476   : > { %v1394_v7 = vpop.f32.mrf.mxu3 }
 0x477   : > { %v1395_v23 = vadd.f32 %v5033_v54, %v1394_v7 }
 0x479   : > { %v4045_v55 = vpop.eup %4044  ;;  %v1411_v46 = vmul.f32 0.5, %v1395_v23 }
 0x47a   : > { %v1426_v11 = vadd.f32 1.0, %v4045_v55 }
 0x47b   : > { %4046 = vtanh.f32 %v1411_v46 }
 0x47c   : > { %v1434_v15 = vmul.f32 %v1426_v11, %v1410_v6 }
 0x47e   : > { %v1460_v17 = vpack.c.bf16 %v1434_v15, %v1433_v14  ;;  %v1396_v52 = vpop.f32.mrf.mxu3  ;;  %v3839_v15 = vld [vmem:[%s5428_s2 + $0x1f8] sm:$0xff] }
 0x47f   : > { %v1397_v31 = vadd.f32 %v5033_v54, %v1396_v52  ;;  %1650 = vmatpush.bf16.msra.mxu1 %v3839_v15 }
 0x480   : > { %1523 = vmatmul.bf16.vlgmr.msra.gmra.mxu0 %v1460_v17 }
 0x481   : > { %2393 = vmatpush.bf16.msra.mxu0 %v4665_v58  ;;  %v1412_v20 = vmul.f32 0.5, %v1397_v31  ;;  %v4047_v21 = vpop.eup %4046 }
 0x482   : > { %v1427_v59 = vadd.f32 1.0, %v4047_v21 }
 0x483   : > { %4048 = vtanh.f32 %v1412_v20 }
 0x484   : > { %v1435_v29 = vmul.f32 %v1427_v59, %v1411_v46 }
 0x485   : > { %2394 = vmatpush.bf16.msra.mxu0 %v4682_v0 }
 0x486   : > { %v1399_v24 = vpop.f32.mrf.mxu3 }
 0x487   : > { %v1400_v25 = vadd.f32 %v5033_v54, %v1399_v24 }
 0x489   : > { %2395 = vmatpush.bf16.msra.mxu0 %v4703_v26  ;;  %v4049_v1 = vpop.eup %4048  ;;  %v1413_v58 = vmul.f32 0.5, %v1400_v25  ;;  %v3838_v25 = vld [vmem:[%s5428_s2 + $0x1f0] sm:$0xff] }
 0x48a   : > { %v1428_v27 = vadd.f32 1.0, %v4049_v1  ;;  %1651 = vmatpush.bf16.msra.mxu1 %v3838_v25 }
 0x48b   : > { %4050 = vtanh.f32 %v1413_v58 }
 0x48c   : > { %v1436_v10 = vmul.f32 %v1428_v27, %v1412_v20  ;;  %v3837_v27 = vld [vmem:[%s5428_s2 + $0x1e8] sm:$0xff] }
 0x48d   : > { %2396 = vmatpush.bf16.msra.mxu0 %v4721_v32 }
 0x48e   : > { %v1401_v13 = vpop.f32.mrf.mxu3  ;;  %v1461_v0 = vpack.c.bf16 %v1436_v10, %v1435_v29  ;;  %1652 = vmatpush.bf16.msra.mxu1 %v3837_v27  ;;  %v3836_v10 = vld [vmem:[%s5428_s2 + $0x1e0] sm:$0xff] }
 0x48f   : > { %v1402_v35 = vadd.f32 %v5033_v54, %v1401_v13 }
 0x490   : > { %1528 = vmatmul.bf16.gmra.mxu0 %v1461_v0 }
 0x491   : > { %2397 = vmatpush.bf16.msra.mxu0 %v4739_v38  ;;  %v1414_v26 = vmul.f32 0.5, %v1402_v35  ;;  %v4051_v51 = vpop.eup %4050  ;;  %v3835_v35 = vld [vmem:[%s5428_s2 + $0x1d8] sm:$0xff] }
 0x492   : > { %v1429_v39 = vadd.f32 1.0, %v4051_v51  ;;  %1653 = vmatpush.bf16.msra.mxu1 %v3836_v10 }
 0x493   : > { %4052 = vtanh.f32 %v1414_v26 }
 0x494   : > { %v1437_v60 = vmul.f32 %v1429_v39, %v1413_v58 }
 0x495   : > { %2398 = vmatpush.bf16.msra.mxu0 %v4757_v44 }
 0x496   : > { %v1404_v32 = vpop.f32.mrf.mxu3  ;;  %1654 = vmatpush.bf16.msra.mxu1 %v3835_v35 }
 0x497   : > { %v1405_v37 = vadd.f32 %v5033_v54, %v1404_v32 }
 0x499   : > { %2399 = vmatpush.bf16.msra.mxu0 %v4775_v50  ;;  %v4053_v41 = vpop.eup %4052  ;;  %v1415_v19 = vmul.f32 0.5, %v1405_v37 }
 0x49a   : > { %v1430_v38 = vadd.f32 1.0, %v4053_v41 }
 0x49b   : > { %4054 = vtanh.f32 %v1415_v19 }
 0x49c   : > { %v1438_v42 = vmul.f32 %v1430_v38, %v1414_v26 }
 0x49d   : > { %2400 = vmatpush.bf16.msra.mxu0 %v4793_v56 }
 0x49e   : > { %v1406_v45 = vpop.f32.mrf.mxu3  ;;  %v1462_v47 = vpack.c.bf16 %v1438_v42, %v1437_v60 }
 0x49f   : > { %v1407_v44 = vadd.f32 %v5033_v54, %v1406_v45 }
 0x4a0   : > { %1533 = vmatmul.bf16.gmra.mxu0 %v1462_v47 }
 0x4a1   : > { %v1416_v43 = vmul.f32 0.5, %v1407_v44  ;;  %v4055_v50 = vpop.eup %4054  ;;  %v3834_v44 = vld [vmem:[%s5428_s2 + $0x1d0] sm:$0xff] }
 0x4a2   : > { %v1431_v49 = vadd.f32 1.0, %v4055_v50  ;;  %1655 = vmatpush.bf16.msra.mxu1 %v3834_v44 }
 0x4a3   : > { %4056 = vtanh.f32 %v1416_v43 }
 0x4a4   : > { %v1439_v57 = vmul.f32 %v1431_v49, %v1415_v19 }
 0x4a6   : > { %v2113_v48 = vpop.f32.mrf.mxu3 }
 0x4a7   : > { %v2114_v56 = vadd.f32 %v5078_v30, %v2113_v48 }
 0x4a9   : > { %v4057_v22 = vpop.eup %4056  ;;  %v2133_v36 = vmul.f32 0.5, %v2114_v56 }
 0x4aa   : > { %v1432_v12 = vadd.f32 1.0, %v4057_v22 }
 0x4ab   : > { %4058 = vtanh.f32 %v2133_v36 }
 0x4ac   : > { %v1440_v61 = vmul.f32 %v1432_v12, %v1416_v43  ;;  %v3832_v12 = vld [vmem:[%s5428_s2 + $0x1c0] sm:$0xff] }
 0x4ae   : > { %v2115_v63 = vpop.f32.mrf.mxu3  ;;  %v1463_v54 = vpack.c.bf16 %v1440_v61, %v1439_v57  ;;  %v4315_v57 = vld [vmem:[%s5428_s2 + $0xb8] sm:$0xff] }
 0x4af   : > { %v2116_v62 = vadd.f32 %v5078_v30, %v2115_v63 }
 0x4b0   : > { %1538 = vmatmul.bf16.gmra.mxu0 %v1463_v54  ;;  %v4316_v54 = vld [vmem:[%s5428_s2 + $0xb0] sm:$0xff] }
 0x4b1   : > { %v2134_v5 = vmul.f32 0.5, %v2116_v62  ;;  %v4059_v4 = vpop.eup %4058 }
 0x4b2   : > { %v2149_v6 = vadd.f32 1.0, %v4059_v4 }
 0x4b3   : > { %4060 = vtanh.f32 %v2134_v5 }
 0x4b4   : > { %v2157_v8 = vmul.f32 %v2149_v6, %v2133_v36  ;;  %v5115_v36 = vld [vmem:[%s5429_s3 + $0x6] ss:$0 sm:$0xff] }
 0x4b6   : > { %v2118_v33 = vpop.f32.mrf.mxu3 }
 0x4b7   : > { %v2119_v2 = vadd.f32 %v5078_v30, %v2118_v33 }
 0x4b9   : > { %v4061_v28 = vpop.eup %4060  ;;  %v2135_v34 = vmul.f32 0.5, %v2119_v2  ;;  %v4318_v2 = vld [vmem:[%s5428_s2 + $0xa0] sm:$0xff] }
 0x4ba   : > { %v2150_v53 = vadd.f32 1.0, %v4061_v28  ;;  %v4319_v28 = vld [vmem:[%s5428_s2 + $0x98] sm:$0xff] }
 0x4bb   : > { %4062 = vtanh.f32 %v2135_v34 }
 0x4bc   : > { %v2158_v55 = vmul.f32 %v2150_v53, %v2134_v5  ;;  %v4317_v5 = vld [vmem:[%s5428_s2 + $0xa8] sm:$0xff] }
 0x4be   : > { %v2165_v11 = vpack.c.bf16 %v2158_v55, %v2157_v8  ;;  %v2120_v7 = vpop.f32.mrf.mxu3 }
 0x4bf   : > { %v2121_v40 = vadd.f32 %v5078_v30, %v2120_v7 }
 0x4c0   : > { %2177 = vmatmul.bf16.vlgmr.msrb.gmra.mxu0 %v2165_v11 }
 0x4c1   : > { %v2136_v14 = vmul.f32 0.5, %v2121_v40  ;;  %v4063_v23 = vpop.eup %4062  ;;  %2773 = vmatpush.bf16.msrb.mxu0 %v3839_v15  ;;  %v4321_v40 = vld [vmem:[%s5428_s2 + $0x88] sm:$0xff] }
 0x4c2   : > { %v2151_v46 = vadd.f32 1.0, %v4063_v23 }
 0x4c3   : > { %4064 = vtanh.f32 %v2136_v14 }
 0x4c4   : > { %v2159_v21 = vmul.f32 %v2151_v46, %v2135_v34  ;;  %v4320_v34 = vld [vmem:[%s5428_s2 + $0x90] sm:$0xff] }
 0x4c5   : > { %2774 = vmatpush.bf16.msrb.mxu0 %v3838_v25  ;;  %v4325_v25 = vld [vmem:[%s5428_s2 + $0x128] sm:$0xff] }
 0x4c6   : > { %v2123_v17 = vpop.f32.mrf.mxu3 }
 0x4c7   : > { %v2124_v18 = vadd.f32 %v5078_v30, %v2123_v17 }
 0x4c9   : > { %v4065_v52 = vpop.eup %4064  ;;  %v2137_v20 = vmul.f32 0.5, %v2124_v18  ;;  %2775 = vmatpush.bf16.msrb.mxu0 %v3837_v27  ;;  %v4322_v18 = vld [vmem:[%s5428_s2 + $0x80] sm:$0xff] }
 0x4ca   : > { %v2152_v31 = vadd.f32 1.0, %v4065_v52  ;;  %v4323_v52 = vld [vmem:[%s5428_s2 + $0x138] sm:$0xff] }
 0x4cb   : > { %4066 = vtanh.f32 %v2137_v20 }
 0x4cc   : > { %v2160_v24 = vmul.f32 %v2152_v31, %v2136_v14 }
 0x4cd   : > { %2776 = vmatpush.bf16.msrb.mxu0 %v3836_v10 }
 0x4ce   : > { %v2125_v59 = vpop.f32.mrf.mxu3  ;;  %v2166_v1 = vpack.c.bf16 %v2160_v24, %v2159_v21  ;;  %v4324_v21 = vld [vmem:[%s5428_s2 + $0x130] sm:$0xff] }
 0x4cf   : > { %v2126_v58 = vadd.f32 %v5078_v30, %v2125_v59 }
 0x4d0   : > { %2182 = vmatmul.bf16.gmra.mxu0 %v2166_v1 }
 0x4d1   : > { %v2138_v29 = vmul.f32 0.5, %v2126_v58  ;;  %v4067_v13 = vpop.eup %4066  ;;  %2777 = vmatpush.bf16.msrb.mxu0 %v3835_v35 }
 0x4d2   : > { %v2153_v51 = vadd.f32 1.0, %v4067_v13 }
 0x4d3   : > { %4068 = vtanh.f32 %v2138_v29 }
 0x4d4   : > { %v2161_v41 = vmul.f32 %v2153_v51, %v2137_v20  ;;  %v4327_v51 = vld [vmem:[%s5428_s2 + $0x118] sm:$0xff] }
 0x4d5   : > { %2778 = vmatpush.bf16.msrb.mxu0 %v3834_v44 }
 0x4d6   : > { %v2128_v0 = vpop.f32.mrf.mxu3 }
 0x4d7   : > { %v2129_v26 = vadd.f32 %v5078_v30, %v2128_v0 }
 0x4d9   : > { %v4069_v32 = vpop.eup %4068  ;;  %v2139_v39 = vmul.f32 0.5, %v2129_v26 }
 0x4da   : > { %v2154_v37 = vadd.f32 1.0, %v4069_v32 }
 0x4db   : > { %4070 = vtanh.f32 %v2139_v39 }
 0x4dc   : > { %v2162_v38 = vmul.f32 %v2154_v37, %v2138_v29  ;;  %v4326_v29 = vld [vmem:[%s5428_s2 + $0x120] sm:$0xff] }
 0x4de   : > { %v2130_v19 = vpop.f32.mrf.mxu3  ;;  %v2167_v60 = vpack.c.bf16 %v2162_v38, %v2161_v41  ;;  %v4328_v38 = vld [vmem:[%s5428_s2 + $0x110] sm:$0xff] }
 0x4df   : > { %v2131_v42 = vadd.f32 %v5078_v30, %v2130_v19  ;;  %v3833_v30 = vld [vmem:[%s5428_s2 + $0x1c8] sm:$0xff] }
 0x4e0   : > { %2187 = vmatmul.bf16.gmra.mxu0 %v2167_v60  ;;  %1656 = vmatpush.bf16.msra.mxu1 %v3833_v30  ;;  %v4329_v60 = vld [vmem:[%s5428_s2 + $0x108] sm:$0xff] }
 0x4e1   : > { %v2140_v45 = vmul.f32 0.5, %v2131_v42  ;;  %v4071_v47 = vpop.eup %4070  ;;  %2779 = vmatpush.bf16.msrb.mxu0 %v3833_v30 }
 0x4e2   : > { %v2155_v43 = vadd.f32 1.0, %v4071_v47 }
 0x4e3   : > { %4072 = vtanh.f32 %v2140_v45 }
 0x4e4   : > { %v2163_v56 = vmul.f32 %v2155_v43, %v2139_v39  ;;  %1657 = vmatpush.bf16.msra.mxu1 %v3832_v12  ;;  %v4330_v43 = vld [vmem:[%s5428_s2 + $0x100] sm:$0xff] }
 0x4e5   : > { %2780 = vmatpush.bf16.msrb.mxu0 %v3832_v12 }
 0x4e8   : > { %2234 = vmatpush.bf16.msrb.mxu1 %v4315_v57 }
 0x4e9   : > { %v4073_v50 = vpop.eup %4072 }
 0x4ea   : > { %v2156_v48 = vadd.f32 1.0, %v4073_v50 }
 0x4ec   : > { %v2164_v49 = vmul.f32 %v2156_v48, %v2140_v45  ;;  %2235 = vmatpush.bf16.msrb.mxu1 %v4316_v54  ;;  %v5176_v54 = vld [vmem:[%s5429_s3 + $0x1] ss:$0 sm:$0xff] }
 0x4ee   : > { %v2168_v22 = vpack.c.bf16 %v2164_v49, %v2163_v56 }
 0x4f0   : > { %2192 = vmatmul.bf16.gmra.mxu0 %v2168_v22  ;;  %2236 = vmatpush.bf16.msrb.mxu1 %v4317_v5 }
 0x4f4   : > { %2237 = vmatpush.bf16.msrb.mxu1 %v4318_v2 }
 0x4f8   : > { %2238 = vmatpush.bf16.msrb.mxu1 %v4319_v28 }
 0x4fc   : > { %2239 = vmatpush.bf16.msrb.mxu1 %v4320_v34 }
 0x4fd   : > { %v1524_v61 = vpop.f32.mrf.mxu0 }
 0x4fe   : > { %v1525_v63 = vadd.f32 %v5115_v36, %v1524_v61 }
 0x500   : > { %v1544_v62 = vmul.f32 0.5, %v1525_v63  ;;  %2240 = vmatpush.bf16.msrb.mxu1 %v4321_v40 }
 0x502   : > { %4074 = vtanh.f32 %v1544_v62 }
 0x504   : > { %2241 = vmatpush.bf16.msrb.mxu1 %v4322_v18 }
 0x505   : > { %v1526_v4 = vpop.f32.mrf.mxu0 }
 0x506   : > { %v1527_v33 = vadd.f32 %v5115_v36, %v1526_v4 }
 0x508   : > { %v1545_v6 = vmul.f32 0.5, %v1527_v33  ;;  %v4075_v53 = vpop.eup %4074 }
 0x509   : > { %v1560_v8 = vadd.f32 1.0, %v4075_v53 }
 0x50a   : > { %4076 = vtanh.f32 %v1545_v6 }
 0x50b   : > { %v1568_v14 = vmul.f32 %v1560_v8, %v1544_v62 }
 0x50d   : > { %v1529_v7 = vpop.f32.mrf.mxu0 }
 0x50e   : > { %v1530_v23 = vadd.f32 %v5115_v36, %v1529_v7 }
 0x510   : > { %v4077_v55 = vpop.eup %4076  ;;  %v1546_v46 = vmul.f32 0.5, %v1530_v23 }
 0x511   : > { %v1561_v11 = vadd.f32 1.0, %v4077_v55 }
 0x512   : > { %4078 = vtanh.f32 %v1546_v46 }
 0x513   : > { %v1569_v15 = vmul.f32 %v1561_v11, %v1545_v6 }
 0x515   : > { %v1595_v17 = vpack.c.bf16 %v1569_v15, %v1568_v14  ;;  %v1531_v31 = vpop.f32.mrf.mxu0 }
 0x516   : > { %v1532_v20 = vadd.f32 %v5115_v36, %v1531_v31 }
 0x517   : > { %1658 = vmatmul.bf16.vlgmr.msra.gmra.mxu1 %v1595_v17 }
 0x518   : > { %2578 = vmatpush.bf16.msra.mxu1 %v4323_v52  ;;  %v1547_v24 = vmul.f32 0.5, %v1532_v20  ;;  %v4079_v59 = vpop.eup %4078 }
 0x519   : > { %v1562_v58 = vadd.f32 1.0, %v4079_v59 }
 0x51a   : > { %4080 = vtanh.f32 %v1547_v24 }
 0x51b   : > { %v1570_v35 = vmul.f32 %v1562_v58, %v1546_v46 }
 0x51c   : > { %2579 = vmatpush.bf16.msra.mxu1 %v4324_v21  ;;  %v3847_v21 = vld [vmem:[%s5428_s2 + $0x238] sm:$0xff] }
 0x51d   : > { %v1534_v1 = vpop.f32.mrf.mxu0  ;;  %1785 = vmatpush.bf16.msrb.mxu2 %v3847_v21 }
 0x51e   : > { %v1535_v27 = vadd.f32 %v5115_v36, %v1534_v1 }
 0x520   : > { %2580 = vmatpush.bf16.msra.mxu1 %v4325_v25  ;;  %v4081_v10 = vpop.eup %4080  ;;  %v1548_v0 = vmul.f32 0.5, %v1535_v27 }
 0x521   : > { %v1563_v13 = vadd.f32 1.0, %v4081_v10 }
 0x522   : > { %4082 = vtanh.f32 %v1548_v0 }
 0x523   : > { %v1571_v26 = vmul.f32 %v1563_v13, %v1547_v24 }
 0x524   : > { %2581 = vmatpush.bf16.msra.mxu1 %v4326_v29 }
 0x525   : > { %v1536_v32 = vpop.f32.mrf.mxu0  ;;  %v1596_v37 = vpack.c.bf16 %v1571_v26, %v1570_v35 }
 0x526   : > { %v1537_v39 = vadd.f32 %v5115_v36, %v1536_v32 }
 0x527   : > { %1663 = vmatmul.bf16.gmra.mxu1 %v1596_v37 }
 0x528   : > { %2582 = vmatpush.bf16.msra.mxu1 %v4327_v51  ;;  %v1549_v41 = vmul.f32 0.5, %v1537_v39  ;;  %v4083_v19 = vpop.eup %4082  ;;  %v3845_v51 = vld [vmem:[%s5428_s2 + $0x228] sm:$0xff]  ;;  %v3844_v39 = vld [vmem:[%s5428_s2 + $0x220] sm:$0xff] }
 0x529   : > { %v1564_v47 = vadd.f32 1.0, %v4083_v19  ;;  %v3843_v19 = vld [vmem:[%s5428_s2 + $0x218] sm:$0xff] }
 0x52a   : > { %4084 = vtanh.f32 %v1549_v41 }
 0x52b   : > { %v1572_v56 = vmul.f32 %v1564_v47, %v1548_v0  ;;  %v3846_v0 = vld [vmem:[%s5428_s2 + $0x230] sm:$0xff] }
 0x52c   : > { %2583 = vmatpush.bf16.msra.mxu1 %v4328_v38  ;;  %1786 = vmatpush.bf16.msrb.mxu2 %v3846_v0 }
 0x52d   : > { %v1539_v42 = vpop.f32.mrf.mxu0 }
 0x52e   : > { %v1540_v45 = vadd.f32 %v5115_v36, %v1539_v42 }
 0x530   : > { %2584 = vmatpush.bf16.msra.mxu1 %v4329_v60  ;;  %v4085_v44 = vpop.eup %4084  ;;  %v1550_v48 = vmul.f32 0.5, %v1540_v45  ;;  %1787 = vmatpush.bf16.msrb.mxu2 %v3845_v51 }
 0x531   : > { %v1565_v50 = vadd.f32 1.0, %v4085_v44 }
 0x532   : > { %4086 = vtanh.f32 %v1550_v48 }
 0x533   : > { %v1573_v49 = vmul.f32 %v1565_v50, %v1549_v41 }
 0x534   : > { %2585 = vmatpush.bf16.msra.mxu1 %v4330_v43  ;;  %1788 = vmatpush.bf16.msrb.mxu2 %v3844_v39 }
 0x535   : > { %v1541_v22 = vpop.f32.mrf.mxu0  ;;  %v1597_v30 = vpack.c.bf16 %v1573_v49, %v1572_v56 }
 0x536   : > { %v1542_v12 = vadd.f32 %v5115_v36, %v1541_v22 }
 0x537   : > { %1668 = vmatmul.bf16.gmra.mxu1 %v1597_v30 }
 0x538   : > { %v1551_v57 = vmul.f32 0.5, %v1542_v12  ;;  %v4087_v61 = vpop.eup %4086  ;;  %1789 = vmatpush.bf16.msrb.mxu2 %v3843_v19  ;;  %v3842_v12 = vld [vmem:[%s5428_s2 + $0x210] sm:$0xff] }
 0x539   : > { %v1566_v5 = vadd.f32 1.0, %v4087_v61 }
 0x53a   : > { %4088 = vtanh.f32 %v1551_v57 }
 0x53b   : > { %v1574_v6 = vmul.f32 %v1566_v5, %v1550_v48 }
 0x53c   : > { %1790 = vmatpush.bf16.msrb.mxu2 %v3842_v12 }
 0x53d   : > { %v2178_v63 = vpop.f32.mrf.mxu0 }
 0x53e   : > { %v2179_v62 = vadd.f32 %v5176_v54, %v2178_v63 }
 0x540   : > { %v4089_v4 = vpop.eup %4088  ;;  %v2198_v2 = vmul.f32 0.5, %v2179_v62 }
 0x541   : > { %v1567_v33 = vadd.f32 1.0, %v4089_v4 }
 0x542   : > { %4090 = vtanh.f32 %v2198_v2 }
 0x543   : > { %v1575_v28 = vmul.f32 %v1567_v33, %v1551_v57  ;;  %v3840_v33 = vld [vmem:[%s5428_s2 + $0x200] sm:$0xff] }
 0x545   : > { %v2180_v53 = vpop.f32.mrf.mxu0  ;;  %v1598_v36 = vpack.c.bf16 %v1575_v28, %v1574_v6  ;;  %v4332_v6 = vld [vmem:[%s5428_s2 + $0xf8] sm:$0xff] }
 0x546   : > { %v2181_v34 = vadd.f32 %v5176_v54, %v2180_v53 }
 0x547   : > { %1673 = vmatmul.bf16.gmra.mxu1 %v1598_v36  ;;  %v4333_v36 = vld [vmem:[%s5428_s2 + $0xf0] sm:$0xff] }
 0x548   : > { %v2199_v8 = vmul.f32 0.5, %v2181_v34  ;;  %v4091_v55 = vpop.eup %4090 }
 0x549   : > { %v2214_v40 = vadd.f32 1.0, %v4091_v55 }
 0x54a   : > { %4092 = vtanh.f32 %v2199_v8 }
 0x54b   : > { %v2222_v17 = vmul.f32 %v2214_v40, %v2198_v2  ;;  %v5213_v2 = vld [vmem:[%s5429_s3 + $0x7] ss:$0 sm:$0xff] }
 0x54d   : > { %v2183_v11 = vpop.f32.mrf.mxu0 }
 0x54e   : > { %v2184_v7 = vadd.f32 %v5176_v54, %v2183_v11 }
 0x550   : > { %v4093_v14 = vpop.eup %4092  ;;  %v2200_v23 = vmul.f32 0.5, %v2184_v7  ;;  %v4335_v7 = vld [vmem:[%s5428_s2 + $0xe0] sm:$0xff] }
 0x551   : > { %v2215_v15 = vadd.f32 1.0, %v4093_v14  ;;  %v4336_v14 = vld [vmem:[%s5428_s2 + $0xd8] sm:$0xff] }
 0x552   : > { %4094 = vtanh.f32 %v2200_v23 }
 0x553   : > { %v2223_v18 = vmul.f32 %v2215_v15, %v2199_v8  ;;  %v4334_v8 = vld [vmem:[%s5428_s2 + $0xe8] sm:$0xff] }
 0x555   : > { %v2230_v46 = vpack.c.bf16 %v2223_v18, %v2222_v17  ;;  %v2185_v52 = vpop.f32.mrf.mxu0 }
 0x556   : > { %v2186_v31 = vadd.f32 %v5176_v54, %v2185_v52 }
 0x557   : > { %2242 = vmatmul.bf16.vlgmr.msrb.gmra.mxu1 %v2230_v46 }
 0x558   : > { %v2201_v20 = vmul.f32 0.5, %v2186_v31  ;;  %v4095_v24 = vpop.eup %4094  ;;  %2838 = vmatpush.bf16.msrb.mxu1 %v3847_v21  ;;  %v4338_v31 = vld [vmem:[%s5428_s2 + $0xc8] sm:$0xff] }
 0x559   : > { %v2216_v1 = vadd.f32 1.0, %v4095_v24 }
 0x55a   : > { %4096 = vtanh.f32 %v2201_v20 }
 0x55b   : > { %v2224_v10 = vmul.f32 %v2216_v1, %v2200_v23  ;;  %v4337_v23 = vld [vmem:[%s5428_s2 + $0xd0] sm:$0xff] }
 0x55c   : > { %2839 = vmatpush.bf16.msrb.mxu1 %v3846_v0  ;;  %v4342_v0 = vld [vmem:[%s5428_s2 + $0x168] sm:$0xff] }
 0x55d   : > { %v2188_v25 = vpop.f32.mrf.mxu0 }
 0x55e   : > { %v2189_v59 = vadd.f32 %v5176_v54, %v2188_v25 }
 0x560   : > { %v4097_v27 = vpop.eup %4096  ;;  %v2202_v29 = vmul.f32 0.5, %v2189_v59  ;;  %2840 = vmatpush.bf16.msrb.mxu1 %v3845_v51  ;;  %v4339_v59 = vld [vmem:[%s5428_s2 + $0xc0] sm:$0xff] }
 0x561   : > { %v2217_v58 = vadd.f32 1.0, %v4097_v27  ;;  %v4340_v27 = vld [vmem:[%s5428_s2 + $0x178] sm:$0xff] }
 0x562   : > { %4098 = vtanh.f32 %v2202_v29 }
 0x563   : > { %v2225_v13 = vmul.f32 %v2217_v58, %v2201_v20 }
 0x564   : > { %2841 = vmatpush.bf16.msrb.mxu1 %v3844_v39 }
 0x565   : > { %v2190_v35 = vpop.f32.mrf.mxu0  ;;  %v2231_v26 = vpack.c.bf16 %v2225_v13, %v2224_v10  ;;  %v4341_v10 = vld [vmem:[%s5428_s2 + $0x170] sm:$0xff] }
 0x566   : > { %v2191_v32 = vadd.f32 %v5176_v54, %v2190_v35 }
 0x567   : > { %2247 = vmatmul.bf16.gmra.mxu1 %v2231_v26 }
 0x568   : > { %v2203_v37 = vmul.f32 0.5, %v2191_v32  ;;  %v4099_v41 = vpop.eup %4098  ;;  %2842 = vmatpush.bf16.msrb.mxu1 %v3843_v19 }
 0x569   : > { %v2218_v42 = vadd.f32 1.0, %v4099_v41 }
 0x56a   : > { %4100 = vtanh.f32 %v2203_v37 }
 0x56b   : > { %v2226_v43 = vmul.f32 %v2218_v42, %v2202_v29  ;;  %v4344_v42 = vld [vmem:[%s5428_s2 + $0x158] sm:$0xff] }
 0x56c   : > { %2843 = vmatpush.bf16.msrb.mxu1 %v3842_v12 }
 0x56d   : > { %v2193_v38 = vpop.f32.mrf.mxu0 }
 0x56e   : > { %v2194_v60 = vadd.f32 %v5176_v54, %v2193_v38 }
 0x570   : > { %v4101_v45 = vpop.eup %4100  ;;  %v2204_v44 = vmul.f32 0.5, %v2194_v60 }
 0x571   : > { %v2219_v47 = vadd.f32 1.0, %v4101_v45 }
 0x572   : > { %4102 = vtanh.f32 %v2204_v44 }
 0x573   : > { %v2227_v50 = vmul.f32 %v2219_v47, %v2203_v37  ;;  %v4343_v37 = vld [vmem:[%s5428_s2 + $0x160] sm:$0xff] }
 0x575   : > { %v2195_v48 = vpop.f32.mrf.mxu0  ;;  %v2232_v56 = vpack.c.bf16 %v2227_v50, %v2226_v43  ;;  %v4345_v50 = vld [vmem:[%s5428_s2 + $0x150] sm:$0xff] }
 0x576   : > { %v2196_v49 = vadd.f32 %v5176_v54, %v2195_v48  ;;  %v3841_v54 = vld [vmem:[%s5428_s2 + $0x208] sm:$0xff] }
 0x577   : > { %2252 = vmatmul.bf16.gmra.mxu1 %v2232_v56  ;;  %1791 = vmatpush.bf16.msrb.mxu2 %v3841_v54  ;;  %v4346_v56 = vld [vmem:[%s5428_s2 + $0x148] sm:$0xff] }
 0x578   : > { %v2205_v22 = vmul.f32 0.5, %v2196_v49  ;;  %v4103_v30 = vpop.eup %4102  ;;  %2844 = vmatpush.bf16.msrb.mxu1 %v3841_v54 }
 0x579   : > { %v2220_v57 = vadd.f32 1.0, %v4103_v30 }
 0x57a   : > { %4104 = vtanh.f32 %v2205_v22 }
 0x57b   : > { %v2228_v62 = vmul.f32 %v2220_v57, %v2204_v44  ;;  %1792 = vmatpush.bf16.msrb.mxu2 %v3840_v33  ;;  %v4347_v57 = vld [vmem:[%s5428_s2 + $0x140] sm:$0xff] }
 0x57c   : > { %2845 = vmatpush.bf16.msrb.mxu1 %v3840_v33 }
 0x57f   : > { %2299 = vmatpush.bf16.msra.mxu2 %v4332_v6 }
 0x580   : > { %v4105_v61 = vpop.eup %4104 }
 0x581   : > { %v2221_v63 = vadd.f32 1.0, %v4105_v61 }
 0x583   : > { %v2229_v5 = vmul.f32 %v2221_v63, %v2205_v22  ;;  %2300 = vmatpush.bf16.msra.mxu2 %v4333_v36  ;;  %v4348_v36 = vld [vmem:[%s5429_s3 + $0x2] ss:$0 sm:$0xff] }
 0x585   : > { %v2233_v4 = vpack.c.bf16 %v2229_v5, %v2228_v62 }
 0x587   : > { %2257 = vmatmul.bf16.gmra.mxu1 %v2233_v4  ;;  %2301 = vmatpush.bf16.msra.mxu2 %v4334_v8 }
 0x58b   : > { %2302 = vmatpush.bf16.msra.mxu2 %v4335_v7 }
 0x58f   : > { %2303 = vmatpush.bf16.msra.mxu2 %v4336_v14 }
 0x593   : > { %2304 = vmatpush.bf16.msra.mxu2 %v4337_v23 }
 0x594   : > { %v1659_v28 = vpop.f32.mrf.mxu1 }
 0x595   : > { %v1660_v53 = vadd.f32 %v5213_v2, %v1659_v28 }
 0x597   : > { %v1679_v34 = vmul.f32 0.5, %v1660_v53  ;;  %2305 = vmatpush.bf16.msra.mxu2 %v4338_v31 }
 0x599   : > { %4106 = vtanh.f32 %v1679_v34 }
 0x59b   : > { %2306 = vmatpush.bf16.msra.mxu2 %v4339_v59 }
 0x59c   : > { %v1661_v55 = vpop.f32.mrf.mxu1 }
 0x59d   : > { %v1662_v11 = vadd.f32 %v5213_v2, %v1661_v55 }
 0x59f   : > { %v1680_v40 = vmul.f32 0.5, %v1662_v11  ;;  %v4107_v15 = vpop.eup %4106 }
 0x5a0   : > { %v1695_v17 = vadd.f32 1.0, %v4107_v15 }
 0x5a1   : > { %4108 = vtanh.f32 %v1680_v40 }
 0x5a2   : > { %v1703_v20 = vmul.f32 %v1695_v17, %v1679_v34 }
 0x5a4   : > { %v1664_v52 = vpop.f32.mrf.mxu1 }
 0x5a5   : > { %v1665_v24 = vadd.f32 %v5213_v2, %v1664_v52 }
 0x5a7   : > { %v4109_v18 = vpop.eup %4108  ;;  %v1681_v1 = vmul.f32 0.5, %v1665_v24 }
 0x5a8   : > { %v1696_v46 = vadd.f32 1.0, %v4109_v18 }
 0x5a9   : > { %4110 = vtanh.f32 %v1681_v1 }
 0x5aa   : > { %v1704_v21 = vmul.f32 %v1696_v46, %v1680_v40 }
 0x5ac   : > { %v1730_v25 = vpack.c.bf16 %v1704_v21, %v1703_v20  ;;  %v1666_v58 = vpop.f32.mrf.mxu1 }
 0x5ad   : > { %v1667_v29 = vadd.f32 %v5213_v2, %v1666_v58 }
 0x5ae   : > { %1793 = vmatmul.bf16.vlgmr.msrb.gmra.mxu2 %v1730_v25 }
 0x5af   : > { %2643 = vmatpush.bf16.msrb.mxu2 %v4340_v27  ;;  %v1682_v13 = vmul.f32 0.5, %v1667_v29  ;;  %v4111_v35 = vpop.eup %4110 }
 0x5b0   : > { %v1697_v32 = vadd.f32 1.0, %v4111_v35 }
 0x5b1   : > { %4112 = vtanh.f32 %v1682_v13 }
 0x5b2   : > { %v1705_v19 = vmul.f32 %v1697_v32, %v1681_v1 }
 0x5b3   : > { %2644 = vmatpush.bf16.msrb.mxu2 %v4341_v10 }
 0x5b4   : > { %v1669_v26 = vpop.f32.mrf.mxu1 }
 0x5b5   : > { %v1670_v51 = vadd.f32 %v5213_v2, %v1669_v26 }
 0x5b7   : > { %2645 = vmatpush.bf16.msrb.mxu2 %v4342_v0  ;;  %v4113_v39 = vpop.eup %4112  ;;  %v1683_v38 = vmul.f32 0.5, %v1670_v51 }
 0x5b8   : > { %v1698_v41 = vadd.f32 1.0, %v4113_v39 }
 0x5b9   : > { %4114 = vtanh.f32 %v1683_v38 }
 0x5ba   : > { %v1706_v60 = vmul.f32 %v1698_v41, %v1682_v13 }
 0x5bb   : > { %2646 = vmatpush.bf16.msrb.mxu2 %v4343_v37 }
 0x5bc   : > { %v1671_v45 = vpop.f32.mrf.mxu1  ;;  %v1731_v47 = vpack.c.bf16 %v1706_v60, %v1705_v19 }
 0x5bd   : > { %v1672_v44 = vadd.f32 %v5213_v2, %v1671_v45 }
 0x5be   : > { %1798 = vmatmul.bf16.gmra.mxu2 %v1731_v47 }
 0x5bf   : > { %2647 = vmatpush.bf16.msrb.mxu2 %v4344_v42  ;;  %v1684_v43 = vmul.f32 0.5, %v1672_v44  ;;  %v4115_v48 = vpop.eup %4114 }
 0x5c0   : > { %v1699_v30 = vadd.f32 1.0, %v4115_v48 }
 0x5c1   : > { %4116 = vtanh.f32 %v1684_v43 }
 0x5c2   : > { %v1707_v62 = vmul.f32 %v1699_v30, %v1683_v38 }
 0x5c3   : > { %2648 = vmatpush.bf16.msrb.mxu2 %v4345_v50 }
 0x5c4   : > { %v1674_v49 = vpop.f32.mrf.mxu1 }
 0x5c5   : > { %v1675_v22 = vadd.f32 %v5213_v2, %v1674_v49 }
 0x5c7   : > { %2649 = vmatpush.bf16.msrb.mxu2 %v4346_v56  ;;  %v4117_v12 = vpop.eup %4116  ;;  %v1685_v63 = vmul.f32 0.5, %v1675_v22 }
 0x5c8   : > { %v1700_v61 = vadd.f32 1.0, %v4117_v12 }
 0x5c9   : > { %4118 = vtanh.f32 %v1685_v63 }
 0x5ca   : > { %v1708_v5 = vmul.f32 %v1700_v61, %v1684_v43 }
 0x5cb   : > { %2650 = vmatpush.bf16.msrb.mxu2 %v4347_v57 }
 0x5cc   : > { %v1676_v4 = vpop.f32.mrf.mxu1  ;;  %v1732_v54 = vpack.c.bf16 %v1708_v5, %v1707_v62 }
 0x5cd   : > { %v1677_v33 = vadd.f32 %v5213_v2, %v1676_v4 }
 0x5ce   : > { %1803 = vmatmul.bf16.gmra.mxu2 %v1732_v54 }
 0x5cf   : > { %v1686_v6 = vmul.f32 0.5, %v1677_v33  ;;  %v4119_v28 = vpop.eup %4118 }
 0x5d0   : > { %v1701_v8 = vadd.f32 1.0, %v4119_v28 }
 0x5d1   : > { %4120 = vtanh.f32 %v1686_v6 }
 0x5d2   : > { %v1709_v40 = vmul.f32 %v1701_v8, %v1685_v63 }
 0x5d4   : > { %v2243_v53 = vpop.f32.mrf.mxu1 }
 0x5d5   : > { %v2244_v34 = vadd.f32 %v4348_v36, %v2243_v53 }
 0x5d7   : > { %v4121_v55 = vpop.eup %4120  ;;  %v2263_v7 = vmul.f32 0.5, %v2244_v34 }
 0x5d8   : > { %v1702_v11 = vadd.f32 1.0, %v4121_v55 }
 0x5d9   : > { %4122 = vtanh.f32 %v2263_v7 }
 0x5da   : > { %v1710_v14 = vmul.f32 %v1702_v11, %v1686_v6  ;;  %v3913_v6 = vld [vmem:[%s5429_s3 + $0x8] ss:$0 sm:$0xff] }
 0x5dc   : > { %v2245_v15 = vpop.f32.mrf.mxu1  ;;  %v1733_v23 = vpack.c.bf16 %v1710_v14, %v1709_v40 }
 0x5dd   : > { %v2246_v2 = vadd.f32 %v4348_v36, %v2245_v15 }
 0x5de   : > { %1808 = vmatmul.bf16.gmra.mxu2 %v1733_v23 }
 0x5df   : > { %v2264_v17 = vmul.f32 0.5, %v2246_v2  ;;  %v4123_v18 = vpop.eup %4122  ;;  %v4351_v2 = vld [vmem:[%s4560_s22 + $0x10] sm:$0xff] }
 0x5e0   : > { %v2279_v31 = vadd.f32 1.0, %v4123_v18 }
 0x5e1   : > { %4124 = vtanh.f32 %v2264_v17 }
 0x5e2   : > { %v2287_v25 = vmul.f32 %v2279_v31, %v2263_v7  ;;  %v4350_v7 = vld [vmem:[%s4560_s22 + $0x8] sm:$0xff]  ;;  %v4352_v31 = vld [vmem:[%s4560_s22 + $0x18] sm:$0xff] }
 0x5e4   : > { %v2248_v46 = vpop.f32.mrf.mxu1 }
 0x5e5   : > { %v2249_v52 = vadd.f32 %v4348_v36, %v2248_v46 }
 0x5e7   : > { %v4125_v20 = vpop.eup %4124  ;;  %v2265_v24 = vmul.f32 0.5, %v2249_v52 }
 0x5e8   : > { %v2280_v21 = vadd.f32 1.0, %v4125_v20 }
 0x5e9   : > { %4126 = vtanh.f32 %v2265_v24 }
 0x5ea   : > { %v2288_v59 = vmul.f32 %v2280_v21, %v2264_v17 }
 0x5ec   : > { %v2295_v1 = vpack.c.bf16 %v2288_v59, %v2287_v25  ;;  %v2250_v27 = vpop.f32.mrf.mxu1  ;;  %v4353_v59 = vld [vmem:[%s4560_s22 + $0x20] sm:$0xff] }
 0x5ed   : > { %v2251_v58 = vadd.f32 %v4348_v36, %v2250_v27 }
 0x5ee   : > { %2307 = vmatmul.bf16.vlgmr.msra.gmra.mxu2 %v2295_v1 }
 0x5ef   : > { %v2266_v29 = vmul.f32 0.5, %v2251_v58  ;;  %v4127_v10 = vpop.eup %4126 }
 0x5f0   : > { %v2281_v35 = vadd.f32 1.0, %v4127_v10  ;;  %v4354_v10 = vld [vmem:[%s4560_s22 + $0x28] sm:$0xff] }
 0x5f1   : > { %4128 = vtanh.f32 %v2266_v29 }
 0x5f2   : > { %v2289_v37 = vmul.f32 %v2281_v35, %v2265_v24 }
 0x5f4   : > { %v2253_v13 = vpop.f32.mrf.mxu1 }
 0x5f5   : > { %v2254_v0 = vadd.f32 %v4348_v36, %v2253_v13 }
 0x5f7   : > { %v4129_v26 = vpop.eup %4128  ;;  %v2267_v32 = vmul.f32 0.5, %v2254_v0 }
 0x5f8   : > { %v2282_v51 = vadd.f32 1.0, %v4129_v26 }
 0x5f9   : > { %4130 = vtanh.f32 %v2267_v32 }
 0x5fa   : > { %v2290_v39 = vmul.f32 %v2282_v51, %v2266_v29  ;;  %v4355_v51 = vld [vmem:[%s4560_s22 + $0x30] sm:$0xff] }
 0x5fc   : > { %v2255_v41 = vpop.f32.mrf.mxu1  ;;  %v2296_v38 = vpack.c.bf16 %v2290_v39, %v2289_v37 }
 0x5fd   : > { %v2256_v19 = vadd.f32 %v4348_v36, %v2255_v41 }
 0x5fe   : > { %2312 = vmatmul.bf16.gmra.mxu2 %v2296_v38  ;;  %v4356_v38 = vld [vmem:[%s4560_s22 + $0x38] sm:$0xff] }
 0x5ff   : > { %v2268_v60 = vmul.f32 0.5, %v2256_v19  ;;  %v4131_v42 = vpop.eup %4130 }
 0x600   : > { %v2283_v44 = vadd.f32 1.0, %v4131_v42 }
 0x601   : > { %4132 = vtanh.f32 %v2268_v60 }
 0x602   : > { %v2291_v56 = vmul.f32 %v2283_v44, %v2267_v32 }
 0x604   : > { %v2258_v45 = vpop.f32.mrf.mxu1 }
 0x605   : > { %v2259_v47 = vadd.f32 %v4348_v36, %v2258_v45  ;;  %v4357_v45 = vld [vmem:[%s5429_s3 + $0x3] ss:$0 sm:$0xff] }
 0x607   : > { %v4133_v43 = vpop.eup %4132  ;;  %v2269_v48 = vmul.f32 0.5, %v2259_v47 }
 0x608   : > { %v2284_v50 = vadd.f32 1.0, %v4133_v43 }
 0x609   : > { %4134 = vtanh.f32 %v2269_v48 }
 0x60a   : > { %v2292_v49 = vmul.f32 %v2284_v50, %v2268_v60 }
 0x60c   : > { %v2260_v22 = vpop.f32.mrf.mxu1  ;;  %v2297_v30 = vpack.c.bf16 %v2292_v49, %v2291_v56 }
 0x60d   : > { %v2261_v12 = vadd.f32 %v4348_v36, %v2260_v22  ;;  %v4349_v36 = vld [vmem:[%s4560_s22] sm:$0xff] }
 0x60e   : > { %2317 = vmatmul.bf16.gmra.mxu2 %v2297_v30 }
 0x60f   : > { %v2270_v57 = vmul.f32 0.5, %v2261_v12  ;;  %v4135_v61 = vpop.eup %4134 }
 0x610   : > { %v2285_v63 = vadd.f32 1.0, %v4135_v61 }
 0x611   : > { %4136 = vtanh.f32 %v2270_v57 }
 0x612   : > { %v2293_v4 = vmul.f32 %v2285_v63, %v2269_v48 }
 0x617   : > { %v4137_v62 = vpop.eup %4136 }
 0x618   : > { %v2286_v5 = vadd.f32 1.0, %v4137_v62 }
 0x61a   : > { %v2294_v54 = vmul.f32 %v2286_v5, %v2270_v57 }
 0x61c   : > { %v2298_v33 = vpack.c.bf16 %v2294_v54, %v2293_v4 }
 0x61e   : > { %2322 = vmatmul.bf16.gmra.mxu2 %v2298_v33 }
 0x631   : > { %v1794_v28 = vpop.f32.mrf.mxu2 }
 0x632   : > { %v1795_v53 = vadd.f32 %v3913_v6, %v1794_v28 }
 0x634   : > { %v1814_v34 = vsub.f32 %v1795_v53, %v4349_v36 }
 0x636   : > { %v1822_v8 = vmul.f32 %v1814_v34, %v1814_v34 }
 0x638   : > { %1830 = vadd.xlane.f32.xlu0 %v1822_v8 }
 0x639   : > { %v1796_v55 = vpop.f32.mrf.mxu2 }
 0x63a   : > { %v1797_v11 = vadd.f32 %v3913_v6, %v1796_v55 }
 0x63c   : > { %v1815_v40 = vsub.f32 %v1797_v11, %v4350_v7 }
 0x63e   : > { %v1823_v14 = vmul.f32 %v1815_v40, %v1815_v40 }
 0x640   : > { %1832 = vadd.xlane.f32.xlu0 %v1823_v14 }
 0x641   : > { %v1799_v15 = vpop.f32.mrf.mxu2 }
 0x642   : > { %v1800_v23 = vadd.f32 %v3913_v6, %v1799_v15 }
 0x644   : > { %v1816_v17 = vsub.f32 %v1800_v23, %v4351_v2  ;;  %v5288_v2 = vpop.trf.xlu0 }
 0x646   : > { %v1824_v18 = vmul.f32 %v1816_v17, %v1816_v17 }
 0x648   : > { %1834 = vadd.xlane.f32.xlu1 %v1824_v18 }
 0x649   : > { %v1801_v46 = vpop.f32.mrf.mxu2 }
 0x64a   : > { %v1802_v52 = vadd.f32 %v3913_v6, %v1801_v46 }
 0x64c   : > { %v1817_v20 = vsub.f32 %v1802_v52, %v4352_v31 }
 0x64e   : > { %v1825_v21 = vmul.f32 %v1817_v20, %v1817_v20 }
 0x650   : > { %1836 = vadd.xlane.f32.xlu1 %v1825_v21 }
 0x651   : > { %v1804_v24 = vpop.f32.mrf.mxu2 }
 0x652   : > { %v1805_v25 = vadd.f32 %v3913_v6, %v1804_v24 }
 0x654   : > { %v1818_v1 = vsub.f32 %v1805_v25, %v4353_v59 }
 0x656   : > { %v1826_v27 = vmul.f32 %v1818_v1, %v1818_v1 }
 0x658   : > { %1838 = vadd.xlane.f32.xlu2 %v1826_v27 }
 0x659   : > { %v1806_v58 = vpop.f32.mrf.mxu2 }
 0x65a   : > { %v1807_v29 = vadd.f32 %v3913_v6, %v1806_v58 }
 0x65c   : > { %v1819_v13 = vsub.f32 %v1807_v29, %v4354_v10 }
 0x65e   : > { %v1827_v0 = vmul.f32 %v1819_v13, %v1819_v13 }
 0x660   : > { %1840 = vadd.xlane.f32.xlu2 %v1827_v0 }
 0x661   : > { %v1809_v35 = vpop.f32.mrf.mxu2 }
 0x662   : > { %v1810_v26 = vadd.f32 %v3913_v6, %v1809_v35 }
 0x664   : > { %v1820_v32 = vsub.f32 %v1810_v26, %v4355_v51 }
 0x666   : > { %v1828_v37 = vmul.f32 %v1820_v32, %v1820_v32 }
 0x668   : > { %1842 = vadd.xlane.f32.xlu0 %v1828_v37 }
 0x669   : > { %v1811_v39 = vpop.f32.mrf.mxu2 }
 0x66a   : > { %v1812_v41 = vadd.f32 %v3913_v6, %v1811_v39 }
 0x66c   : > { %v1821_v19 = vsub.f32 %v1812_v41, %v4356_v38 }
 0x66e   : > { %v1829_v60 = vmul.f32 %v1821_v19, %v1821_v19 }
 0x670   : > { %1844 = vadd.xlane.f32.xlu1 %v1829_v60 }
 0x671   : > { %v2308_v42 = vpop.f32.mrf.mxu2 }
 0x672   : > { %v2309_v47 = vadd.f32 %v4357_v45, %v2308_v42 }
 0x674   : > { %v2328_v44 = vmul.f32 0.5, %v2309_v47 }
 0x676   : > { %4138 = vtanh.f32 %v2328_v44 }
 0x679   : > { %v2310_v43 = vpop.f32.mrf.mxu2 }
 0x67a   : > { %v2311_v50 = vadd.f32 %v4357_v45, %v2310_v43 }
 0x67c   : > { %v2329_v48 = vmul.f32 0.5, %v2311_v50  ;;  %v4139_v56 = vpop.eup %4138 }
 0x67d   : > { %v2344_v30 = vadd.f32 1.0, %v4139_v56 }
 0x67e   : > { %4140 = vtanh.f32 %v2329_v48 }
 0x67f   : > { %v2352_v63 = vmul.f32 %v2344_v30, %v2328_v44 }
 0x681   : > { %v2313_v49 = vpop.f32.mrf.mxu2 }
 0x682   : > { %v2314_v22 = vadd.f32 %v4357_v45, %v2313_v49 }
 0x684   : > { %v4141_v12 = vpop.eup %4140  ;;  %v2330_v61 = vmul.f32 0.5, %v2314_v22 }
 0x685   : > { %v2345_v57 = vadd.f32 1.0, %v4141_v12 }
 0x686   : > { %4142 = vtanh.f32 %v2330_v61 }
 0x687   : > { %v2353_v62 = vmul.f32 %v2345_v57, %v2329_v48 }
 0x689   : > { %v2360_v5 = vpack.c.bf16 %v2353_v62, %v2352_v63  ;;  %v2315_v4 = vpop.f32.mrf.mxu2 }
 0x68a   : > { %v2316_v54 = vadd.f32 %v4357_v45, %v2315_v4 }
 0x68b   : > { %2372 = vmatmul.bf16.vlgmr.msra.gmra.mxu3 %v2360_v5  ;;  %2401 = vmatmul.bf16.vlgmr.msra.gmra.mxu0 %v2360_v5 }
 0x68c   : > { %v2331_v33 = vmul.f32 0.5, %v2316_v54  ;;  %v4143_v6 = vpop.eup %4142 }
 0x68d   : > { %v2346_v36 = vadd.f32 1.0, %v4143_v6 }
 0x68e   : > { %4144 = vtanh.f32 %v2331_v33 }
 0x68f   : > { %v2354_v11 = vmul.f32 %v2346_v36, %v2330_v61 }
 0x691   : > { %v2318_v28 = vpop.f32.mrf.mxu2 }
 0x692   : > { %v2319_v53 = vadd.f32 %v4357_v45, %v2318_v28 }
 0x694   : > { %v4145_v34 = vpop.eup %4144  ;;  %v2332_v55 = vmul.f32 0.5, %v2319_v53 }
 0x695   : > { %v2347_v8 = vadd.f32 1.0, %v4145_v34 }
 0x696   : > { %4146 = vtanh.f32 %v2332_v55 }
 0x697   : > { %v2355_v7 = vmul.f32 %v2347_v8, %v2331_v33 }
 0x699   : > { %v2320_v40 = vpop.f32.mrf.mxu2  ;;  %v2361_v14 = vpack.c.bf16 %v2355_v7, %v2354_v11 }
 0x69a   : > { %v2321_v15 = vadd.f32 %v4357_v45, %v2320_v40 }
 0x69b   : > { %2377 = vmatmul.bf16.gmra.mxu3 %v2361_v14  ;;  %2406 = vmatmul.bf16.gmra.mxu0 %v2361_v14 }
 0x69c   : > { %v2333_v23 = vmul.f32 0.5, %v2321_v15  ;;  %v4147_v17 = vpop.eup %4146 }
 0x69d   : > { %v2348_v52 = vadd.f32 1.0, %v4147_v17 }
 0x69e   : > { %4148 = vtanh.f32 %v2333_v23 }
 0x69f   : > { %v2356_v25 = vmul.f32 %v2348_v52, %v2332_v55 }
 0x6a1   : > { %v2323_v18 = vpop.f32.mrf.mxu2 }
 0x6a2   : > { %v2324_v46 = vadd.f32 %v4357_v45, %v2323_v18 }
 0x6a4   : > { %v4149_v31 = vpop.eup %4148  ;;  %v2334_v21 = vmul.f32 0.5, %v2324_v46 }
 0x6a5   : > { %v2349_v20 = vadd.f32 1.0, %v4149_v31 }
 0x6a7   : > { %v2357_v59 = vmul.f32 %v2349_v20, %v2333_v23 }
 0x6a9   : > { %v2325_v1 = vpop.f32.mrf.mxu2  ;;  %v2362_v27 = vpack.c.bf16 %v2357_v59, %v2356_v25 }
 0x6aa   : > { %v2326_v58 = vadd.f32 %v4357_v45, %v2325_v1 }
 0x6ab   : > { %v1831_v24 = vpop.xlane.xlu0 %1830  ;;  %2382 = vmatmul.bf16.gmra.mxu3 %v2362_v27  ;;  %2411 = vmatmul.bf16.gmra.mxu0 %v2362_v27 }
 0x6ac   : > { %4150 = vrsqrt.f32 %v1831_v24  ;;  %v2335_v29 = vmul.f32 0.5, %v2326_v58  ;;  %vm1853_vm9 = vcmp.eq.f32.partialorder %v1831_v24, inf  ;;  %v1856_v50 = vand.u32 2147483648, %v1831_v24 }
 0x6ad   : > { %4152 = vtanh.f32 %v2334_v21  ;;  %vm1855_vm10 = vcmp.eq.f32.partialorder %v1831_v24, 0.0 }
 0x6ae   : > { %4154 = vtanh.f32 %v2335_v29 }
 0x6b2   : > { %v4151_v10 = vpop.eup %4150 }
 0x6b3   : > { %v1833_v13 = vpop.xlane.xlu0 %1832  ;;  %v1847_v0 = vmul.f32 %v4151_v10, %v1831_v24  ;;  %v4153_v35 = vpop.eup %4152 }
 0x6b4   : > { %4156 = vrsqrt.f32 %v1833_v13  ;;  %v2350_v32 = vadd.f32 1.0, %v4153_v35  ;;  %v4155_v37 = vpop.eup %4154  ;;  %vm1865_vm11 = vcmp.eq.f32.partialorder %v1833_v13, inf  ;;  %v1868_v61 = vand.u32 2147483648, %v1833_v13 }
 0x6b5   : > { %v1848_v26 = vmul.f32 %v4151_v10, %v1847_v0  ;;  %v2351_v38 = vadd.f32 1.0, %v4155_v37  ;;  %vm1867_vm12 = vcmp.eq.f32.partialorder %v1833_v13, 0.0 }
 0x6b6   : > { %v2358_v42 = vmul.f32 %v2350_v32, %v2334_v21 }
 0x6b7   : > { %v1849_v51 = vmul.f32 0.5, %v1848_v26  ;;  %v2359_v45 = vmul.f32 %v2351_v38, %v2335_v29 }
 0x6b9   : > { %v1850_v39 = vsub.f32 1.5, %v1849_v51  ;;  %v2363_v43 = vpack.c.bf16 %v2359_v45, %v2358_v42 }
 0x6ba   : > { %v4157_v41 = vpop.eup %4156 }
 0x6bb   : > { %v1851_v19 = vmul.f32 %v4151_v10, %v1850_v39  ;;  %v1859_v60 = vmul.f32 %v4157_v41, %v1833_v13  ;;  %2387 = vmatmul.bf16.gmra.mxu3 %v2363_v43  ;;  %2416 = vmatmul.bf16.gmra.mxu0 %v2363_v43  ;;  %v1835_v49 = vpop.xlane.xlu1 %1834 }
 0x6bc   : > { %4158 = vrsqrt.f32 %v1835_v49  ;;  %vm1877_vm13 = vcmp.eq.f32.partialorder %v1835_v49, inf  ;;  %v1880_v7 = vand.u32 2147483648, %v1835_v49  ;;  %vm1879_vm14 = vcmp.eq.f32.partialorder %v1835_v49, 0.0 }
 0x6bd   : > { %v1852_v47 = vmul.f32 %v1851_v19, %v1831_v24  ;;  %v1860_v44 = vmul.f32 %v4157_v41, %v1859_v60 }
 0x6bf   : > { %v1854_v48 = vsel %vm1853_vm9, %v1831_v24, %v1852_v47  ;;  %v1861_v56 = vmul.f32 0.5, %v1860_v44 }
 0x6c0   : > { %v1857_v22 = vsel %vm1855_vm10, %v1856_v50, %v1854_v48 }
 0x6c1   : > { %1942 = vxpose.xlu2.b32.start [1/8] (short) (narrow) %v1857_v22, 8  ;;  %v1862_v30 = vsub.f32 1.5, %v1861_v56 }
 0x6c2   : > { %v4159_v63 = vpop.eup %4158 }
 0x6c3   : > { %v1863_v12 = vmul.f32 %v4157_v41, %v1862_v30  ;;  %v1837_v5 = vpop.xlane.xlu1 %1836  ;;  %v1871_v54 = vmul.f32 %v4159_v63, %v1835_v49 }
 0x6c4   : > { %4160 = vrsqrt.f32 %v1837_v5  ;;  %vm1889_vm15 = vcmp.eq.f32.partialorder %v1837_v5, inf  ;;  %v1892_v21 = vand.u32 2147483648, %v1837_v5  ;;  %vm1891_vm0 = vcmp.eq.f32.partialorder %v1837_v5, 0.0 }
 0x6c5   : > { %v1864_v57 = vmul.f32 %v1863_v12, %v1833_v13  ;;  %v1872_v33 = vmul.f32 %v4159_v63, %v1871_v54 }
 0x6c7   : > { %v1866_v62 = vsel %vm1865_vm11, %v1833_v13, %v1864_v57  ;;  %v1873_v6 = vmul.f32 0.5, %v1872_v33 }
 0x6c8   : > { %v1869_v4 = vsel %vm1867_vm12, %v1868_v61, %v1866_v62 }
 0x6c9   : > { %1943 = vxpose.xlu2.b32.cont [2/8] (short) (narrow) %v1869_v4, 8  ;;  %v1874_v28 = vsub.f32 1.5, %v1873_v6 }
 0x6ca   : > { %v4161_v53 = vpop.eup %4160 }
 0x6cb   : > { %v1839_v36 = vpop.xlane.xlu2 %1838  ;;  %v1875_v34 = vmul.f32 %v4159_v63, %v1874_v28  ;;  %v1883_v8 = vmul.f32 %v4161_v53, %v1837_v5 }
 0x6cc   : > { %4162 = vrsqrt.f32 %v1839_v36  ;;  %vm1901_vm1 = vcmp.eq.f32.partialorder %v1839_v36, inf  ;;  %v1904_v35 = vand.u32 2147483648, %v1839_v36  ;;  %vm1903_vm2 = vcmp.eq.f32.partialorder %v1839_v36, 0.0 }
 0x6cd   : > { %v1876_v55 = vmul.f32 %v1875_v34, %v1835_v49  ;;  %v1884_v11 = vmul.f32 %v4161_v53, %v1883_v8 }
 0x6cf   : > { %v1878_v40 = vsel %vm1877_vm13, %v1835_v49, %v1876_v55  ;;  %v1885_v14 = vmul.f32 0.5, %v1884_v11 }
 0x6d0   : > { %v1881_v15 = vsel %vm1879_vm14, %v1880_v7, %v1878_v40 }
 0x6d1   : > { %1944 = vxpose.xlu2.b32.cont [3/8] (short) (narrow) %v1881_v15, 8  ;;  %v1886_v23 = vsub.f32 1.5, %v1885_v14 }
 0x6d2   : > { %v4163_v17 = vpop.eup %4162 }
 0x6d3   : > { %v1841_v18 = vpop.xlane.xlu2 %1840  ;;  %v1887_v46 = vmul.f32 %v4161_v53, %v1886_v23  ;;  %v1895_v52 = vmul.f32 %v4163_v17, %v1839_v36 }
 0x6d4   : > { %4164 = vrsqrt.f32 %v1841_v18  ;;  %vm1913_vm4 = vcmp.eq.f32.partialorder %v1841_v18, inf  ;;  %v1916_v45 = vand.u32 2147483648, %v1841_v18  ;;  %vm1915_vm5 = vcmp.eq.f32.partialorder %v1841_v18, 0.0 }
 0x6d5   : > { %v1888_v31 = vmul.f32 %v1887_v46, %v1837_v5  ;;  %v1896_v20 = vmul.f32 %v4163_v17, %v1895_v52 }
 0x6d7   : > { %v1890_v24 = vsel %vm1889_vm15, %v1837_v5, %v1888_v31  ;;  %v1897_v25 = vmul.f32 0.5, %v1896_v20 }
 0x6d8   : > { %v1893_v59 = vsel %vm1891_vm0, %v1892_v21, %v1890_v24 }
 0x6d9   : > { %1945 = vxpose.xlu2.b32.cont [4/8] (short) (narrow) %v1893_v59, 8  ;;  %v1898_v1 = vsub.f32 1.5, %v1897_v25 }
 0x6da   : > { %v4165_v27 = vpop.eup %4164 }
 0x6db   : > { %v1843_v58 = vpop.xlane.xlu0 %1842  ;;  %v1899_v29 = vmul.f32 %v4163_v17, %v1898_v1  ;;  %v1907_v10 = vmul.f32 %v4165_v27, %v1841_v18 }
 0x6dc   : > { %4166 = vrsqrt.f32 %v1843_v58  ;;  %vm1925_vm6 = vcmp.eq.f32.partialorder %v1843_v58, inf  ;;  %v1928_v12 = vand.u32 2147483648, %v1843_v58  ;;  %vm1927_vm7 = vcmp.eq.f32.partialorder %v1843_v58, 0.0 }
 0x6dd   : > { %v1900_v13 = vmul.f32 %v1899_v29, %v1839_v36  ;;  %v1908_v0 = vmul.f32 %v4165_v27, %v1907_v10 }
 0x6df   : > { %v1902_v26 = vsel %vm1901_vm1, %v1839_v36, %v1900_v13  ;;  %v1909_v51 = vmul.f32 0.5, %v1908_v0 }
 0x6e0   : > { %v1905_v32 = vsel %vm1903_vm2, %v1904_v35, %v1902_v26 }
 0x6e1   : > { %1946 = vxpose.xlu2.b32.cont [5/8] (short) (narrow) %v1905_v32, 8  ;;  %v1910_v37 = vsub.f32 1.5, %v1909_v51 }
 0x6e2   : > { %v4167_v39 = vpop.eup %4166 }
 0x6e3   : > { %v1845_v41 = vpop.xlane.xlu1 %1844  ;;  %v1911_v38 = vmul.f32 %v4165_v27, %v1910_v37  ;;  %v1919_v19 = vmul.f32 %v4167_v39, %v1843_v58 }
 0x6e4   : > { %4168 = vrsqrt.f32 %v1845_v41  ;;  %vm1937_vm8 = vcmp.eq.f32.partialorder %v1845_v41, inf  ;;  %v1940_v54 = vand.u32 2147483648, %v1845_v41  ;;  %vm1939_vm9 = vcmp.eq.f32.partialorder %v1845_v41, 0.0 }
 0x6e5   : > { %v1912_v60 = vmul.f32 %v1911_v38, %v1841_v18  ;;  %v1920_v42 = vmul.f32 %v4167_v39, %v1919_v19 }
 0x6e7   : > { %v1914_v47 = vsel %vm1913_vm4, %v1841_v18, %v1912_v60  ;;  %v1921_v44 = vmul.f32 0.5, %v1920_v42 }
 0x6e8   : > { %v1917_v43 = vsel %vm1915_vm5, %v1916_v45, %v1914_v47 }
 0x6e9   : > { %1947 = vxpose.xlu2.b32.cont [6/8] (short) (narrow) %v1917_v43, 8  ;;  %v1922_v50 = vsub.f32 1.5, %v1921_v44 }
 0x6ea   : > { %v4169_v48 = vpop.eup %4168 }
 0x6eb   : > { %v1923_v56 = vmul.f32 %v4167_v39, %v1922_v50  ;;  %v1931_v49 = vmul.f32 %v4169_v48, %v1845_v41 }
 0x6ed   : > { %v1924_v22 = vmul.f32 %v1923_v56, %v1843_v58  ;;  %v1932_v30 = vmul.f32 %v4169_v48, %v1931_v49 }
 0x6ef   : > { %v1926_v57 = vsel %vm1925_vm6, %v1843_v58, %v1924_v22  ;;  %v1933_v61 = vmul.f32 0.5, %v1932_v30  ;;  %v2550_v30 = vld [vmem:[%s4852_s16 + $0x40] sm:$0xff] }
 0x6f0   : > { %v1929_v63 = vsel %vm1927_vm7, %v1928_v12, %v1926_v57 }
 0x6f1   : > { %1948 = vxpose.xlu2.b32.cont [7/8] (short) (narrow) %v1929_v63, 8  ;;  %v1934_v62 = vsub.f32 1.5, %v1933_v61 }
 0x6f3   : > { %v1935_v5 = vmul.f32 %v4169_v48, %v1934_v62  ;;  %v2551_v62 = vld [vmem:[%s4852_s16 + $0x48] sm:$0xff] }
 0x6f5   : > { %v1936_v4 = vmul.f32 %v1935_v5, %v1845_v41 }
 0x6f7   : > { %v1938_v33 = vsel %vm1937_vm8, %v1845_v41, %v1936_v4 }
 0x6f8   : > { %v1941_v6 = vsel %vm1939_vm9, %v1940_v54, %v1938_v33 }
 0x6f9   : > { %1949 = vxpose.xlu2.b32.end [8/8] (short) (narrow) %v1941_v6, 8 }
 0x708   : > { %v2402_v28 = vpop.f32.mrf.mxu0 }
 0x709   : > { %v2403_v53 = vadd.f32 %v2402_v28, %v4823_v9 }
 0x70b   : > { %v2430_v36 = vand.u32 2147483647, %v2403_v53  ;;  %v2422_v35 = vmax.f32 %v2403_v53, 0.0 }
 0x70d   : > { %v2438_v34 = vsub.f32 0.0, %v2430_v36 }
 0x70e   : > { %v2373_v46 = vpop.f32.mrf.mxu3 }
 0x70f   : > { %v2446_v8 = vmul.f32 1.442695, %v2438_v34  ;;  %v2374_v22 = vadd.f32 %v2373_v46, %v4858_v16 }
 0x710   : > { %v2404_v55 = vpop.f32.mrf.mxu0 }
 0x711   : > { %4170 = vpow2.f32 %v2446_v8  ;;  %v2405_v11 = vadd.f32 %v2404_v55, %v4823_v9  ;;  %v3035_v53 = vmul.f32 %v2374_v22, %v2374_v22 }
 0x713   : > { %v2431_v7 = vand.u32 2147483647, %v2405_v11  ;;  %v2423_v49 = vmax.f32 %v2405_v11, 0.0 }
 0x715   : > { %v2439_v40 = vsub.f32 0.0, %v2431_v7 }
 0x716   : > { %v2375_v51 = vpop.f32.mrf.mxu3 }
 0x717   : > { %v4171_v14 = vpop.eup %4170  ;;  %v2448_v15 = vmul.f32 1.442695, %v2439_v40  ;;  %v2376_v36 = vadd.f32 %v2375_v51, %v4858_v16 }
 0x718   : > { %v2462_v23 = vadd.f32 1.0, %v4171_v14  ;;  %v2465_v17 = vmul.f32 -0.5, %v4171_v14  ;;  %v2407_v18 = vpop.f32.mrf.mxu0  ;;  %v2468_v24 = vand.u32 2147483647, %v4171_v14 }
 0x719   : > { %4172 = vpow2.f32 %v2448_v15  ;;  %v5293_v52 = vadd.f32 %v2407_v18, %v4823_v9 }
 0x71a   : > { %4174 = vlog2.f32 %v2462_v23  ;;  %v2466_v20 = vadd.f32 1.0, %v2465_v17  ;;  %vm2469_vm10 = vcmp.lt.f32.partialorder %v2468_v24, 0.0004427343 }
 0x71b   : > { %v2432_v31 = vand.u32 2147483647, %v5293_v52  ;;  %v2424_v34 = vmax.f32 %v5293_v52, 0.0 }
 0x71c   : > { %v2467_v27 = vmul.f32 %v4171_v14, %v2466_v20 }
 0x71d   : > { %v2440_v21 = vsub.f32 0.0, %v2432_v31 }
 0x71e   : > { %v5307_v5 = vpop.f32.mrf.mxu3 }
 0x71f   : > { %v4173_v25 = vpop.eup %4172  ;;  %v2450_v59 = vmul.f32 1.442695, %v2440_v21 }
 0x720   : > { %v4175_v1 = vpop.eup %4174  ;;  %v2471_v58 = vadd.f32 1.0, %v4173_v25  ;;  %v2409_v29 = vpop.f32.mrf.mxu0  ;;  %v2474_v13 = vmul.f32 -0.5, %v4173_v25  ;;  %v2477_v38 = vand.u32 2147483647, %v4173_v25 }
 0x721   : > { %v2464_v10 = vmul.f32 0.6931472, %v4175_v1  ;;  %4176 = vpow2.f32 %v2450_v59  ;;  %v5297_v0 = vadd.f32 %v2409_v29, %v4823_v9 }
 0x722   : > { %4178 = vlog2.f32 %v2471_v58  ;;  %v2475_v39 = vadd.f32 1.0, %v2474_v13  ;;  %vm2478_vm11 = vcmp.lt.f32.partialorder %v2477_v38, 0.0004427343 }
 0x723   : > { %v2470_v26 = vsel %vm2469_vm10, %v2467_v27, %v2464_v10  ;;  %v2433_v32 = vand.u32 2147483647, %v5297_v0 }
 0x724   : > { %v2534_v37 = vadd.f32 %v2470_v26, %v2422_v35  ;;  %v2476_v48 = vmul.f32 %v4173_v25, %v2475_v39 }
 0x725   : > { %v2441_v41 = vsub.f32 0.0, %v2433_v32 }
 0x726   : > { %v2542_v45 = vadd.f32 1e-08, %v2534_v37  ;;  %v2380_v26 = vpop.f32.mrf.mxu3 }
 0x727   : > { %v4177_v19 = vpop.eup %4176  ;;  %v2452_v60 = vmul.f32 1.442695, %v2441_v41 }
 0x728   : > { %v4179_v42 = vpop.eup %4178  ;;  %v2480_v47 = vadd.f32 1.0, %v4177_v19  ;;  %v2483_v44 = vmul.f32 -0.5, %v4177_v19  ;;  %v2412_v43 = vpop.f32.mrf.mxu0  ;;  %v2558_v54 = vmul.f32 %v2550_v30, %v2542_v45  ;;  %v2486_v6 = vand.u32 2147483647, %v4177_v19 }
 0x729   : > { %v2473_v50 = vmul.f32 0.6931472, %v4179_v42  ;;  %4180 = vpow2.f32 %v2452_v60  ;;  %v5301_v56 = vadd.f32 %v2412_v43, %v4823_v9  ;;  %v3027_v15 = vmul.f32 %v2542_v45, %v2542_v45 }
 0x72a   : > { %4182 = vlog2.f32 %v2480_v47  ;;  %v2484_v63 = vadd.f32 1.0, %v2483_v44  ;;  %v2566_v31 = vadd.f32 %v2558_v54, %v2374_v22  ;;  %vm2487_vm12 = vcmp.lt.f32.partialorder %v2486_v6, 0.0004427343 }
 0x72b   : > { %v2479_v12 = vsel %vm2478_vm11, %v2476_v48, %v2473_v50  ;;  %v2434_v57 = vand.u32 2147483647, %v5301_v56  ;;  %4184 = vlog2.f32 %v2542_v45  ;;  %v3043_v1 = vadd.f32 %v3035_v53, %v3027_v15 }
 0x72c   : > { %v2535_v61 = vadd.f32 %v2479_v12, %v2423_v49  ;;  %v2485_v7 = vmul.f32 %v4177_v19, %v2484_v63  ;;  %v2552_v19 = vld [vmem:[%s4852_s16 + $0x50] sm:$0xff]  ;;  %v2425_v47 = vmax.f32 %v5297_v0, 0.0  ;;  %v2379_v0 = vadd.f32 %v5307_v5, %v4858_v16 }
 0x72d   : > { %v2442_v4 = vsub.f32 0.0, %v2434_v57  ;;  %v3036_v57 = vmul.f32 %v2376_v36, %v2376_v36 }
 0x72e   : > { %v2543_v33 = vadd.f32 1e-08, %v2535_v61  ;;  %v2553_v61 = vld [vmem:[%s4852_s16 + $0x58] sm:$0xff] }
 0x72f   : > { %v4181_v28 = vpop.eup %4180  ;;  %v2454_v8 = vmul.f32 1.442695, %v2442_v4 }
 0x730   : > { %v4183_v55 = vpop.eup %4182  ;;  %v2559_v11 = vmul.f32 %v2551_v62, %v2543_v33  ;;  %v2489_v40 = vadd.f32 1.0, %v4181_v28  ;;  %v2414_v14 = vpop.f32.mrf.mxu0  ;;  %v2492_v17 = vmul.f32 -0.5, %v4181_v28  ;;  %v2495_v10 = vand.u32 2147483647, %v4181_v28 }
 0x731   : > { %v2482_v23 = vmul.f32 0.6931472, %v4183_v55  ;;  %4186 = vpow2.f32 %v2454_v8  ;;  %v5312_v18 = vadd.f32 %v2414_v14, %v4823_v9  ;;  %v4185_v46 = vpop.eup %4184  ;;  %v3028_v48 = vmul.f32 %v2543_v33, %v2543_v33 }
 0x732   : > { %v2567_v20 = vadd.f32 %v2559_v11, %v2376_v36  ;;  %4188 = vlog2.f32 %v2489_v40  ;;  %v3052_v24 = vmul.f32 0.6931472, %v4185_v46  ;;  %v2493_v27 = vadd.f32 1.0, %v2492_v17 }
 0x733   : > { %v2488_v21 = vsel %vm2487_vm12, %v2485_v7, %v2482_v23  ;;  %v2435_v52 = vand.u32 2147483647, %v5312_v18  ;;  %4190 = vlog2.f32 %v2543_v33  ;;  %vm2496_vm13 = vcmp.lt.f32.partialorder %v2495_v10, 0.0004427343  ;;  %v2383_v23 = vpop.f32.mrf.mxu3 }
 0x734   : > { %v2574_v25 = vpack.c.bf16 %v2567_v20, %v2566_v31  ;;  %v2536_v59 = vadd.f32 %v2488_v21, %v2424_v34  ;;  %v3067_v29 = vmul.f32 2.0, %v3052_v24  ;;  %v2494_v42 = vmul.f32 %v4181_v28, %v2493_v27 }
 0x735   : > { %v2443_v58 = vsub.f32 0.0, %v2435_v52  ;;  %v2381_v28 = vadd.f32 %v2380_v26, %v4858_v16  ;;  %v2426_v33 = vmax.f32 %v5301_v56, 0.0  ;;  %v3044_v34 = vadd.f32 %v3036_v57, %v3028_v48 }
 0x736   : > { %2586 = vmatmul.bf16.vlgmr.msra.gmra.mxu1 %v2574_v25  ;;  %v2544_v35 = vadd.f32 1e-08, %v2536_v59  ;;  %v3075_v32 = vsub.f32 %v3043_v1, %v3067_v29  ;;  %v3037_v24 = vmul.f32 %v2379_v0, %v2379_v0 }
 0x737   : > { %v4187_v13 = vpop.eup %4186  ;;  %v2456_v51 = vmul.f32 1.442695, %v2443_v58 }
 0x738   : > { %v4189_v37 = vpop.eup %4188  ;;  %v2498_v39 = vadd.f32 1.0, %v4187_v13  ;;  %v2501_v41 = vmul.f32 -0.5, %v4187_v13  ;;  %v2417_v38 = vpop.f32.mrf.mxu0  ;;  %v3083_v45 = vsel %vm1976_vm3, %v3075_v32, 0.0  ;;  %v2560_v49 = vmul.f32 %v2552_v19, %v2544_v35 }
 0x739   : > { %v2491_v60 = vmul.f32 0.6931472, %v4189_v37  ;;  %4192 = vpow2.f32 %v2456_v51  ;;  %3091 = vadd.xlane.f32.xlu1 %v3083_v45  ;;  %v4191_v44 = vpop.eup %4190  ;;  %v5320_v50 = vadd.f32 %v2417_v38, %v4823_v9  ;;  %v2504_v4 = vand.u32 2147483647, %v4187_v13 }
 0x73a   : > { %4194 = vlog2.f32 %v2498_v39  ;;  %v2502_v30 = vadd.f32 1.0, %v2501_v41  ;;  %v3054_v12 = vmul.f32 0.6931472, %v4191_v44  ;;  %v2568_v55 = vadd.f32 %v2560_v49, %v2379_v0 }
 0x73b   : > { %v2497_v43 = vsel %vm2496_vm13, %v2494_v42, %v2491_v60  ;;  %4196 = vlog2.f32 %v2544_v35  ;;  %v2436_v63 = vand.u32 2147483647, %v5320_v50  ;;  %vm2505_vm14 = vcmp.lt.f32.partialorder %v2504_v4, 0.0004427343 }
 0x73c   : > { %v2537_v22 = vadd.f32 %v2497_v43, %v2425_v47  ;;  %v3068_v54 = vmul.f32 2.0, %v3054_v12  ;;  %v2503_v36 = vmul.f32 %v4187_v13, %v2502_v30  ;;  %v3029_v20 = vmul.f32 %v2544_v35, %v2544_v35  ;;  %v2554_v47 = vld [vmem:[%s4852_s16 + $0x60] sm:$0xff]  ;;  %v2385_v43 = vpop.f32.mrf.mxu3  ;;  %v2555_v12 = vld [vmem:[%s4852_s16 + $0x68] sm:$0xff] }
 0x73d   : > { %v2444_v53 = vsub.f32 0.0, %v2436_v63  ;;  %v2384_v37 = vadd.f32 %v2383_v23, %v4858_v16  ;;  %v2427_v19 = vmax.f32 %v5312_v18, 0.0  ;;  %v3038_v30 = vmul.f32 %v2381_v28, %v2381_v28 }
 0x73e   : > { %v2545_v62 = vadd.f32 1e-08, %v2537_v22  ;;  %v3076_v46 = vsub.f32 %v3044_v34, %v3068_v54  ;;  %v3045_v13 = vadd.f32 %v3037_v24, %v3029_v20 }
 0x73f   : > { %v4193_v6 = vpop.eup %4192  ;;  %v2458_v17 = vmul.f32 1.442695, %v2444_v53  ;;  %v3039_v63 = vmul.f32 %v2384_v37, %v2384_v37  ;;  %v2386_v53 = vadd.f32 %v2385_v43, %v4858_v16 }
 0x740   : > { %v4195_v8 = vpop.eup %4194  ;;  %v2561_v11 = vmul.f32 %v2553_v61, %v2545_v62  ;;  %v2507_v7 = vadd.f32 1.0, %v4193_v6  ;;  %v2419_v40 = vpop.f32.mrf.mxu0  ;;  %v2510_v5 = vmul.f32 -0.5, %v4193_v6  ;;  %v3084_v56 = vsel %vm1976_vm3, %v3076_v46, 0.0 }
 0x741   : > { %v4197_v14 = vpop.eup %4196  ;;  %v2500_v15 = vmul.f32 0.6931472, %v4195_v8  ;;  %v5331_v52 = vadd.f32 %v2419_v40, %v4823_v9  ;;  %3093 = vadd.xlane.f32.xlu1 %v3084_v56  ;;  %v2513_v10 = vand.u32 2147483647, %v4193_v6  ;;  %v3030_v42 = vmul.f32 %v2545_v62, %v2545_v62 }
 0x742   : > { %v2569_v31 = vadd.f32 %v2561_v11, %v2381_v28  ;;  %4198 = vlog2.f32 %v2507_v7  ;;  %v3056_v1 = vmul.f32 0.6931472, %v4197_v14  ;;  %v2511_v27 = vadd.f32 1.0, %v2510_v5 }
 0x743   : > { %v2506_v21 = vsel %vm2505_vm14, %v2503_v36, %v2500_v15  ;;  %4200 = vpow2.f32 %v2458_v17  ;;  %v2437_v58 = vand.u32 2147483647, %v5331_v52  ;;  %vm2514_vm15 = vcmp.lt.f32.partialorder %v2513_v10, 0.0004427343 }
 0x744   : > { %v2538_v25 = vadd.f32 %v2506_v21, %v2426_v33  ;;  %v2575_v59 = vpack.c.bf16 %v2569_v31, %v2568_v55  ;;  %4202 = vlog2.f32 %v2545_v62  ;;  %v3069_v35 = vmul.f32 2.0, %v3056_v1  ;;  %v2388_v56 = vpop.f32.mrf.mxu3 }
 0x745   : > { %v2445_v26 = vsub.f32 0.0, %v2437_v58  ;;  %v2512_v41 = vmul.f32 %v4193_v6, %v2511_v27  ;;  %v3046_v54 = vadd.f32 %v3038_v30, %v3030_v42  ;;  %v2428_v31 = vmax.f32 %v5320_v50, 0.0 }
 0x746   : > { %v2546_v29 = vadd.f32 1e-08, %v2538_v25  ;;  %2591 = vmatmul.bf16.gmra.mxu1 %v2575_v59  ;;  %v3077_v32 = vsub.f32 %v3045_v13, %v3069_v35  ;;  %v3040_v27 = vmul.f32 %v2386_v53, %v2386_v53 }
 0x747   : > { %v2460_v38 = vmul.f32 1.442695, %v2445_v26 }
 0x748   : > { %v4199_v51 = vpop.eup %4198  ;;  %4204 = vlog2.f32 %v2546_v29  ;;  %v3085_v49 = vsel %vm1976_vm3, %v3077_v32, 0.0  ;;  %v2562_v18 = vmul.f32 %v2554_v47, %v2546_v29  ;;  %v3031_v62 = vmul.f32 %v2546_v29, %v2546_v29  ;;  %v2557_v47 = vld [vmem:[%s4852_s16 + $0x78] sm:$0xff] }
 0x749   : > { %v4201_v9 = vpop.eup %4200  ;;  %v2509_v39 = vmul.f32 0.6931472, %v4199_v51  ;;  %4206 = vpow2.f32 %v2460_v38  ;;  %3095 = vadd.xlane.f32.xlu1 %v3085_v49  ;;  %v2556_v38 = vld [vmem:[%s4852_s16 + $0x70] sm:$0xff]  ;;  %s3170_s16 = scalar_lea.hbm %s5433_s7, %s4497_s28 }
 0x74a   : > { %v2516_v60 = vadd.f32 1.0, %v4201_v9  ;;  %v4203_v45 = vpop.eup %4202  ;;  %v2519_v48 = vmul.f32 -0.5, %v4201_v9  ;;  %v2522_v8 = vand.u32 2147483647, %v4201_v9  ;;  %v2570_v7 = vadd.f32 %v2562_v18, %v2384_v37  ;;  %s3174_s19 = sshll.u32 %s3170_s16, 4  ;;  %s3175_s19 = int_to_ptr.hbm [resolvable:$true] %s3174_s19 }
 0x74b   : > { %v2515_v44 = vsel %vm2514_vm15, %v2512_v41, %v2509_v39  ;;  %v3058_v57 = vmul.f32 0.6931472, %v4203_v45  ;;  %v3047_v15 = vadd.f32 %v3039_v63, %v3031_v62  ;;  %v2429_v39 = vmax.f32 %v5331_v52, 0.0  ;;  %s4385_s17 = sshra.s32 %s3175_s19, 4  ;;  %s4386_s17 = int_to_ptr.hbm [resolvable:$true] %s4385_s17 }
 0x74c   : > { %v2539_v22 = vadd.f32 %v2515_v44, %v2427_v19  ;;  %4208 = vlog2.f32 %v2516_v60  ;;  %v2520_v4 = vadd.f32 1.0, %v2519_v48  ;;  %vm2523_vm0 = vcmp.lt.f32.partialorder %v2522_v8, 0.0004427343  ;;  %v2390_v45 = vpop.f32.mrf.mxu3  ;;  %s4387_s18 = scalar_lea.hbm %s4386_s17, 1  ;;  %p4392_p0 = scmp.lt.s32.totalorder %s4386_s17, %s5433_s7 }
 0x74d   : > { %v3070_v6 = vmul.f32 2.0, %v3058_v57  ;;  %v2389_v41 = vadd.f32 %v2388_v56, %v4858_v16  ;;  %v2391_v52 = vadd.f32 %v2390_v45, %v4858_v16  ;;  %p4388_p11 = scmp.ne.s32.totalorder %s4386_s17, %s4387_s18  ;;  %p4393_p1 = scmp.lt.s32.totalorder %s4391_s23, %s4387_s18 }
 0x74e   : > { %v4205_v61 = vpop.eup %4204  ;;  %v2547_v0 = vadd.f32 1e-08, %v2539_v22  ;;  %v2521_v5 = vmul.f32 %v4201_v9, %v2520_v4 }
 0x74f   : > { %v3060_v33 = vmul.f32 0.6931472, %v4205_v61  ;;  %v4207_v55 = vpop.eup %4206  ;;  %v3078_v11 = vsub.f32 %v3046_v54, %v3070_v6  ;;  %v3041_v22 = vmul.f32 %v2389_v41, %v2389_v41  ;;  %p4389_p12 = pnand %p4388_p11, %p4514_p5  ;;  %p4394_p2 = por %p4393_p1, %p4392_p0 }
 0x750   : > { %v2563_v34 = vmul.f32 %v2555_v12, %v2547_v0  ;;  %4210 = vlog2.f32 %v2547_v0  ;;  %v2525_v14 = vadd.f32 1.0, %v4207_v55  ;;  %v2528_v17 = vmul.f32 -0.5, %v4207_v55 }
 0x751   : > { %v3071_v36 = vmul.f32 2.0, %v3060_v33  ;;  %v3086_v46 = vsel %vm1976_vm3, %v3078_v11, 0.0  ;;  %v3032_v25 = vmul.f32 %v2547_v0, %v2547_v0  ;;  %v2531_v13 = vand.u32 2147483647, %v4207_v55  ;;  %p4390_p13 = pneg %p4389_p12 }
 0x752   : > { %v4209_v28 = vpop.eup %4208  ;;  %v2571_v40 = vadd.f32 %v2563_v34, %v2386_v53  ;;  %4212 = vlog2.f32 %v2525_v14  ;;  %3097 = vadd.xlane.f32.xlu1 %v3086_v46  ;;  %v2529_v58 = vadd.f32 1.0, %v2528_v17  ;;  %v3042_v33 = vmul.f32 %v2391_v52, %v2391_v52 }
 0x753   : > { %v2518_v23 = vmul.f32 0.6931472, %v4209_v28  ;;  %v3079_v24 = vsub.f32 %v3047_v15, %v3071_v36  ;;  %v3048_v35 = vadd.f32 %v3040_v27, %v3032_v25  ;;  %vm2532_vm1 = vcmp.lt.f32.partialorder %v2531_v13, 0.0004427343  ;;  %v4358_v36 = vld [vmem:[%s5429_s3 + $0x4] ss:$0 sm:$0xff]  ;;  %p4395_p3 = pnand %p4394_p2, %p4390_p13 }
 0x754   : > { %v2576_v20 = vpack.c.bf16 %v2571_v40, %v2570_v7  ;;  %v2530_v9 = vmul.f32 %v4207_v55, %v2529_v58 }
 0x755   : > { %v2524_v21 = vsel %vm2523_vm0, %v2521_v5, %v2518_v23  ;;  %v3087_v50 = vsel %vm1976_vm3, %v3079_v24, 0.0 }
 0x756   : > { %v4211_v59 = vpop.eup %4210  ;;  %v2540_v1 = vadd.f32 %v2524_v21, %v2428_v31  ;;  %2596 = vmatmul.bf16.gmra.mxu1 %v2576_v20 }
 0x757   : > { %v3062_v29 = vmul.f32 0.6931472, %v4211_v59 }
 0x758   : > { %v2548_v10 = vadd.f32 1e-08, %v2540_v1  ;;  %v4213_v51 = vpop.eup %4212 }
 0x759   : > { %v3072_v26 = vmul.f32 2.0, %v3062_v29  ;;  %v2527_v32 = vmul.f32 0.6931472, %v4213_v51 }
 0x75a   : > { %4214 = vlog2.f32 %v2548_v10  ;;  %3099 = vadd.xlane.f32.xlu1 %v3087_v50  ;;  %v3033_v44 = vmul.f32 %v2548_v10, %v2548_v10  ;;  %v2564_v48 = vmul.f32 %v2556_v38, %v2548_v10 }
 0x75b   : > { %v3080_v37 = vsub.f32 %v3048_v35, %v3072_v26  ;;  %v2533_v19 = vsel %vm2532_vm1, %v2530_v9, %v2527_v32 }
 0x75c   : > { %v2541_v42 = vadd.f32 %v2533_v19, %v2429_v39  ;;  %v3049_v57 = vadd.f32 %v3041_v22, %v3033_v44  ;;  %v2572_v18 = vadd.f32 %v2564_v48, %v2389_v41 }
 0x75d   : > { %v3088_v60 = vsel %vm1976_vm3, %v3080_v37, 0.0 }
 0x75e   : > { %3101 = vadd.xlane.f32.xlu0 %v3088_v60  ;;  %v2549_v49 = vadd.f32 1e-08, %v2541_v42 }
 0x760   : > { %v4215_v43 = vpop.eup %4214  ;;  %v2565_v12 = vmul.f32 %v2557_v47, %v2549_v49  ;;  %4216 = vlog2.f32 %v2549_v49  ;;  %v3034_v54 = vmul.f32 %v2549_v49, %v2549_v49 }
 0x761   : > { %v3064_v30 = vmul.f32 0.6931472, %v4215_v43 }
 0x762   : > { %v2573_v63 = vadd.f32 %v2565_v12, %v2391_v52  ;;  %v3050_v34 = vadd.f32 %v3042_v33, %v3034_v54 }
 0x763   : > { %v3073_v61 = vmul.f32 2.0, %v3064_v30 }
 0x764   : > { %v2577_v62 = vpack.c.bf16 %v2573_v63, %v2572_v18 }
 0x765   : > { %v3081_v0 = vsub.f32 %v3049_v57, %v3073_v61 }
 0x766   : > { %v4217_v6 = vpop.eup %4216  ;;  %2601 = vmatmul.bf16.gmra.mxu1 %v2577_v62 }
 0x767   : > { %v3089_v4 = vsel %vm1976_vm3, %v3081_v0, 0.0  ;;  %v3066_v53 = vmul.f32 0.6931472, %v4217_v6 }
 0x768   : > { %3103 = vadd.xlane.f32.xlu1 %v3089_v4  ;;  %v4359_v4 = vld [vmem:[%s5429_s3 + $0x5] ss:$0 sm:$0xff] }
 0x769   : > { %v3074_v8 = vmul.f32 2.0, %v3066_v53 }
 0x76b   : > { %v3082_v16 = vsub.f32 %v3050_v34, %v3074_v8 }
 0x76d   : > { %v3090_v55 = vsel %vm1976_vm3, %v3082_v16, 0.0 }
 0x770   : > { %3105 = vadd.xlane.f32.xlu1 %v3090_v55 }
 0x7b3   : > { %v2587_v11 = vpop.f32.mrf.mxu1 }
 0x7b4   : > { %v2588_v28 = vadd.f32 %v4358_v36, %v2587_v11 }
 0x7b6   : > { %v2607_v7 = vmul.f32 0.5, %v2588_v28 }
 0x7b8   : > { %4218 = vtanh.f32 %v2607_v7 }
 0x7bb   : > { %v2589_v40 = vpop.f32.mrf.mxu1 }
 0x7bc   : > { %v2590_v14 = vadd.f32 %v4358_v36, %v2589_v40 }
 0x7be   : > { %v2608_v15 = vmul.f32 0.5, %v2590_v14  ;;  %v4219_v23 = vpop.eup %4218 }
 0x7bf   : > { %v2623_v46 = vadd.f32 1.0, %v4219_v23 }
 0x7c0   : > { %4220 = vtanh.f32 %v2608_v15 }
 0x7c1   : > { %v2631_v21 = vmul.f32 %v2623_v46, %v2607_v7 }
 0x7c3   : > { %v2592_v5 = vpop.f32.mrf.mxu1 }
 0x7c4   : > { %v2593_v17 = vadd.f32 %v4358_v36, %v2592_v5 }
 0x7c6   : > { %v4221_v31 = vpop.eup %4220  ;;  %v2609_v20 = vmul.f32 0.5, %v2593_v17 }
 0x7c7   : > { %v2624_v3 = vadd.f32 1.0, %v4221_v31 }
 0x7c8   : > { %4222 = vtanh.f32 %v2609_v20 }
 0x7c9   : > { %v2632_v56 = vmul.f32 %v2624_v3, %v2608_v15 }
 0x7cb   : > { %v2639_v24 = vpack.c.bf16 %v2632_v56, %v2631_v21  ;;  %v2594_v25 = vpop.f32.mrf.mxu1 }
 0x7cc   : > { %v2595_v59 = vadd.f32 %v4358_v36, %v2594_v25 }
 0x7cd   : > { %2651 = vmatmul.bf16.vlgmr.msrb.gmra.mxu2 %v2639_v24 }
 0x7ce   : > { %v2610_v1 = vmul.f32 0.5, %v2595_v59  ;;  %v4223_v27 = vpop.eup %4222 }
 0x7cf   : > { %v2625_v10 = vadd.f32 1.0, %v4223_v27 }
 0x7d0   : > { %4224 = vtanh.f32 %v2610_v1 }
 0x7d1   : > { %v2633_v26 = vmul.f32 %v2625_v10, %v2609_v20 }
 0x7d3   : > { %v2597_v58 = vpop.f32.mrf.mxu1 }
 0x7d4   : > { %v2598_v29 = vadd.f32 %v4358_v36, %v2597_v58 }
 0x7d6   : > { %v4225_v13 = vpop.eup %4224  ;;  %v2611_v35 = vmul.f32 0.5, %v2598_v29 }
 0x7d7   : > { %v2626_v50 = vadd.f32 1.0, %v4225_v13 }
 0x7d8   : > { %4226 = vtanh.f32 %v2611_v35 }
 0x7d9   : > { %v2634_v51 = vmul.f32 %v2626_v50, %v2610_v1 }
 0x7db   : > { %v2599_v32 = vpop.f32.mrf.mxu1  ;;  %v2640_v9 = vpack.c.bf16 %v2634_v51, %v2633_v26 }
 0x7dc   : > { %v2600_v37 = vadd.f32 %v4358_v36, %v2599_v32 }
 0x7dd   : > { %2656 = vmatmul.bf16.gmra.mxu2 %v2640_v9 }
 0x7de   : > { %v2612_v39 = vmul.f32 0.5, %v2600_v37  ;;  %v4227_v41 = vpop.eup %4226 }
 0x7df   : > { %v2627_v38 = vadd.f32 1.0, %v4227_v41 }
 0x7e0   : > { %4228 = vtanh.f32 %v2612_v39 }
 0x7e1   : > { %v2635_v47 = vmul.f32 %v2627_v38, %v2611_v35 }
 0x7e3   : > { %v2602_v19 = vpop.f32.mrf.mxu1 }
 0x7e4   : > { %v2603_v42 = vadd.f32 %v4358_v36, %v2602_v19 }
 0x7e6   : > { %v4229_v60 = vpop.eup %4228  ;;  %v2613_v43 = vmul.f32 0.5, %v2603_v42 }
 0x7e7   : > { %v2628_v45 = vadd.f32 1.0, %v4229_v60 }
 0x7e8   : > { %4230 = vtanh.f32 %v2613_v43 }
 0x7e9   : > { %v2636_v44 = vmul.f32 %v2628_v45, %v2612_v39 }
 0x7eb   : > { %v2641_v48 = vpack.c.bf16 %v2636_v44, %v2635_v47  ;;  %v2604_v49 = vpop.f32.mrf.mxu1 }
 0x7ec   : > { %v2605_v22 = vadd.f32 %v4358_v36, %v2604_v49 }
 0x7ed   : > { %2661 = vmatmul.bf16.gmra.mxu2 %v2641_v48 }
 0x7ee   : > { %v2614_v30 = vmul.f32 0.5, %v2605_v22  ;;  %v4231_v52 = vpop.eup %4230  ;;  %v4360_v22 = vld [vmem:[%s5429_s3 + $0x6] ss:$0 sm:$0xff] }
 0x7ef   : > { %v2629_v12 = vadd.f32 1.0, %v4231_v52 }
 0x7f0   : > { %4232 = vtanh.f32 %v2614_v30 }
 0x7f1   : > { %v2637_v18 = vmul.f32 %v2629_v12, %v2613_v43 }
 0x7f6   : > { %v4233_v57 = vpop.eup %4232 }
 0x7f7   : > { %v2630_v61 = vadd.f32 1.0, %v4233_v57 }
 0x7f9   : > { %v2638_v63 = vmul.f32 %v2630_v61, %v2614_v30 }
 0x7fb   : > { %v2642_v0 = vpack.c.bf16 %v2638_v63, %v2637_v18 }
 0x7fd   : > { %2666 = vmatmul.bf16.gmra.mxu2 %v2642_v0 }
 0x850   : > { %v2652_v62 = vpop.f32.mrf.mxu2 }
 0x851   : > { %v2653_v54 = vadd.f32 %v4359_v4, %v2652_v62 }
 0x853   : > { %v2672_v6 = vmul.f32 0.5, %v2653_v54 }
 0x855   : > { %4234 = vtanh.f32 %v2672_v6 }
 0x858   : > { %v2654_v33 = vpop.f32.mrf.mxu2 }
 0x859   : > { %v2655_v53 = vadd.f32 %v4359_v4, %v2654_v33 }
 0x85b   : > { %v2673_v34 = vmul.f32 0.5, %v2655_v53  ;;  %v4235_v8 = vpop.eup %4234 }
 0x85c   : > { %v2688_v11 = vadd.f32 1.0, %v4235_v8 }
 0x85d   : > { %4236 = vtanh.f32 %v2673_v34 }
 0x85e   : > { %v2696_v40 = vmul.f32 %v2688_v11, %v2672_v6 }
 0x860   : > { %v2657_v16 = vpop.f32.mrf.mxu2 }
 0x861   : > { %v2658_v55 = vadd.f32 %v4359_v4, %v2657_v16 }
 0x863   : > { %v4237_v36 = vpop.eup %4236  ;;  %v2674_v7 = vmul.f32 0.5, %v2658_v55 }
 0x864   : > { %v2689_v28 = vadd.f32 1.0, %v4237_v36 }
 0x865   : > { %4238 = vtanh.f32 %v2674_v7 }
 0x866   : > { %v2697_v14 = vmul.f32 %v2689_v28, %v2673_v34 }
 0x868   : > { %v2704_v15 = vpack.c.bf16 %v2697_v14, %v2696_v40  ;;  %v2659_v23 = vpop.f32.mrf.mxu2 }
 0x869   : > { %v2660_v5 = vadd.f32 %v4359_v4, %v2659_v23 }
 0x86a   : > { %2716 = vmatmul.bf16.vlgmr.msrb.gmra.mxu3 %v2704_v15 }
 0x86b   : > { %v2675_v17 = vmul.f32 0.5, %v2660_v5  ;;  %v4239_v46 = vpop.eup %4238 }
 0x86c   : > { %v2690_v20 = vadd.f32 1.0, %v4239_v46 }
 0x86d   : > { %4240 = vtanh.f32 %v2675_v17 }
 0x86e   : > { %v2698_v25 = vmul.f32 %v2690_v20, %v2674_v7 }
 0x870   : > { %v2662_v31 = vpop.f32.mrf.mxu2 }
 0x871   : > { %v2663_v3 = vadd.f32 %v4359_v4, %v2662_v31 }
 0x873   : > { %v4241_v21 = vpop.eup %4240  ;;  %v2676_v24 = vmul.f32 0.5, %v2663_v3 }
 0x874   : > { %v2691_v56 = vadd.f32 1.0, %v4241_v21 }
 0x875   : > { %4242 = vtanh.f32 %v2676_v24 }
 0x876   : > { %v2699_v59 = vmul.f32 %v2691_v56, %v2675_v17 }
 0x878   : > { %v2664_v1 = vpop.f32.mrf.mxu2  ;;  %v2705_v27 = vpack.c.bf16 %v2699_v59, %v2698_v25 }
 0x879   : > { %v2665_v58 = vadd.f32 %v4359_v4, %v2664_v1 }
 0x87a   : > { %2721 = vmatmul.bf16.gmra.mxu3 %v2705_v27 }
 0x87b   : > { %v2677_v29 = vmul.f32 0.5, %v2665_v58  ;;  %v4243_v10 = vpop.eup %4242 }
 0x87c   : > { %v2692_v13 = vadd.f32 1.0, %v4243_v10 }
 0x87d   : > { %4244 = vtanh.f32 %v2677_v29 }
 0x87e   : > { %v2700_v32 = vmul.f32 %v2692_v13, %v2676_v24 }
 0x880   : > { %v2667_v50 = vpop.f32.mrf.mxu2 }
 0x881   : > { %v2668_v26 = vadd.f32 %v4359_v4, %v2667_v50 }
 0x883   : > { %v4245_v35 = vpop.eup %4244  ;;  %v2678_v37 = vmul.f32 0.5, %v2668_v26 }
 0x884   : > { %v2693_v51 = vadd.f32 1.0, %v4245_v35 }
 0x885   : > { %4246 = vtanh.f32 %v2678_v37 }
 0x886   : > { %v2701_v9 = vmul.f32 %v2693_v51, %v2677_v29 }
 0x888   : > { %v2706_v39 = vpack.c.bf16 %v2701_v9, %v2700_v32  ;;  %v2669_v41 = vpop.f32.mrf.mxu2 }
 0x889   : > { %v2670_v38 = vadd.f32 %v4359_v4, %v2669_v41 }
 0x88a   : > { %2726 = vmatmul.bf16.gmra.mxu3 %v2706_v39 }
 0x88b   : > { %v2679_v19 = vmul.f32 0.5, %v2670_v38  ;;  %v4247_v60 = vpop.eup %4246  ;;  %v4361_v38 = vld [vmem:[%s5429_s3 + $0x7] ss:$0 sm:$0xff] }
 0x88c   : > { %v2694_v42 = vadd.f32 1.0, %v4247_v60 }
 0x88d   : > { %4248 = vtanh.f32 %v2679_v19 }
 0x88e   : > { %v2702_v44 = vmul.f32 %v2694_v42, %v2678_v37 }
 0x893   : > { %v4249_v45 = vpop.eup %4248 }
 0x894   : > { %v2695_v47 = vadd.f32 1.0, %v4249_v45 }
 0x896   : > { %v2703_v43 = vmul.f32 %v2695_v47, %v2679_v19 }
 0x898   : > { %v2707_v48 = vpack.c.bf16 %v2703_v43, %v2702_v44 }
 0x89a   : > { %2731 = vmatmul.bf16.gmra.mxu3 %v2707_v48 }
 0x8ed   : > { %v2717_v49 = vpop.f32.mrf.mxu3 }
 0x8ee   : > { %v2718_v30 = vadd.f32 %v4360_v22, %v2717_v49 }
 0x8f0   : > { %v2737_v52 = vmul.f32 0.5, %v2718_v30 }
 0x8f2   : > { %4250 = vtanh.f32 %v2737_v52 }
 0x8f5   : > { %v2719_v12 = vpop.f32.mrf.mxu3 }
 0x8f6   : > { %v2720_v57 = vadd.f32 %v4360_v22, %v2719_v12 }
 0x8f8   : > { %v2738_v61 = vmul.f32 0.5, %v2720_v57  ;;  %v4251_v18 = vpop.eup %4250 }
 0x8f9   : > { %v2753_v62 = vadd.f32 1.0, %v4251_v18 }
 0x8fa   : > { %4252 = vtanh.f32 %v2738_v61 }
 0x8fb   : > { %v2761_v33 = vmul.f32 %v2753_v62, %v2737_v52 }
 0x8fd   : > { %v2722_v63 = vpop.f32.mrf.mxu3 }
 0x8fe   : > { %v2723_v0 = vadd.f32 %v4360_v22, %v2722_v63 }
 0x900   : > { %v4253_v4 = vpop.eup %4252  ;;  %v2739_v6 = vmul.f32 0.5, %v2723_v0 }
 0x901   : > { %v2754_v54 = vadd.f32 1.0, %v4253_v4 }
 0x902   : > { %4254 = vtanh.f32 %v2739_v6 }
 0x903   : > { %v2762_v53 = vmul.f32 %v2754_v54, %v2738_v61 }
 0x905   : > { %v2769_v34 = vpack.c.bf16 %v2762_v53, %v2761_v33  ;;  %v2724_v8 = vpop.f32.mrf.mxu3 }
 0x906   : > { %v2725_v16 = vadd.f32 %v4360_v22, %v2724_v8 }
 0x907   : > { %2781 = vmatmul.bf16.vlgmr.msrb.gmra.mxu0 %v2769_v34 }
 0x908   : > { %v2740_v55 = vmul.f32 0.5, %v2725_v16  ;;  %v4255_v11 = vpop.eup %4254 }
 0x909   : > { %v2755_v7 = vadd.f32 1.0, %v4255_v11 }
 0x90a   : > { %4256 = vtanh.f32 %v2740_v55 }
 0x90b   : > { %v2763_v23 = vmul.f32 %v2755_v7, %v2739_v6 }
 0x90d   : > { %v2727_v36 = vpop.f32.mrf.mxu3 }
 0x90e   : > { %v2728_v28 = vadd.f32 %v4360_v22, %v2727_v36 }
 0x910   : > { %v4257_v40 = vpop.eup %4256  ;;  %v2741_v15 = vmul.f32 0.5, %v2728_v28 }
 0x911   : > { %v2756_v14 = vadd.f32 1.0, %v4257_v40 }
 0x912   : > { %4258 = vtanh.f32 %v2741_v15 }
 0x913   : > { %v2764_v5 = vmul.f32 %v2756_v14, %v2740_v55 }
 0x915   : > { %v2729_v17 = vpop.f32.mrf.mxu3  ;;  %v2770_v46 = vpack.c.bf16 %v2764_v5, %v2763_v23 }
 0x916   : > { %v2730_v31 = vadd.f32 %v4360_v22, %v2729_v17 }
 0x917   : > { %2786 = vmatmul.bf16.gmra.mxu0 %v2770_v46 }
 0x918   : > { %v2742_v3 = vmul.f32 0.5, %v2730_v31  ;;  %v4259_v20 = vpop.eup %4258 }
 0x919   : > { %v2757_v21 = vadd.f32 1.0, %v4259_v20 }
 0x91a   : > { %4260 = vtanh.f32 %v2742_v3 }
 0x91b   : > { %v2765_v1 = vmul.f32 %v2757_v21, %v2741_v15 }
 0x91d   : > { %v2732_v56 = vpop.f32.mrf.mxu3 }
 0x91e   : > { %v2733_v25 = vadd.f32 %v4360_v22, %v2732_v56 }
 0x920   : > { %v4261_v24 = vpop.eup %4260  ;;  %v2743_v58 = vmul.f32 0.5, %v2733_v25 }
 0x921   : > { %v2758_v59 = vadd.f32 1.0, %v4261_v24 }
 0x922   : > { %4262 = vtanh.f32 %v2743_v58 }
 0x923   : > { %v2766_v27 = vmul.f32 %v2758_v59, %v2742_v3 }
 0x925   : > { %v2771_v29 = vpack.c.bf16 %v2766_v27, %v2765_v1  ;;  %v2734_v10 = vpop.f32.mrf.mxu3 }
 0x926   : > { %v2735_v13 = vadd.f32 %v4360_v22, %v2734_v10 }
 0x927   : > { %2791 = vmatmul.bf16.gmra.mxu0 %v2771_v29 }
 0x928   : > { %v2744_v50 = vmul.f32 0.5, %v2735_v13  ;;  %v4263_v35 = vpop.eup %4262  ;;  %v4362_v13 = vld [vmem:[%s5429_s3 + $0x8] ss:$0 sm:$0xff] }
 0x929   : > { %v2759_v26 = vadd.f32 1.0, %v4263_v35  ;;  %v4363_v35 = vld [vmem:[%s4560_s22 + $0x40] sm:$0xff] }
 0x92a   : > { %4264 = vtanh.f32 %v2744_v50 }
 0x92b   : > { %v2767_v9 = vmul.f32 %v2759_v26, %v2743_v58 }
 0x930   : > { %v4265_v51 = vpop.eup %4264 }
 0x931   : > { %v2760_v32 = vadd.f32 1.0, %v4265_v51 }
 0x933   : > { %v2768_v37 = vmul.f32 %v2760_v32, %v2744_v50 }
 0x935   : > { %v2772_v39 = vpack.c.bf16 %v2768_v37, %v2767_v9  ;;  %v4364_v37 = vld [vmem:[%s4560_s22 + $0x48] sm:$0xff] }
 0x937   : > { %2796 = vmatmul.bf16.gmra.mxu0 %v2772_v39 }
 0x984   : > { %v2782_v41 = vpop.f32.mrf.mxu0 }
 0x985   : > { %v2783_v19 = vadd.f32 %v4361_v38, %v2782_v41 }
 0x987   : > { %v2802_v60 = vmul.f32 0.5, %v2783_v19 }
 0x989   : > { %4266 = vtanh.f32 %v2802_v60 }
 0x98c   : > { %v2784_v42 = vpop.f32.mrf.mxu0 }
 0x98d   : > { %v2785_v45 = vadd.f32 %v4361_v38, %v2784_v42 }
 0x98f   : > { %v2803_v47 = vmul.f32 0.5, %v2785_v45  ;;  %v4267_v44 = vpop.eup %4266 }
 0x990   : > { %v2818_v49 = vadd.f32 1.0, %v4267_v44 }
 0x991   : > { %4268 = vtanh.f32 %v2803_v47 }
 0x992   : > { %v2826_v12 = vmul.f32 %v2818_v49, %v2802_v60  ;;  %v4365_v60 = vld [vmem:[%s4560_s22 + $0x50] sm:$0xff] }
 0x994   : > { %v2787_v43 = vpop.f32.mrf.mxu0 }
 0x995   : > { %v2788_v48 = vadd.f32 %v4361_v38, %v2787_v43  ;;  %v4366_v43 = vld [vmem:[%s4560_s22 + $0x58] sm:$0xff] }
 0x997   : > { %v4269_v22 = vpop.eup %4268  ;;  %v2804_v52 = vmul.f32 0.5, %v2788_v48 }
 0x998   : > { %v2819_v30 = vadd.f32 1.0, %v4269_v22 }
 0x999   : > { %4270 = vtanh.f32 %v2804_v52 }
 0x99a   : > { %v2827_v57 = vmul.f32 %v2819_v30, %v2803_v47 }
 0x99c   : > { %v2834_v61 = vpack.c.bf16 %v2827_v57, %v2826_v12  ;;  %v2789_v18 = vpop.f32.mrf.mxu0 }
 0x99d   : > { %v2790_v63 = vadd.f32 %v4361_v38, %v2789_v18 }
 0x99e   : > { %2846 = vmatmul.bf16.vlgmr.msrb.gmra.mxu1 %v2834_v61 }
 0x99f   : > { %v2805_v0 = vmul.f32 0.5, %v2790_v63  ;;  %v4271_v62 = vpop.eup %4270  ;;  %v4368_v63 = vld [vmem:[%s4560_s22 + $0x68] sm:$0xff] }
 0x9a0   : > { %v2820_v6 = vadd.f32 1.0, %v4271_v62 }
 0x9a1   : > { %4272 = vtanh.f32 %v2805_v0 }
 0x9a2   : > { %v2828_v8 = vmul.f32 %v2820_v6, %v2804_v52  ;;  %v4367_v52 = vld [vmem:[%s4560_s22 + $0x60] sm:$0xff]  ;;  %v4369_v6 = vld [vmem:[%s4560_s22 + $0x70] sm:$0xff] }
 0x9a4   : > { %v2792_v4 = vpop.f32.mrf.mxu0 }
 0x9a5   : > { %v2793_v54 = vadd.f32 %v4361_v38, %v2792_v4 }
 0x9a7   : > { %v4273_v33 = vpop.eup %4272  ;;  %v2806_v34 = vmul.f32 0.5, %v2793_v54 }
 0x9a8   : > { %v2821_v53 = vadd.f32 1.0, %v4273_v33 }
 0x9a9   : > { %4274 = vtanh.f32 %v2806_v34 }
 0x9aa   : > { %v2829_v16 = vmul.f32 %v2821_v53, %v2805_v0 }
 0x9ac   : > { %v2794_v55 = vpop.f32.mrf.mxu0  ;;  %v2835_v11 = vpack.c.bf16 %v2829_v16, %v2828_v8 }
 0x9ad   : > { %v2795_v36 = vadd.f32 %v4361_v38, %v2794_v55  ;;  %v4370_v55 = vld [vmem:[%s4560_s22 + $0x78] sm:$0xff]  ;;  %s4435_s22 = smov 64  }
 0x9ae   : > { %2851 = vmatmul.bf16.gmra.mxu1 %v2835_v11 }
 0x9af   : > { %v2807_v28 = vmul.f32 0.5, %v2795_v36  ;;  %v4275_v7 = vpop.eup %4274 }
 0x9b0   : > { %v2822_v40 = vadd.f32 1.0, %v4275_v7 }
 0x9b1   : > { %4276 = vtanh.f32 %v2807_v28 }
 0x9b2   : > { %v2830_v17 = vmul.f32 %v2822_v40, %v2806_v34  ;;  %v3092_v34 = vpop.xlane.xlu1 %3091 }
 0x9b4   : > { %v2797_v14 = vpop.f32.mrf.mxu0 }
 0x9b5   : > { %v2798_v23 = vadd.f32 %v4361_v38, %v2797_v14 }
 0x9b7   : > { %v4277_v15 = vpop.eup %4276  ;;  %v2808_v31 = vmul.f32 0.5, %v2798_v23 }
 0x9b8   : > { %v2823_v5 = vadd.f32 1.0, %v4277_v15 }
 0x9b9   : > { %4278 = vtanh.f32 %v2808_v31 }
 0x9ba   : > { %v2831_v46 = vmul.f32 %v2823_v5, %v2807_v28  ;;  %v3094_v28 = vpop.xlane.xlu1 %3093 }
 0x9bc   : > { %v2836_v3 = vpack.c.bf16 %v2831_v46, %v2830_v17  ;;  %v2799_v20 = vpop.f32.mrf.mxu0 }
 0x9bd   : > { %v2800_v21 = vadd.f32 %v4361_v38, %v2799_v20 }
 0x9be   : > { %2856 = vmatmul.bf16.gmra.mxu1 %v2836_v3 }
 0x9bf   : > { %v2809_v56 = vmul.f32 0.5, %v2800_v21  ;;  %v4279_v24 = vpop.eup %4278 }
 0x9c0   : > { %v2824_v25 = vadd.f32 1.0, %v4279_v24 }
 0x9c1   : > { %4280 = vtanh.f32 %v2809_v56 }
 0x9c2   : > { %v2832_v27 = vmul.f32 %v2824_v25, %v2808_v31  ;;  %v3096_v7 = vpop.xlane.xlu1 %3095 }
 0x9c7   : > { %v4281_v59 = vpop.eup %4280 }
 0x9c8   : > { %v2825_v1 = vadd.f32 1.0, %v4281_v59 }
 0x9ca   : > { %v2833_v58 = vmul.f32 %v2825_v1, %v2809_v56  ;;  %v3098_v40 = vpop.xlane.xlu1 %3097 }
 0x9cc   : > { %v2837_v29 = vpack.c.bf16 %v2833_v58, %v2832_v27 }
 0x9ce   : > { %2861 = vmatmul.bf16.gmra.mxu1 %v2837_v29 }
 0x9d2   : > { %v3100_v14 = vpop.xlane.xlu1 %3099 }
 0x9da   : > { %v5380_v15 = vpop.xlane.xlu1 %3103 }
 0x9e2   : > { %v5382_v23 = vpop.xlane.xlu1 %3105 }
 0xa1b   : > { %v2847_v10 = vpop.f32.mrf.mxu1 }
 0xa1c   : > { %v2848_v50 = vadd.f32 %v4362_v13, %v2847_v10 }
 0xa1e   : > { %v2867_v26 = vsub.f32 %v2848_v50, %v4363_v35 }
 0xa20   : > { %v2875_v51 = vmul.f32 %v2867_v26, %v2867_v26 }
 0xa22   : > { %2883 = vadd.xlane.f32.xlu1 %v2875_v51 }
 0xa23   : > { %v2849_v32 = vpop.f32.mrf.mxu1 }
 0xa24   : > { %v2850_v9 = vadd.f32 %v4362_v13, %v2849_v32 }
 0xa26   : > { %v2868_v39 = vsub.f32 %v2850_v9, %v4364_v37 }
 0xa28   : > { %v2876_v41 = vmul.f32 %v2868_v39, %v2868_v39 }
 0xa2a   : > { %2885 = vadd.xlane.f32.xlu1 %v2876_v41 }
 0xa2b   : > { %v2852_v38 = vpop.f32.mrf.mxu1 }
 0xa2c   : > { %v2853_v19 = vadd.f32 %v4362_v13, %v2852_v38 }
 0xa2e   : > { %v2869_v42 = vsub.f32 %v2853_v19, %v4365_v60 }
 0xa30   : > { %v2877_v45 = vmul.f32 %v2869_v42, %v2869_v42 }
 0xa32   : > { %2887 = vadd.xlane.f32.xlu1 %v2877_v45 }
 0xa33   : > { %v2854_v47 = vpop.f32.mrf.mxu1 }
 0xa34   : > { %v2855_v44 = vadd.f32 %v4362_v13, %v2854_v47 }
 0xa36   : > { %v2870_v48 = vsub.f32 %v2855_v44, %v4366_v43 }
 0xa38   : > { %v2878_v49 = vmul.f32 %v2870_v48, %v2870_v48 }
 0xa3a   : > { %2889 = vadd.xlane.f32.xlu1 %v2878_v49 }
 0xa3b   : > { %v2857_v22 = vpop.f32.mrf.mxu1 }
 0xa3c   : > { %v2858_v30 = vadd.f32 %v4362_v13, %v2857_v22 }
 0xa3e   : > { %v2871_v12 = vsub.f32 %v2858_v30, %v4367_v52 }
 0xa40   : > { %v2879_v57 = vmul.f32 %v2871_v12, %v2871_v12 }
 0xa42   : > { %2891 = vadd.xlane.f32.xlu1 %v2879_v57 }
 0xa43   : > { %v2859_v61 = vpop.f32.mrf.mxu1 }
 0xa44   : > { %v2860_v18 = vadd.f32 %v4362_v13, %v2859_v61  ;;  %v3102_v61 = vpop.xlane.xlu0 %3101 }
 0xa46   : > { %v2872_v0 = vsub.f32 %v2860_v18, %v4368_v63 }
 0xa48   : > { %v2880_v62 = vmul.f32 %v2872_v0, %v2872_v0 }
 0xa4a   : > { %2893 = vadd.xlane.f32.xlu1 %v2880_v62 }
 0xa4b   : > { %v2862_v4 = vpop.f32.mrf.mxu1 }
 0xa4c   : > { %v2863_v54 = vadd.f32 %v4362_v13, %v2862_v4 }
 0xa4e   : > { %v2873_v33 = vsub.f32 %v2863_v54, %v4369_v6 }
 0xa50   : > { %v2881_v53 = vmul.f32 %v2873_v33, %v2873_v33 }
 0xa52   : > { %2895 = vadd.xlane.f32.xlu1 %v2881_v53 }
 0xa53   : > { %v2864_v8 = vpop.f32.mrf.mxu1 }
 0xa54   : > { %v2865_v16 = vadd.f32 %v4362_v13, %v2864_v8 }
 0xa56   : > { %v2874_v11 = vsub.f32 %v2865_v16, %v4370_v55 }
 0xa58   : > { %v2882_v36 = vmul.f32 %v2874_v11, %v2874_v11 }
 0xa5a   : > { %2897 = vadd.xlane.f32.xlu1 %v2882_v36 }
 0xa94   : > { %3107 = vxpose.xlu1.b32.start [1/8] (short) (narrow) %v3092_v34, 8 }
 0xa95   : > { %v2884_v5 = vpop.xlane.xlu1 %2883 }
 0xa96   : > { %4282 = vrsqrt.f32 %v2884_v5  ;;  %vm2906_vm3 = vcmp.eq.f32.partialorder %v2884_v5, inf  ;;  %v2909_v58 = vand.u32 2147483648, %v2884_v5  ;;  %vm2908_vm2 = vcmp.eq.f32.partialorder %v2884_v5, 0.0 }
 0xa9c   : > { %v4283_v17 = vpop.eup %4282  ;;  %3108 = vxpose.xlu1.b32.cont [2/8] (short) (narrow) %v3094_v28, 8 }
 0xa9d   : > { %v2886_v46 = vpop.xlane.xlu1 %2885  ;;  %v2900_v31 = vmul.f32 %v4283_v17, %v2884_v5 }
 0xa9e   : > { %4284 = vrsqrt.f32 %v2886_v46  ;;  %vm2918_vm4 = vcmp.eq.f32.partialorder %v2886_v46, inf  ;;  %v2921_v39 = vand.u32 2147483648, %v2886_v46  ;;  %vm2920_vm5 = vcmp.eq.f32.partialorder %v2886_v46, 0.0 }
 0xa9f   : > { %v2901_v3 = vmul.f32 %v4283_v17, %v2900_v31 }
 0xaa1   : > { %v2902_v20 = vmul.f32 0.5, %v2901_v3 }
 0xaa3   : > { %v2903_v21 = vsub.f32 1.5, %v2902_v20 }
 0xaa4   : > { %v4285_v56 = vpop.eup %4284  ;;  %3109 = vxpose.xlu1.b32.cont [3/8] (short) (narrow) %v3096_v7, 8 }
 0xaa5   : > { %v2888_v24 = vpop.xlane.xlu1 %2887  ;;  %v2904_v25 = vmul.f32 %v4283_v17, %v2903_v21  ;;  %v2912_v59 = vmul.f32 %v4285_v56, %v2886_v46 }
 0xaa6   : > { %4286 = vrsqrt.f32 %v2888_v24  ;;  %vm2930_vm6 = vcmp.eq.f32.partialorder %v2888_v24, inf  ;;  %v2933_v49 = vand.u32 2147483648, %v2888_v24  ;;  %vm2932_vm7 = vcmp.eq.f32.partialorder %v2888_v24, 0.0 }
 0xaa7   : > { %v2905_v1 = vmul.f32 %v2904_v25, %v2884_v5  ;;  %v2913_v27 = vmul.f32 %v4285_v56, %v2912_v59 }
 0xaa9   : > { %v2907_v29 = vsel %vm2906_vm3, %v2884_v5, %v2905_v1  ;;  %v2914_v10 = vmul.f32 0.5, %v2913_v27  ;;  %vm3146_vm3 = vcmask 523264  }
 0xaaa   : > { %v2910_v13 = vsel %vm2908_vm2, %v2909_v58, %v2907_v29 }
 0xaab   : > { %2995 = vxpose.xlu2.b32.start [1/8] (short) (narrow) %v2910_v13, 8  ;;  %v2915_v50 = vsub.f32 1.5, %v2914_v10 }
 0xaac   : > { %v4287_v35 = vpop.eup %4286  ;;  %3110 = vxpose.xlu1.b32.cont [4/8] (short) (narrow) %v3098_v40, 8 }
 0xaad   : > { %v2890_v26 = vpop.xlane.xlu1 %2889  ;;  %v2916_v51 = vmul.f32 %v4285_v56, %v2915_v50  ;;  %v2924_v32 = vmul.f32 %v4287_v35, %v2888_v24 }
 0xaae   : > { %4288 = vrsqrt.f32 %v2890_v26  ;;  %vm2942_vm8 = vcmp.eq.f32.partialorder %v2890_v26, inf  ;;  %v2945_v54 = vand.u32 2147483648, %v2890_v26  ;;  %vm2944_vm9 = vcmp.eq.f32.partialorder %v2890_v26, 0.0 }
 0xaaf   : > { %v2917_v9 = vmul.f32 %v2916_v51, %v2886_v46  ;;  %v2925_v37 = vmul.f32 %v4287_v35, %v2924_v32 }
 0xab1   : > { %v2919_v41 = vsel %vm2918_vm4, %v2886_v46, %v2917_v9  ;;  %v2926_v38 = vmul.f32 0.5, %v2925_v37 }
 0xab2   : > { %v2922_v19 = vsel %vm2920_vm5, %v2921_v39, %v2919_v41 }
 0xab3   : > { %2996 = vxpose.xlu2.b32.cont [2/8] (short) (narrow) %v2922_v19, 8  ;;  %v2927_v60 = vsub.f32 1.5, %v2926_v38  ;;  %v1958_v19 = vpop.trf.xlu2 }
 0xab4   : > { %v4289_v42 = vpop.eup %4288  ;;  %3111 = vxpose.xlu1.b32.cont [5/8] (short) (narrow) %v3100_v14, 8 }
 0xab5   : > { %v2892_v45 = vpop.xlane.xlu1 %2891  ;;  %v2928_v47 = vmul.f32 %v4287_v35, %v2927_v60  ;;  %v2936_v44 = vmul.f32 %v4289_v42, %v2890_v26 }
 0xab6   : > { %4290 = vrsqrt.f32 %v2892_v45  ;;  %vm2954_vm10 = vcmp.eq.f32.partialorder %v2892_v45, inf  ;;  %v2957_v7 = vand.u32 2147483648, %v2892_v45  ;;  %vm2956_vm11 = vcmp.eq.f32.partialorder %v2892_v45, 0.0 }
 0xab7   : > { %v2929_v43 = vmul.f32 %v2928_v47, %v2888_v24  ;;  %v2937_v48 = vmul.f32 %v4289_v42, %v2936_v44 }
 0xab9   : > { %v2931_v22 = vsel %vm2930_vm6, %v2888_v24, %v2929_v43  ;;  %v2938_v30 = vmul.f32 0.5, %v2937_v48 }
 0xaba   : > { %v2934_v52 = vsel %vm2932_vm7, %v2933_v49, %v2931_v22 }
 0xabb   : > { %2997 = vxpose.xlu2.b32.cont [3/8] (short) (narrow) %v2934_v52, 8  ;;  %v2939_v12 = vsub.f32 1.5, %v2938_v30 }
 0xabc   : > { %v4291_v57 = vpop.eup %4290  ;;  %3112 = vxpose.xlu1.b32.cont [6/8] (short) (narrow) %v3102_v61, 8 }
 0xabd   : > { %v2894_v18 = vpop.xlane.xlu1 %2893  ;;  %v2940_v63 = vmul.f32 %v4289_v42, %v2939_v12  ;;  %v2948_v0 = vmul.f32 %v4291_v57, %v2892_v45 }
 0xabe   : > { %4292 = vrsqrt.f32 %v2894_v18  ;;  %vm2966_vm12 = vcmp.eq.f32.partialorder %v2894_v18, inf  ;;  %vm2968_vm13 = vcmp.eq.f32.partialorder %v2894_v18, 0.0 }
 0xabf   : > { %v2941_v62 = vmul.f32 %v2940_v63, %v2890_v26  ;;  %v2949_v4 = vmul.f32 %v4291_v57, %v2948_v0 }
 0xac1   : > { %v2943_v6 = vsel %vm2942_vm8, %v2890_v26, %v2941_v62  ;;  %v2950_v33 = vmul.f32 0.5, %v2949_v4 }
 0xac2   : > { %v2946_v53 = vsel %vm2944_vm9, %v2945_v54, %v2943_v6 }
 0xac3   : > { %2998 = vxpose.xlu2.b32.cont [4/8] (short) (narrow) %v2946_v53, 8  ;;  %v2951_v34 = vsub.f32 1.5, %v2950_v33 }
 0xac4   : > { %v4293_v8 = vpop.eup %4292  ;;  %3113 = vxpose.xlu1.b32.cont [7/8] (short) (narrow) %v5380_v15, 8  ;;  %v2969_v15 = vand.u32 2147483648, %v2894_v18 }
 0xac5   : > { %v2952_v16 = vmul.f32 %v4291_v57, %v2951_v34  ;;  %v2960_v55 = vmul.f32 %v4293_v8, %v2894_v18  ;;  %v2896_v11 = vpop.xlane.xlu1 %2895 }
 0xac6   : > { %4294 = vrsqrt.f32 %v2896_v11  ;;  %vm2978_vm14 = vcmp.eq.f32.partialorder %v2896_v11, inf  ;;  %vm2980_vm15 = vcmp.eq.f32.partialorder %v2896_v11, 0.0 }
 0xac7   : > { %v2953_v36 = vmul.f32 %v2952_v16, %v2892_v45  ;;  %v2961_v28 = vmul.f32 %v4293_v8, %v2960_v55 }
 0xac9   : > { %v2955_v40 = vsel %vm2954_vm10, %v2892_v45, %v2953_v36  ;;  %v2962_v14 = vmul.f32 0.5, %v2961_v28 }
 0xaca   : > { %v2958_v5 = vsel %vm2956_vm11, %v2957_v7, %v2955_v40 }
 0xacb   : > { %2999 = vxpose.xlu2.b32.cont [5/8] (short) (narrow) %v2958_v5, 8  ;;  %v2963_v17 = vsub.f32 1.5, %v2962_v14 }
 0xacc   : > { %v4295_v31 = vpop.eup %4294  ;;  %3114 = vxpose.xlu1.b32.end [8/8] (short) (narrow) %v5382_v23, 8  ;;  %v2981_v23 = vand.u32 2147483648, %v2896_v11 }
 0xacd   : > { %v2964_v46 = vmul.f32 %v4293_v8, %v2963_v17  ;;  %v2898_v3 = vpop.xlane.xlu1 %2897  ;;  %v2972_v21 = vmul.f32 %v4295_v31, %v2896_v11 }
 0xace   : > { %4296 = vrsqrt.f32 %v2898_v3  ;;  %vm2990_vm0 = vcmp.eq.f32.partialorder %v2898_v3, inf  ;;  %v2993_v37 = vand.u32 2147483648, %v2898_v3  ;;  %vm2992_vm1 = vcmp.eq.f32.partialorder %v2898_v3, 0.0 }
 0xacf   : > { %v2965_v20 = vmul.f32 %v2964_v46, %v2894_v18  ;;  %v2973_v24 = vmul.f32 %v4295_v31, %v2972_v21 }
 0xad1   : > { %v2967_v56 = vsel %vm2966_vm12, %v2894_v18, %v2965_v20  ;;  %v2974_v59 = vmul.f32 0.5, %v2973_v24 }
 0xad2   : > { %v2970_v25 = vsel %vm2968_vm13, %v2969_v15, %v2967_v56 }
 0xad3   : > { %3000 = vxpose.xlu2.b32.cont [6/8] (short) (narrow) %v2970_v25, 8  ;;  %v2975_v1 = vsub.f32 1.5, %v2974_v59 }
 0xad4   : > { %v4297_v27 = vpop.eup %4296 }
 0xad5   : > { %v2976_v58 = vmul.f32 %v4295_v31, %v2975_v1  ;;  %v2984_v29 = vmul.f32 %v4297_v27, %v2898_v3 }
 0xad7   : > { %v2977_v10 = vmul.f32 %v2976_v58, %v2896_v11  ;;  %v2985_v13 = vmul.f32 %v4297_v27, %v2984_v29 }
 0xad9   : > { %v2979_v50 = vsel %vm2978_vm14, %v2896_v11, %v2977_v10  ;;  %v2986_v35 = vmul.f32 0.5, %v2985_v13 }
 0xada   : > { %v2982_v26 = vsel %vm2980_vm15, %v2981_v23, %v2979_v50 }
 0xadb   : > { %3001 = vxpose.xlu2.b32.cont [7/8] (short) (narrow) %v2982_v26, 8  ;;  %v2987_v51 = vsub.f32 1.5, %v2986_v35 }
 0xadd   : > { %v2988_v32 = vmul.f32 %v4297_v27, %v2987_v51 }
 0xadf   : > { %v2989_v9 = vmul.f32 %v2988_v32, %v2898_v3 }
 0xae1   : > { %v2991_v39 = vsel %vm2990_vm0, %v2898_v3, %v2989_v9 }
 0xae2   : > { %v2994_v41 = vsel %vm2992_vm1, %v2993_v37, %v2991_v39 }
 0xae3   : > { %3002 = vxpose.xlu2.b32.end [8/8] (short) (narrow) %v2994_v41, 8 }
 0xb38   : > { %v3123_v38 = vpop.trf.xlu1 }
 0xb39   : > { %v3757_v60 = vadd.f32 -4.0, %v3123_v38 }
 0xb3b   : > { %v3140_v42 = vmul.f32 0.5, %v3757_v60 }
 0xb44   : > { %v3011_v45 = vpop.trf.xlu2 }
 0xb45   : > { %v3141_v47 = vadd.f32 %v3140_v42, %v3011_v45 }
 0xb47   : > { %3150 = vrot.lane.b32.xlu0 %v3141_v47, %s4435_s22 }
 0xb4c   : > { %3143 = vrot.lane.b32.xlu2 %v3011_v45, %s4435_s22 }
 0xba6   : > { %v3144_v44 = vpop.permute.xlu2 %3143 }
 0xba7   : > { %v3147_v43 = vsel %vm3146_vm3, %v1958_v19, %v3144_v44 }
 0xba8   : > { %3148 = vst [vmem:[%s293_s13] sm:$0x1] %v3147_v43 }
 0xba9   : > { %4398 = shalt.err (!%p4395_p3)
}
 0xbaa   : > { %3864 = dma.vmem_to_hbm [thread:$0]  (%p4514_p5), %s3173_s15, 16, %s3175_s19, %s3159_s14   ;;  %v3756_v48 = vadd.f32 -4.0, %v5288_v2 }
 0xbab   : > { %p306_p4 = scmp.lt.s32.totalorder %s4497_s28, 1 }
 0xbac   : > { %v2090_v49 = vmul.f32 0.5, %v3756_v48 }
 0xbad   : > { %s5445_s28 = smov (!%p306_p4, %s4497_s28), 1 }
 0xbae   : > { %v2091_v22 = vadd.f32 %v2090_v49, %v1958_v19  ;;  %s308_s16 = scalar_lea.vmem %s5432_s6, %s5445_s28 }
 0xbb9   : > { %v3151_v30 = vpop.permute.xlu0 %3150 }
 0xbba   : > { %v3153_v52 = vsel %vm3146_vm3, %v2091_v22, %v3151_v30 }
 0xbbb   : > { %3154 = vst [vmem:[%s308_s16] sm:$0x1] %v3153_v52 }
 0xbbc PF: > { %p3870_p7 = scmp.ge.s32.totalorder %s4433_s27, 2  ;;  %s3192_s11 = sand.u32 1, %s4421_s24  }
 0xbbd   : > { %s3193_s13 = scalar_lea.sflag [#allocation3], %s3192_s11 }
 0xbbe   : > { %p3867_p5 = pnand %p3870_p7, %p4518_p6 }
 0xbc0   : > { %p3868_p8 = pneg %p3867_p5 }
 0xbc2   : > { %4416 = dma.done.wait (%p3868_p8), %s3193_s13, 16  }
 0xbc3   : > { %4418 = vsyncadd (%p3868_p8), %s3193_s13, 4294967280  ;;  %p18_p9 = scmp.ge.s32.totalorder %s4501_s30, 4   ;;  %s5438_s24 = smov %s4425_s25 }
 0xbc4   : > { %s5439_s25 = smov %s4429_s26  ;;  %s5440_s26 = smov %s4512_s10 }
 0xbc5   : > { %s5441_s27 = smov %s4501_s30  ;;  %20 = sbr.rel (!%p18_p9) target bundleno = 3 (0x3), region = 110 }
 0xbca   :  { %3198 = vsyncpa [#allocation3], 1 }
 0xbcb   :  { %3200 = vsyncpa [#allocation3 + $0x1], 1 }

</bundles_post_ra>
